<compile_context>
chip_gen: v5e
topology: v5e:2x2
jax: 0.10.0
libtpu: 0.0.40
codegen_flags: <defaults>
</compile_context>

<pallas_src>
import functools

import jax
import jax.numpy as jnp
import numpy as np
from jax import lax
from jax.experimental import pallas as pl
from jax.experimental.pallas import tpu as pltpu

BN_EPS = 1e-5
LANES = 128
# Budget scoped VMEM for the smallest-VMEM generation (v7x: 64 MiB physical), with headroom
# for the double-buffered input/output blocks.
VMEM_LIMIT_BYTES = 48 * 1024 * 1024


def _round_up(x, m=LANES):
    return ((x + m - 1) // m) * m


# ----------------------------------------------------------------------------------------------
# Pass 1: 3x3 conv (input pre-padded by 1 pixel, channel-padded) + fused BN statistics
# ----------------------------------------------------------------------------------------------
def _conv3x3_stats_kernel(x_ref, w_ref, conv_ref, stats_ref, *, H, W):
    """One (cout-tile, batch-tile) grid step.

    x_ref:     (TN, H+2, W+2, Cp_in)  compute dtype (bf16 on v6e/v7x), channel-padded, halo'd
    w_ref:     (9*Cp_in, TCo)         compute dtype, single dense RHS tile (tap-major K)
    conv_ref:  (TN, H, W, TCo)        f32 raw (pre-BN) conv output
    stats_ref: (2, TCo)               f32 [sum, sum_of_squares], accumulated across batch tiles
    """
    tn = x_ref.shape[0]
    cp_in = x_ref.shape[-1]
    rows = tn * H * W

    x = x_ref[...]
    # im2col once: nine lane-dense (rows, Cp_in) taps concatenated along K -> a single MXU
    # matmul with K = 9*Cp_in instead of nine tiny K=Cin dots.
    taps = [x[:, dy:dy + H, dx:dx + W, :].reshape(rows, cp_in)
            for dy in range(3) for dx in range(3)]
    patch = jnp.concatenate(taps, axis=1)                                   # (rows, 9*Cp_in)
    acc = jnp.dot(patch, w_ref[...], preferred_element_type=jnp.float32)    # (rows, TCo) f32

    conv_ref[...] = acc.reshape(tn, H, W, acc.shape[-1])

    # BN statistics folded into the conv pass (no separate mean/var passes over the activation).
    @pl.when(pl.program_id(1) == 0)           # first batch tile for this cout tile
    def _():
        stats_ref[...] = jnp.zeros_like(stats_ref)

    stats_ref[0:1, :] += jnp.sum(acc, axis=0, keepdims=True)
    stats_ref[1:2, :] += jnp.sum(acc * acc, axis=0, keepdims=True)


def _conv3x3_stats(xpad, w, *, tn=1, tco=LANES):
    N, Hp, Wp, cp_in = xpad.shape
    H, W = Hp - 2, Wp - 2
    k9, cp_out = w.shape
    assert k9 == 9 * cp_in and N % tn == 0 and cp_out % tco == 0

    grid = (cp_out // tco, N // tn)           # (cout tiles [parallel], batch tiles [arbitrary])
    kernel = functools.partial(_conv3x3_stats_kernel, H=H, W=W)

    conv_raw, stats = pl.pallas_call(
        kernel,
        grid=grid,
        in_specs=[
            pl.BlockSpec((tn, Hp, Wp, cp_in), lambda j, n: (n, 0, 0, 0)),
            pl.BlockSpec((k9, tco), lambda j, n: (0, j)),   # weight tile resident across n
        ],
        out_specs=[
            pl.BlockSpec((tn, H, W, tco), lambda j, n: (n, 0, 0, j)),
            pl.BlockSpec((2, tco), lambda j, n: (0, j)),    # stats accumulator: revisited over n
        ],
        out_shape=(
            jax.ShapeDtypeStruct((N, H, W, cp_out), jnp.float32),
            jax.ShapeDtypeStruct((2, cp_out), jnp.float32),
        ),
        compiler_params=pltpu.CompilerParams(
            dimension_semantics=("parallel", "arbitrary"),
            vmem_limit_bytes=VMEM_LIMIT_BYTES),
    )(xpad, w)
    return conv_raw, stats


# ----------------------------------------------------------------------------------------------
# Pass 2: BatchNorm (global batch stats) + ReLU, optionally emitting a halo-padded activation
# ----------------------------------------------------------------------------------------------
def _bn_relu_kernel(conv_ref, stats_ref, gamma_ref, beta_ref, out_ref, *, count, pad_output):
    tn, H, W, tco = conv_ref.shape
    inv_n = 1.0 / count
    mean = stats_ref[0:1, :] * inv_n                                   # (1, TCo)
    var = jnp.maximum(stats_ref[1:2, :] * inv_n - mean * mean, 0.0)    # biased variance
    scale = gamma_ref[...] * lax.rsqrt(var + BN_EPS)
    shift = beta_ref[...] - mean * scale

    y = jnp.maximum(conv_ref[...] * scale.reshape(1, 1, 1, tco)
                    + shift.reshape(1, 1, 1, tco), 0.0).astype(out_ref.dtype)

    if pad_output:
        # Next conv's input, already spatially padded: zero ONLY the 1-pixel halo.
        zrow = jnp.zeros((tn, 1, W + 2, tco), out_ref.dtype)
        zcol = jnp.zeros((tn, H, 1, tco), out_ref.dtype)
        out_ref[:, 0:1, :, :] = zrow
        out_ref[:, H + 1:H + 2, :, :] = zrow
        out_ref[:, 1:H + 1, 0:1, :] = zcol
        out_ref[:, 1:H + 1, W + 1:W + 2, :] = zcol
        out_ref[:, 1:H + 1, 1:W + 1, :] = y
    else:
        out_ref[...] = y


def _bn_relu(conv_raw, stats, gamma, beta, *, count, pad_output, out_dtype, tn=1, tco=LANES):
    N, H, W, cp = conv_raw.shape
    assert N % tn == 0 and cp % tco == 0
    grid = (cp // tco, N // tn)

    if pad_output:
        out_shape = jax.ShapeDtypeStruct((N, H + 2, W + 2, cp), out_dtype)
        out_spec = pl.BlockSpec((tn, H + 2, W + 2, tco), lambda j, n: (n, 0, 0, j))
    else:
        out_shape = jax.ShapeDtypeStruct((N, H, W, cp), out_dtype)
        out_spec = pl.BlockSpec((tn, H, W, tco), lambda j, n: (n, 0, 0, j))

    kernel = functools.partial(_bn_relu_kernel, count=count, pad_output=pad_output)
    return pl.pallas_call(
        kernel,
        grid=grid,
        in_specs=[
            pl.BlockSpec((tn, H, W, tco), lambda j, n: (n, 0, 0, j)),
            pl.BlockSpec((2, tco), lambda j, n: (0, j)),
            pl.BlockSpec((1, tco), lambda j, n: (0, j)),
            pl.BlockSpec((1, tco), lambda j, n: (0, j)),
        ],
        out_specs=out_spec,
        out_shape=out_shape,
        compiler_params=pltpu.CompilerParams(
            dimension_semantics=("parallel", "parallel"),   # no cross-tile state: megacore-friendly
            vmem_limit_bytes=VMEM_LIMIT_BYTES),
    )(conv_raw, stats, gamma, beta)


# ----------------------------------------------------------------------------------------------
# DoubleConv wrapper (PyTorch NCHW / OIHW layouts at the boundary)
# ----------------------------------------------------------------------------------------------
@functools.partial(jax.jit, static_argnames=("compute_dtype",))
def double_conv(x_nchw, w1_oihw, gamma1, beta1, w2_oihw, gamma2, beta2,
                compute_dtype=jnp.bfloat16):
    """Pallas implementation of DoubleConv.forward (training-mode BN).

    compute_dtype: dtype of the MXU matmul inputs (bf16 recommended on v6e/v7x).
    Accumulation and all BN math stay in f32.
    """
    N, Cin, H, W = x_nchw.shape
    Cmid = w1_oihw.shape[0]
    Cout = w2_oihw.shape[0]
    cp_in, cp_mid, cp_out = _round_up(Cin), _round_up(Cmid), _round_up(Cout)

    # NCHW -> NHWC, cast, 1-pixel halo pad and channel pad to a lane multiple — one fused XLA op.
    xpad = jnp.pad(jnp.transpose(x_nchw, (0, 2, 3, 1)).astype(compute_dtype),
                   ((0, 0), (1, 1), (1, 1), (0, cp_in - Cin)))

    def prep_w(w_oihw, cin_p, cout_p):
        cout, cin = w_oihw.shape[0], w_oihw.shape[1]
        w = jnp.transpose(w_oihw, (2, 3, 1, 0))                         # (3,3,Cin,Cout) HWIO
        w = jnp.pad(w, ((0, 0), (0, 0), (0, cin_p - cin), (0, cout_p - cout)))
        return w.reshape(9 * cin_p, cout_p).astype(compute_dtype)       # tap-major K layout

    def prep_affine(p, cp):
        return jnp.pad(p.astype(jnp.float32), (0, cp - p.shape[0])).reshape(1, cp)

    w1p = prep_w(w1_oihw, cp_in, cp_mid)
    w2p = prep_w(w2_oihw, cp_mid, cp_out)
    g1p, b1p = prep_affine(gamma1, cp_mid), prep_affine(beta1, cp_mid)
    g2p, b2p = prep_affine(gamma2, cp_out), prep_affine(beta2, cp_out)

    count = N * H * W  # BN reduction count (static)

    conv1_raw, stats1 = _conv3x3_stats(xpad, w1p)
    h_pad = _bn_relu(conv1_raw, stats1, g1p, b1p, count=count,
                     pad_output=True, out_dtype=compute_dtype)
    conv2_raw, stats2 = _conv3x3_stats(h_pad, w2p)
    y = _bn_relu(conv2_raw, stats2, g2p, b2p, count=count,
                 pad_output=False, out_dtype=jnp.float32)

    # Drop channel padding, back to PyTorch NCHW layout.
    return jnp.transpose(y[:, :, :, :Cout], (0, 3, 1, 2))


# ----------------------------------------------------------------------------------------------
# Pure-JAX reference (lax.conv + training-mode BN + ReLU), NCHW
# ----------------------------------------------------------------------------------------------
def reference_double_conv(x_nchw, w1, g1, b1, w2, g2, b2):
    def conv_bn_relu(x, w, g, b):
        y = lax.conv_general_dilated(
            x, w, window_strides=(1, 1), padding=((1, 1), (1, 1)),
            dimension_numbers=("NCHW", "OIHW", "NCHW"))
        mean = jnp.mean(y, axis=(0, 2, 3), keepdims=True)
        var = jnp.mean((y - mean) ** 2, axis=(0, 2, 3), keepdims=True)
        y = (y - mean) * lax.rsqrt(var + BN_EPS) * g.reshape(1, -1, 1, 1) \
            + b.reshape(1, -1, 1, 1)
        return jnp.maximum(y, 0.0)

    return conv_bn_relu(conv_bn_relu(x_nchw, w1, g1, b1), w2, g2, b2)


if __name__ == "__main__":
    # Small shapes consistent with DoubleConv(in_channels=4, out_channels=8)
    N, Cin, H, W = 2, 4, 16, 16
    Cmid = Cout = 8

    key = jax.random.PRNGKey(0)
    k_x, k_w1, k_w2, k_g1, k_b1, k_g2, k_b2 = jax.random.split(key, 7)

    x = jax.random.normal(k_x, (N, Cin, H, W), jnp.float32)
    # Conv2d weights (Cout, Cin, 3, 3), bias=False
    w1 = jax.random.normal(k_w1, (Cmid, Cin, 3, 3), jnp.float32) * 0.1
    w2 = jax.random.normal(k_w2, (Cout, Cmid, 3, 3), jnp.float32) * 0.1
    # BatchNorm2d affine params (PyTorch default is ones/zeros; randomized deterministically)
    gamma1 = 1.0 + 0.1 * jax.random.normal(k_g1, (Cmid,), jnp.float32)
    beta1 = 0.1 * jax.random.normal(k_b1, (Cmid,), jnp.float32)
    gamma2 = 1.0 + 0.1 * jax.random.normal(k_g2, (Cout,), jnp.float32)
    beta2 = 0.1 * jax.random.normal(k_b2, (Cout,), jnp.float32)

    ref = np.asarray(jax.block_until_ready(
        reference_double_conv(x, w1, gamma1, beta1, w2, gamma2, beta2)))

    # f32 MXU-input path: tight check against the f32 reference.
    out_f32 = jax.block_until_ready(
        double_conv(x, w1, gamma1, beta1, w2, gamma2, beta2, compute_dtype=jnp.float32))
    np.testing.assert_allclose(np.asarray(out_f32), ref, atol=5e-4, rtol=5e-4)

    # bf16 MXU-input path (recommended on v6e/v7x; f32 accumulation + f32 BN math):
    # looser tolerance only because the matmul *inputs* are bf16-quantized.
    out_bf16 = jax.block_until_ready(
        double_conv(x, w1, gamma1, beta1, w2, gamma2, beta2, compute_dtype=jnp.bfloat16))
    np.testing.assert_allclose(np.asarray(out_bf16), ref, atol=5e-2, rtol=5e-2)

    print("KERNEL_OK")
</pallas_src>

<mosaic_0001>
module attributes {stable_mosaic.version = 11 : i64} {
  func.func @_conv3x3_stats_kernel(%arg0: i32, %arg1: i32, %arg2: memref<1x18x18x128xf32, #tpu.memory_space<vmem>>, %arg3: memref<1152x128xf32, #tpu.memory_space<vmem>>, %arg4: memref<1x16x16x128xf32, #tpu.memory_space<vmem>>, %arg5: memref<2x128xf32, #tpu.memory_space<vmem>>) attributes {dimension_semantics = [#tpu.dimension_semantics<parallel>, #tpu.dimension_semantics<arbitrary>], iteration_bounds = array<i64: 1, 2>, scalar_prefetch = 0 : i64, scratch_operands = 0 : i64, tpu.core_type = #tpu.core_type<tc>, window_params = [{transform_indices = @transform_0, window_bounds = array<i64: 1, 18, 18, 128>}, {transform_indices = @transform_1, window_bounds = array<i64: 1152, 128>}, {transform_indices = @transform_2, window_bounds = array<i64: 1, 16, 16, 128>}, {transform_indices = @transform_3, window_bounds = array<i64: 2, 128>}]} {
    %c0 = arith.constant 0 : index
    %c0_0 = arith.constant 0 : index
    %c0_1 = arith.constant 0 : index
    %c0_2 = arith.constant 0 : index
    %0 = vector.load %arg2[%c0, %c0_0, %c0_1, %c0_2] : memref<1x18x18x128xf32, #tpu.memory_space<vmem>>, vector<1x18x18x128xf32>
    %1 = vector.extract_strided_slice %0 {offsets = [0, 0, 0, 0], sizes = [1, 16, 16, 128], strides = [1, 1, 1, 1]} : vector<1x18x18x128xf32> to vector<1x16x16x128xf32>
    %2 = vector.shape_cast %1 : vector<1x16x16x128xf32> to vector<256x128xf32>
    %3 = vector.extract_strided_slice %0 {offsets = [0, 0, 1, 0], sizes = [1, 16, 16, 128], strides = [1, 1, 1, 1]} : vector<1x18x18x128xf32> to vector<1x16x16x128xf32>
    %4 = vector.shape_cast %3 : vector<1x16x16x128xf32> to vector<256x128xf32>
    %5 = vector.extract_strided_slice %0 {offsets = [0, 0, 2, 0], sizes = [1, 16, 16, 128], strides = [1, 1, 1, 1]} : vector<1x18x18x128xf32> to vector<1x16x16x128xf32>
    %6 = vector.shape_cast %5 : vector<1x16x16x128xf32> to vector<256x128xf32>
    %7 = vector.extract_strided_slice %0 {offsets = [0, 1, 0, 0], sizes = [1, 16, 16, 128], strides = [1, 1, 1, 1]} : vector<1x18x18x128xf32> to vector<1x16x16x128xf32>
    %8 = vector.shape_cast %7 : vector<1x16x16x128xf32> to vector<256x128xf32>
    %9 = vector.extract_strided_slice %0 {offsets = [0, 1, 1, 0], sizes = [1, 16, 16, 128], strides = [1, 1, 1, 1]} : vector<1x18x18x128xf32> to vector<1x16x16x128xf32>
    %10 = vector.shape_cast %9 : vector<1x16x16x128xf32> to vector<256x128xf32>
    %11 = vector.extract_strided_slice %0 {offsets = [0, 1, 2, 0], sizes = [1, 16, 16, 128], strides = [1, 1, 1, 1]} : vector<1x18x18x128xf32> to vector<1x16x16x128xf32>
    %12 = vector.shape_cast %11 : vector<1x16x16x128xf32> to vector<256x128xf32>
    %13 = vector.extract_strided_slice %0 {offsets = [0, 2, 0, 0], sizes = [1, 16, 16, 128], strides = [1, 1, 1, 1]} : vector<1x18x18x128xf32> to vector<1x16x16x128xf32>
    %14 = vector.shape_cast %13 : vector<1x16x16x128xf32> to vector<256x128xf32>
    %15 = vector.extract_strided_slice %0 {offsets = [0, 2, 1, 0], sizes = [1, 16, 16, 128], strides = [1, 1, 1, 1]} : vector<1x18x18x128xf32> to vector<1x16x16x128xf32>
    %16 = vector.shape_cast %15 : vector<1x16x16x128xf32> to vector<256x128xf32>
    %17 = vector.extract_strided_slice %0 {offsets = [0, 2, 2, 0], sizes = [1, 16, 16, 128], strides = [1, 1, 1, 1]} : vector<1x18x18x128xf32> to vector<1x16x16x128xf32>
    %18 = vector.shape_cast %17 : vector<1x16x16x128xf32> to vector<256x128xf32>
    %19 = tpu.concatenate %2, %4, %6, %8, %10, %12, %14, %16, %18 in 1 : vector<256x128xf32>, vector<256x128xf32>, vector<256x128xf32>, vector<256x128xf32>, vector<256x128xf32>, vector<256x128xf32>, vector<256x128xf32>, vector<256x128xf32>, vector<256x128xf32> -> vector<256x1152xf32>
    %c0_3 = arith.constant 0 : index
    %c0_4 = arith.constant 0 : index
    %20 = vector.load %arg3[%c0_3, %c0_4] : memref<1152x128xf32, #tpu.memory_space<vmem>>, vector<1152x128xf32>
    %cst = arith.constant dense<0.000000e+00> : vector<256x128xf32>
    %21 = tpu.matmul %19, %20, %cst {dimension_numbers = #tpu.dot_dimension_numbers<[1], [0], [0], [1], [0, 0, 1, 1], [], []>} : vector<256x1152xf32>, vector<1152x128xf32>, vector<256x128xf32> -> vector<256x128xf32>
    %22 = vector.shape_cast %21 : vector<256x128xf32> to vector<1x16x16x128xf32>
    %c0_5 = arith.constant 0 : index
    %c0_6 = arith.constant 0 : index
    %c0_7 = arith.constant 0 : index
    %c0_8 = arith.constant 0 : index
    %23 = vector.load %arg4[%c0_5, %c0_6, %c0_7, %c0_8] : memref<1x16x16x128xf32, #tpu.memory_space<vmem>>, vector<1x16x16x128xf32>
    tpu.vector_store %arg4[%c0_5, %c0_6, %c0_7, %c0_8], %22 {strides = array<i32>} : memref<1x16x16x128xf32, #tpu.memory_space<vmem>>, vector<1x16x16x128xf32>,
    %c0_i32 = arith.constant 0 : i32
    %24 = arith.cmpi eq, %arg1, %c0_i32 : i32
    %25 = arith.extui %24 : i1 to i32
    %c0_i32_9 = arith.constant 0 : i32
    %26 = arith.cmpi ne, %25, %c0_i32_9 : i32
    scf.if %26 {
      %cst_19 = arith.constant 0.000000e+00 : f32
      %38 = vector.broadcast %cst_19 : f32 to vector<2x128xf32>
      %c0_20 = arith.constant 0 : index
      %c0_21 = arith.constant 0 : index
      %39 = vector.load %arg5[%c0_20, %c0_21] : memref<2x128xf32, #tpu.memory_space<vmem>>, vector<2x128xf32>
      tpu.vector_store %arg5[%c0_20, %c0_21], %38 {strides = array<i32>} : memref<2x128xf32, #tpu.memory_space<vmem>>, vector<2x128xf32>,
    } else {
    }
    %c0_10 = arith.constant 0 : index
    %c0_11 = arith.constant 0 : index
    %27 = vector.load %arg5[%c0_10, %c0_11] : memref<2x128xf32, #tpu.memory_space<vmem>>, vector<1x128xf32>
    %cst_12 = arith.constant dense<0.000000e+00> : vector<128xf32>
    %28 = vector.multi_reduction <add>, %21, %cst_12 [0] : vector<256x128xf32> to vector<128xf32>
    %29 = vector.shape_cast %28 : vector<128xf32> to vector<1x128xf32>
    %30 = arith.addf %27, %29 : vector<1x128xf32>
    %c0_13 = arith.constant 0 : index
    %c0_14 = arith.constant 0 : index
    %31 = vector.load %arg5[%c0_13, %c0_14] : memref<2x128xf32, #tpu.memory_space<vmem>>, vector<1x128xf32>
    tpu.vector_store %arg5[%c0_13, %c0_14], %30 {strides = array<i32>} : memref<2x128xf32, #tpu.memory_space<vmem>>, vector<1x128xf32>,
    %c1 = arith.constant 1 : index
    %c0_15 = arith.constant 0 : index
    %32 = vector.load %arg5[%c1, %c0_15] : memref<2x128xf32, #tpu.memory_space<vmem>>, vector<1x128xf32>
    %33 = arith.mulf %21, %21 : vector<256x128xf32>
    %cst_16 = arith.constant dense<0.000000e+00> : vector<128xf32>
    %34 = vector.multi_reduction <add>, %33, %cst_16 [0] : vector<256x128xf32> to vector<128xf32>
    %35 = vector.shape_cast %34 : vector<128xf32> to vector<1x128xf32>
    %36 = arith.addf %32, %35 : vector<1x128xf32>
    %c1_17 = arith.constant 1 : index
    %c0_18 = arith.constant 0 : index
    %37 = vector.load %arg5[%c1_17, %c0_18] : memref<2x128xf32, #tpu.memory_space<vmem>>, vector<1x128xf32>
    tpu.vector_store %arg5[%c1_17, %c0_18], %36 {strides = array<i32>} : memref<2x128xf32, #tpu.memory_space<vmem>>, vector<1x128xf32>,
    return
  }
  func.func @transform_0(%arg0: i32, %arg1: i32) -> (i32, i32, i32, i32) {
    %c0_i32 = arith.constant 0 : i32
    %c0_i32_0 = arith.constant 0 : i32
    %c0_i32_1 = arith.constant 0 : i32
    %c0_i32_2 = arith.constant 0 : i32
    return %arg1, %c0_i32, %c0_i32_0, %c0_i32_1 : i32, i32, i32, i32
  }
  func.func @transform_1(%arg0: i32, %arg1: i32) -> (i32, i32) {
    %c0_i32 = arith.constant 0 : i32
    %c0_i32_0 = arith.constant 0 : i32
    return %c0_i32, %arg0 : i32, i32
  }
  func.func @transform_2(%arg0: i32, %arg1: i32) -> (i32, i32, i32, i32) {
    %c0_i32 = arith.constant 0 : i32
    %c0_i32_0 = arith.constant 0 : i32
    %c0_i32_1 = arith.constant 0 : i32
    return %arg1, %c0_i32, %c0_i32_0, %arg0 : i32, i32, i32, i32
  }
  func.func @transform_3(%arg0: i32, %arg1: i32) -> (i32, i32) {
    %c0_i32 = arith.constant 0 : i32
    %c0_i32_0 = arith.constant 0 : i32
    return %c0_i32, %arg0 : i32, i32
  }
}

module attributes {stable_mosaic.version = 11 : i64} {
  func.func @_bn_relu_kernel(%arg0: i32, %arg1: i32, %arg2: memref<1x16x16x128xf32, #tpu.memory_space<vmem>>, %arg3: memref<2x128xf32, #tpu.memory_space<vmem>>, %arg4: memref<1x128xf32, #tpu.memory_space<vmem>>, %arg5: memref<1x128xf32, #tpu.memory_space<vmem>>, %arg6: memref<1x18x18x128xf32, #tpu.memory_space<vmem>>) attributes {dimension_semantics = [#tpu.dimension_semantics<parallel>, #tpu.dimension_semantics<parallel>], iteration_bounds = array<i64: 1, 2>, scalar_prefetch = 0 : i64, scratch_operands = 0 : i64, tpu.core_type = #tpu.core_type<tc>, window_params = [{transform_indices = @transform_0, window_bounds = array<i64: 1, 16, 16, 128>}, {transform_indices = @transform_1, window_bounds = array<i64: 2, 128>}, {transform_indices = @transform_2, window_bounds = array<i64: 1, 128>}, {transform_indices = @transform_3, window_bounds = array<i64: 1, 128>}, {transform_indices = @transform_4, window_bounds = array<i64: 1, 18, 18, 128>}]} {
    %c0 = arith.constant 0 : index
    %c0_0 = arith.constant 0 : index
    %0 = vector.load %arg3[%c0, %c0_0] : memref<2x128xf32, #tpu.memory_space<vmem>>, vector<1x128xf32>
    %cst = arith.constant 0.001953125 : f32
    %1 = vector.broadcast %cst : f32 to vector<1x128xf32>
    %2 = arith.mulf %0, %1 : vector<1x128xf32>
    %c1 = arith.constant 1 : index
    %c0_1 = arith.constant 0 : index
    %3 = vector.load %arg3[%c1, %c0_1] : memref<2x128xf32, #tpu.memory_space<vmem>>, vector<1x128xf32>
    %cst_2 = arith.constant 0.001953125 : f32
    %4 = vector.broadcast %cst_2 : f32 to vector<1x128xf32>
    %5 = arith.mulf %3, %4 : vector<1x128xf32>
    %6 = arith.mulf %2, %2 : vector<1x128xf32>
    %7 = arith.subf %5, %6 : vector<1x128xf32>
    %cst_3 = arith.constant 0.000000e+00 : f32
    %8 = vector.broadcast %cst_3 : f32 to vector<1x128xf32>
    %9 = arith.maximumf %7, %8 : vector<1x128xf32>
    %c0_4 = arith.constant 0 : index
    %c0_5 = arith.constant 0 : index
    %10 = vector.load %arg4[%c0_4, %c0_5] : memref<1x128xf32, #tpu.memory_space<vmem>>, vector<1x128xf32>
    %cst_6 = arith.constant 9.99999974E-6 : f32
    %11 = vector.broadcast %cst_6 : f32 to vector<1x128xf32>
    %12 = arith.addf %9, %11 : vector<1x128xf32>
    %13 = math.rsqrt %12 : vector<1x128xf32>
    %14 = arith.mulf %10, %13 : vector<1x128xf32>
    %c0_7 = arith.constant 0 : index
    %c0_8 = arith.constant 0 : index
    %15 = vector.load %arg5[%c0_7, %c0_8] : memref<1x128xf32, #tpu.memory_space<vmem>>, vector<1x128xf32>
    %16 = arith.mulf %2, %14 : vector<1x128xf32>
    %17 = arith.subf %15, %16 : vector<1x128xf32>
    %c0_9 = arith.constant 0 : index
    %c0_10 = arith.constant 0 : index
    %c0_11 = arith.constant 0 : index
    %c0_12 = arith.constant 0 : index
    %18 = vector.load %arg2[%c0_9, %c0_10, %c0_11, %c0_12] : memref<1x16x16x128xf32, #tpu.memory_space<vmem>>, vector<1x16x16x128xf32>
    %19 = vector.shape_cast %14 : vector<1x128xf32> to vector<1x1x1x128xf32>
    %20 = vector.broadcast %19 : vector<1x1x1x128xf32> to vector<1x16x16x128xf32>
    %21 = arith.mulf %18, %20 : vector<1x16x16x128xf32>
    %22 = vector.shape_cast %17 : vector<1x128xf32> to vector<1x1x1x128xf32>
    %23 = vector.broadcast %22 : vector<1x1x1x128xf32> to vector<1x16x16x128xf32>
    %24 = arith.addf %21, %23 : vector<1x16x16x128xf32>
    %cst_13 = arith.constant 0.000000e+00 : f32
    %25 = vector.broadcast %cst_13 : f32 to vector<1x16x16x128xf32>
    %26 = arith.maximumf %24, %25 : vector<1x16x16x128xf32>
    %cst_14 = arith.constant 0.000000e+00 : f32
    %27 = vector.broadcast %cst_14 : f32 to vector<1x1x18x128xf32>
    %cst_15 = arith.constant 0.000000e+00 : f32
    %28 = vector.broadcast %cst_15 : f32 to vector<1x16x1x128xf32>
    %c0_16 = arith.constant 0 : index
    %c0_17 = arith.constant 0 : index
    %c0_18 = arith.constant 0 : index
    %c0_19 = arith.constant 0 : index
    %29 = vector.load %arg6[%c0_16, %c0_17, %c0_18, %c0_19] : memref<1x18x18x128xf32, #tpu.memory_space<vmem>>, vector<1x1x18x128xf32>
    tpu.vector_store %arg6[%c0_16, %c0_17, %c0_18, %c0_19], %27 {strides = array<i32>} : memref<1x18x18x128xf32, #tpu.memory_space<vmem>>, vector<1x1x18x128xf32>,
    %c0_20 = arith.constant 0 : index
    %c17 = arith.constant 17 : index
    %c0_21 = arith.constant 0 : index
    %c0_22 = arith.constant 0 : index
    %30 = vector.load %arg6[%c0_20, %c17, %c0_21, %c0_22] : memref<1x18x18x128xf32, #tpu.memory_space<vmem>>, vector<1x1x18x128xf32>
    tpu.vector_store %arg6[%c0_20, %c17, %c0_21, %c0_22], %27 {strides = array<i32>} : memref<1x18x18x128xf32, #tpu.memory_space<vmem>>, vector<1x1x18x128xf32>,
    %c0_23 = arith.constant 0 : index
    %c1_24 = arith.constant 1 : index
    %c0_25 = arith.constant 0 : index
    %c0_26 = arith.constant 0 : index
    %31 = vector.load %arg6[%c0_23, %c1_24, %c0_25, %c0_26] : memref<1x18x18x128xf32, #tpu.memory_space<vmem>>, vector<1x16x1x128xf32>
    tpu.vector_store %arg6[%c0_23, %c1_24, %c0_25, %c0_26], %28 {strides = array<i32>} : memref<1x18x18x128xf32, #tpu.memory_space<vmem>>, vector<1x16x1x128xf32>,
    %c0_27 = arith.constant 0 : index
    %c1_28 = arith.constant 1 : index
    %c17_29 = arith.constant 17 : index
    %c0_30 = arith.constant 0 : index
    %32 = vector.load %arg6[%c0_27, %c1_28, %c17_29, %c0_30] : memref<1x18x18x128xf32, #tpu.memory_space<vmem>>, vector<1x16x1x128xf32>
    tpu.vector_store %arg6[%c0_27, %c1_28, %c17_29, %c0_30], %28 {strides = array<i32>} : memref<1x18x18x128xf32, #tpu.memory_space<vmem>>, vector<1x16x1x128xf32>,
    %c0_31 = arith.constant 0 : index
    %c1_32 = arith.constant 1 : index
    %c1_33 = arith.constant 1 : index
    %c0_34 = arith.constant 0 : index
    %33 = vector.load %arg6[%c0_31, %c1_32, %c1_33, %c0_34] : memref<1x18x18x128xf32, #tpu.memory_space<vmem>>, vector<1x16x16x128xf32>
    tpu.vector_store %arg6[%c0_31, %c1_32, %c1_33, %c0_34], %26 {strides = array<i32>} : memref<1x18x18x128xf32, #tpu.memory_space<vmem>>, vector<1x16x16x128xf32>,
    return
  }
  func.func @transform_0(%arg0: i32, %arg1: i32) -> (i32, i32, i32, i32) {
    %c0_i32 = arith.constant 0 : i32
    %c0_i32_0 = arith.constant 0 : i32
    %c0_i32_1 = arith.constant 0 : i32
    return %arg1, %c0_i32, %c0_i32_0, %arg0 : i32, i32, i32, i32
  }
  func.func @transform_1(%arg0: i32, %arg1: i32) -> (i32, i32) {
    %c0_i32 = arith.constant 0 : i32
    %c0_i32_0 = arith.constant 0 : i32
    return %c0_i32, %arg0 : i32, i32
  }
  func.func @transform_2(%arg0: i32, %arg1: i32) -> (i32, i32) {
    %c0_i32 = arith.constant 0 : i32
    %c0_i32_0 = arith.constant 0 : i32
    return %c0_i32, %arg0 : i32, i32
  }
  func.func @transform_3(%arg0: i32, %arg1: i32) -> (i32, i32) {
    %c0_i32 = arith.constant 0 : i32
    %c0_i32_0 = arith.constant 0 : i32
    return %c0_i32, %arg0 : i32, i32
  }
  func.func @transform_4(%arg0: i32, %arg1: i32) -> (i32, i32, i32, i32) {
    %c0_i32 = arith.constant 0 : i32
    %c0_i32_0 = arith.constant 0 : i32
    %c0_i32_1 = arith.constant 0 : i32
    return %arg1, %c0_i32, %c0_i32_0, %arg0 : i32, i32, i32, i32
  }
}

module attributes {stable_mosaic.version = 11 : i64} {
  func.func @_bn_relu_kernel(%arg0: i32, %arg1: i32, %arg2: memref<1x16x16x128xf32, #tpu.memory_space<vmem>>, %arg3: memref<2x128xf32, #tpu.memory_space<vmem>>, %arg4: memref<1x128xf32, #tpu.memory_space<vmem>>, %arg5: memref<1x128xf32, #tpu.memory_space<vmem>>, %arg6: memref<1x16x16x128xf32, #tpu.memory_space<vmem>>) attributes {dimension_semantics = [#tpu.dimension_semantics<parallel>, #tpu.dimension_semantics<parallel>], iteration_bounds = array<i64: 1, 2>, scalar_prefetch = 0 : i64, scratch_operands = 0 : i64, tpu.core_type = #tpu.core_type<tc>, window_params = [{transform_indices = @transform_0, window_bounds = array<i64: 1, 16, 16, 128>}, {transform_indices = @transform_1, window_bounds = array<i64: 2, 128>}, {transform_indices = @transform_2, window_bounds = array<i64: 1, 128>}, {transform_indices = @transform_3, window_bounds = array<i64: 1, 128>}, {transform_indices = @transform_4, window_bounds = array<i64: 1, 16, 16, 128>}]} {
    %c0 = arith.constant 0 : index
    %c0_0 = arith.constant 0 : index
    %0 = vector.load %arg3[%c0, %c0_0] : memref<2x128xf32, #tpu.memory_space<vmem>>, vector<1x128xf32>
    %cst = arith.constant 0.001953125 : f32
    %1 = vector.broadcast %cst : f32 to vector<1x128xf32>
    %2 = arith.mulf %0, %1 : vector<1x128xf32>
    %c1 = arith.constant 1 : index
    %c0_1 = arith.constant 0 : index
    %3 = vector.load %arg3[%c1, %c0_1] : memref<2x128xf32, #tpu.memory_space<vmem>>, vector<1x128xf32>
    %cst_2 = arith.constant 0.001953125 : f32
    %4 = vector.broadcast %cst_2 : f32 to vector<1x128xf32>
    %5 = arith.mulf %3, %4 : vector<1x128xf32>
    %6 = arith.mulf %2, %2 : vector<1x128xf32>
    %7 = arith.subf %5, %6 : vector<1x128xf32>
    %cst_3 = arith.constant 0.000000e+00 : f32
    %8 = vector.broadcast %cst_3 : f32 to vector<1x128xf32>
    %9 = arith.maximumf %7, %8 : vector<1x128xf32>
    %c0_4 = arith.constant 0 : index
    %c0_5 = arith.constant 0 : index
    %10 = vector.load %arg4[%c0_4, %c0_5] : memref<1x128xf32, #tpu.memory_space<vmem>>, vector<1x128xf32>
    %cst_6 = arith.constant 9.99999974E-6 : f32
    %11 = vector.broadcast %cst_6 : f32 to vector<1x128xf32>
    %12 = arith.addf %9, %11 : vector<1x128xf32>
    %13 = math.rsqrt %12 : vector<1x128xf32>
    %14 = arith.mulf %10, %13 : vector<1x128xf32>
    %c0_7 = arith.constant 0 : index
    %c0_8 = arith.constant 0 : index
    %15 = vector.load %arg5[%c0_7, %c0_8] : memref<1x128xf32, #tpu.memory_space<vmem>>, vector<1x128xf32>
    %16 = arith.mulf %2, %14 : vector<1x128xf32>
    %17 = arith.subf %15, %16 : vector<1x128xf32>
    %c0_9 = arith.constant 0 : index
    %c0_10 = arith.constant 0 : index
    %c0_11 = arith.constant 0 : index
    %c0_12 = arith.constant 0 : index
    %18 = vector.load %arg2[%c0_9, %c0_10, %c0_11, %c0_12] : memref<1x16x16x128xf32, #tpu.memory_space<vmem>>, vector<1x16x16x128xf32>
    %19 = vector.shape_cast %14 : vector<1x128xf32> to vector<1x1x1x128xf32>
    %20 = vector.broadcast %19 : vector<1x1x1x128xf32> to vector<1x16x16x128xf32>
    %21 = arith.mulf %18, %20 : vector<1x16x16x128xf32>
    %22 = vector.shape_cast %17 : vector<1x128xf32> to vector<1x1x1x128xf32>
    %23 = vector.broadcast %22 : vector<1x1x1x128xf32> to vector<1x16x16x128xf32>
    %24 = arith.addf %21, %23 : vector<1x16x16x128xf32>
    %cst_13 = arith.constant 0.000000e+00 : f32
    %25 = vector.broadcast %cst_13 : f32 to vector<1x16x16x128xf32>
    %26 = arith.maximumf %24, %25 : vector<1x16x16x128xf32>
    %c0_14 = arith.constant 0 : index
    %c0_15 = arith.constant 0 : index
    %c0_16 = arith.constant 0 : index
    %c0_17 = arith.constant 0 : index
    %27 = vector.load %arg6[%c0_14, %c0_15, %c0_16, %c0_17] : memref<1x16x16x128xf32, #tpu.memory_space<vmem>>, vector<1x16x16x128xf32>
    tpu.vector_store %arg6[%c0_14, %c0_15, %c0_16, %c0_17], %26 {strides = array<i32>} : memref<1x16x16x128xf32, #tpu.memory_space<vmem>>, vector<1x16x16x128xf32>,
    return
  }
  func.func @transform_0(%arg0: i32, %arg1: i32) -> (i32, i32, i32, i32) {
    %c0_i32 = arith.constant 0 : i32
    %c0_i32_0 = arith.constant 0 : i32
    %c0_i32_1 = arith.constant 0 : i32
    return %arg1, %c0_i32, %c0_i32_0, %arg0 : i32, i32, i32, i32
  }
  func.func @transform_1(%arg0: i32, %arg1: i32) -> (i32, i32) {
    %c0_i32 = arith.constant 0 : i32
    %c0_i32_0 = arith.constant 0 : i32
    return %c0_i32, %arg0 : i32, i32
  }
  func.func @transform_2(%arg0: i32, %arg1: i32) -> (i32, i32) {
    %c0_i32 = arith.constant 0 : i32
    %c0_i32_0 = arith.constant 0 : i32
    return %c0_i32, %arg0 : i32, i32
  }
  func.func @transform_3(%arg0: i32, %arg1: i32) -> (i32, i32) {
    %c0_i32 = arith.constant 0 : i32
    %c0_i32_0 = arith.constant 0 : i32
    return %c0_i32, %arg0 : i32, i32
  }
  func.func @transform_4(%arg0: i32, %arg1: i32) -> (i32, i32, i32, i32) {
    %c0_i32 = arith.constant 0 : i32
    %c0_i32_0 = arith.constant 0 : i32
    %c0_i32_1 = arith.constant 0 : i32
    return %arg1, %c0_i32, %c0_i32_0, %arg0 : i32, i32, i32, i32
  }
}

</mosaic_0001>

<bundles_post_ra>
// kernel: double_conv.7
= control target key start
LH: loop header
LB: loop body
LE: loop exit
PB: predicated region body
PF: predicated region fallthrough
CT: control target
= control target key end

     0   :  { %s677_s15 = smov 0   ;;  %s679_s16 = smov 0   ;;  %s865_s0 = inlined_call_operand.vmem [shape: f32[2,16,16,128], index: 0, kind: input, shape index: {}]   ;;  %s866_s1 = inlined_call_operand.vmem [shape: f32[2,128], index: 1, kind: input, shape index: {}]   ;;  %s867_s2 = inlined_call_operand.vmem [shape: f32[1,128], index: 2, kind: input, shape index: {}]   ;;  %s868_s3 = inlined_call_operand.vmem [shape: f32[1,128], index: 3, kind: input, shape index: {}]   ;;  %s869_s4 = inlined_call_operand.vmem [shape: f32[2,16,16,128], index: 4, kind: output, shape index: {}]  }
   0x1   :  { %s681_s17 = smov 0  }
   0x2 LB: > { %s23_s18 = sadd.s32 1, %s646_s16  ;;  %p593_p0 = scmp.ge.s32.totalorder %s650_s17, 1  ;;  %s650_s17 = sphi %s681_s17, %s14_s17   ;;  %s646_s16 = sphi %s679_s16, %s871_s16   ;;  %s642_s15 = sphi %s677_s15, %s870_s15  }
   0x3   : > { %p24_p1 = scmp.ge.s32.totalorder %s23_s18, 2  ;;  %p206_p2 = scmp.lt.s32.totalorder %s650_s17, 3 }
   0x5   : > { %s873_s18 = smov (%p24_p1, %s23_s18), 0  ;;  %p207_p3 = pnand %p593_p0, %p206_p2 }
   0x6   : > { %p248_p4 = scmp.lt.s32.totalorder (!%p207_p3), %s642_s15, 1 }
   0x7   : > { %210 = sbr.rel (%p207_p3) target bundleno = 85 (0x55), region = 36 }
   0xc   : > { %v274_v0 = vld [vmem:[%s866_s1] sm:$0x1]  ;;  %v276_v1 = vld [vmem:[%s866_s1 + $0x1] sm:$0x1]  ;;  %s875_s15 = smov (!%p248_p4, %s642_s15), 1 }
   0xd   : > { %v275_v2 = vmul.f32 0.001953125, %v274_v0  ;;  %v277_v3 = vmul.f32 0.001953125, %v276_v1  ;;  %s600_s23 = sshll.u32 %s875_s15, 8  ;;  %v281_v13 = vld [vmem:[%s867_s2] sm:$0x1] }
   0xe   : > { %s712_s28 = scalar_lea.vmem %s865_s0, %s600_s23  ;;  %v294_v17 = vld [vmem:[%s868_s3] sm:$0x1]  ;;  %s751_s7 = scalar_lea.vmem %s869_s4, %s600_s23 }
   0xf   : > { %v278_v4 = vmul.f32 %v275_v2, %v275_v2  ;;  %v297_v18 = vld [vmem:[%s712_s28] sm:$0xff]  ;;  %v298_v19 = vld [vmem:[%s712_s28 + $0x8] sm:$0xff]  ;;  %v299_v20 = vld [vmem:[%s712_s28 + $0x10] sm:$0xff] }
  0x10   : > { %v300_v23 = vld [vmem:[%s712_s28 + $0x18] sm:$0xff]  ;;  %v301_v24 = vld [vmem:[%s712_s28 + $0x20] sm:$0xff]  ;;  %v302_v25 = vld [vmem:[%s712_s28 + $0x28] sm:$0xff] }
  0x11   : > { %v279_v5 = vsub.f32 %v277_v3, %v278_v4  ;;  %v303_v26 = vld [vmem:[%s712_s28 + $0x30] sm:$0xff]  ;;  %v304_v31 = vld [vmem:[%s712_s28 + $0x38] sm:$0xff]  ;;  %v305_v32 = vld [vmem:[%s712_s28 + $0x40] sm:$0xff] }
  0x12   : > { %v306_v38 = vld [vmem:[%s712_s28 + $0x48] sm:$0xff]  ;;  %v307_v39 = vld [vmem:[%s712_s28 + $0x50] sm:$0xff]  ;;  %v308_v46 = vld [vmem:[%s712_s28 + $0x58] sm:$0xff] }
  0x13   : > { %v280_v6 = vmax.f32 %v279_v5, 0.0  ;;  %v309_v51 = vld [vmem:[%s712_s28 + $0x60] sm:$0xff]  ;;  %v310_v56 = vld [vmem:[%s712_s28 + $0x68] sm:$0xff]  ;;  %v311_v60 = vld [vmem:[%s712_s28 + $0x70] sm:$0xff] }
  0x14   : > { %v312_v0 = vld [vmem:[%s712_s28 + $0x78] sm:$0xff]  ;;  %v313_v4 = vld [vmem:[%s712_s28 + $0x80] sm:$0xff] }
  0x15   : > { %v282_v7 = vadd.f32 1e-05, %v280_v6 }
  0x17   : > { %626 = vrsqrt.f32 %v282_v7  ;;  %vm289_vm0 = vweird.f32 %v282_v7 }
  0x1d   : > { %v627_v8 = vpop.eup %626 }
  0x1e   : > { %v284_v9 = vmul.f32 %v627_v8, %v282_v7  ;;  %vm290_vm1 = vweird.f32 %v627_v8 }
  0x1f   : > { %vm291_vm2 = vmor %vm289_vm0, %vm290_vm1 }
  0x20   : > { %v285_v10 = vmul.f32 %v627_v8, %v284_v9 }
  0x22   : > { %v286_v11 = vmul.f32 0.5, %v285_v10 }
  0x24   : > { %v287_v12 = vsub.f32 1.5, %v286_v11 }
  0x26   : > { %v288_v14 = vmul.f32 %v627_v8, %v287_v12  ;;  %v315_v12 = vld [vmem:[%s712_s28 + $0x90] sm:$0xff] }
  0x28   : > { %v292_v15 = vsel %vm291_vm2, %v627_v8, %v288_v14  ;;  %v314_v8 = vld [vmem:[%s712_s28 + $0x88] sm:$0xff] }
  0x29   : > { %v293_v16 = vmul.f32 %v292_v15, %v281_v13 }
  0x2b   : > { %v295_v21 = vmul.f32 %v293_v16, %v275_v2  ;;  %v720_v22 = vperm.slane %v293_v16, 0  ;;  %v316_v16 = vld [vmem:[%s712_s28 + $0x98] sm:$0xff] }
  0x2d   : > { %v296_v27 = vsub.f32 %v294_v17, %v295_v21  ;;  %v332_v28 = vmul.f32 %v720_v22, %v297_v18  ;;  %v333_v29 = vmul.f32 %v720_v22, %v298_v19  ;;  %v334_v30 = vmul.f32 %v720_v22, %v299_v20  ;;  %v317_v20 = vld [vmem:[%s712_s28 + $0xa0] sm:$0xff] }
  0x2e   : > { %v335_v33 = vmul.f32 %v720_v22, %v300_v23  ;;  %v336_v34 = vmul.f32 %v720_v22, %v301_v24  ;;  %v337_v35 = vmul.f32 %v720_v22, %v302_v25  ;;  %v338_v37 = vmul.f32 %v720_v22, %v303_v26  ;;  %v318_v25 = vld [vmem:[%s712_s28 + $0xa8] sm:$0xff] }
  0x2f   : > { %v734_v36 = vperm.slane %v296_v27, 0  ;;  %v339_v40 = vmul.f32 %v720_v22, %v304_v31  ;;  %v340_v41 = vmul.f32 %v720_v22, %v305_v32  ;;  %v341_v49 = vmul.f32 %v720_v22, %v306_v38  ;;  %v321_v38 = vld [vmem:[%s712_s28 + $0xc0] sm:$0xff] }
  0x30   : > { %v342_v50 = vmul.f32 %v720_v22, %v307_v39  ;;  %v343_v59 = vmul.f32 %v720_v22, %v308_v46  ;;  %v344_v63 = vmul.f32 %v720_v22, %v309_v51  ;;  %v345_v3 = vmul.f32 %v720_v22, %v310_v56  ;;  %v323_v46 = vld [vmem:[%s712_s28 + $0xd0] sm:$0xff] }
  0x31   : > { %v367_v42 = vadd.f32 %v734_v36, %v332_v28  ;;  %v368_v43 = vadd.f32 %v734_v36, %v333_v29  ;;  %v369_v44 = vadd.f32 %v734_v36, %v334_v30  ;;  %v370_v45 = vadd.f32 %v734_v36, %v335_v33  ;;  %v319_v29 = vld [vmem:[%s712_s28 + $0xb0] sm:$0xff]  ;;  %v320_v33 = vld [vmem:[%s712_s28 + $0xb8] sm:$0xff] }
  0x32   : > { %v371_v47 = vadd.f32 %v734_v36, %v336_v34  ;;  %v372_v48 = vadd.f32 %v734_v36, %v337_v35  ;;  %v373_v55 = vadd.f32 %v734_v36, %v338_v37  ;;  %v374_v58 = vadd.f32 %v734_v36, %v339_v40 }
  0x33   : > { %v399_v52 = vmax.f32 %v367_v42, 0.0  ;;  %v400_v53 = vmax.f32 %v368_v43, 0.0  ;;  %v401_v54 = vmax.f32 %v369_v44, 0.0  ;;  %v402_v57 = vmax.f32 %v370_v45, 0.0  ;;  %v322_v42 = vld [vmem:[%s712_s28 + $0xc8] sm:$0xff] }
  0x34   : > { %v403_v61 = vmax.f32 %v371_v47, 0.0  ;;  %v375_v62 = vadd.f32 %v734_v36, %v340_v41  ;;  %v404_v1 = vmax.f32 %v372_v48, 0.0  ;;  %v376_v2 = vadd.f32 %v734_v36, %v341_v49 }
  0x35   : > { %431 = vst [vmem:[%s751_s7] sm:$0xff] %v399_v52  ;;  %v405_v5 = vmax.f32 %v373_v55, 0.0  ;;  %v377_v6 = vadd.f32 %v734_v36, %v342_v50  ;;  %v346_v7 = vmul.f32 %v720_v22, %v311_v60  ;;  %v406_v9 = vmax.f32 %v374_v58, 0.0  ;;  %v324_v50 = vld [vmem:[%s712_s28 + $0xd8] sm:$0xff]  ;;  %v326_v58 = vld [vmem:[%s712_s28 + $0xe8] sm:$0xff] }
  0x36   : > { %432 = vst [vmem:[%s751_s7 + $0x8] sm:$0xff] %v400_v53  ;;  %v378_v10 = vadd.f32 %v734_v36, %v343_v59  ;;  %v347_v11 = vmul.f32 %v720_v22, %v312_v0  ;;  %v407_v13 = vmax.f32 %v375_v62, 0.0  ;;  %v379_v14 = vadd.f32 %v734_v36, %v344_v63  ;;  %v327_v62 = vld [vmem:[%s712_s28 + $0xf0] sm:$0xff] }
  0x37   : > { %433 = vst [vmem:[%s751_s7 + $0x10] sm:$0xff] %v401_v54  ;;  %v348_v15 = vmul.f32 %v720_v22, %v313_v4  ;;  %v408_v17 = vmax.f32 %v376_v2, 0.0  ;;  %v380_v18 = vadd.f32 %v734_v36, %v345_v3  ;;  %v349_v19 = vmul.f32 %v720_v22, %v314_v8  ;;  %v325_v54 = vld [vmem:[%s712_s28 + $0xe0] sm:$0xff]  ;;  %v328_v2 = vld [vmem:[%s712_s28 + $0xf8] sm:$0xff] }
  0x38   : > { %434 = vst [vmem:[%s751_s7 + $0x18] sm:$0xff] %v402_v57  ;;  %v409_v21 = vmax.f32 %v377_v6, 0.0  ;;  %v381_v23 = vadd.f32 %v734_v36, %v346_v7  ;;  %v350_v24 = vmul.f32 %v720_v22, %v315_v12  ;;  %v410_v26 = vmax.f32 %v378_v10, 0.0 }
  0x39   : > { %435 = vst [vmem:[%s751_s7 + $0x20] sm:$0xff] %v403_v61  ;;  %v382_v27 = vadd.f32 %v734_v36, %v347_v11  ;;  %v351_v28 = vmul.f32 %v720_v22, %v316_v16  ;;  %v411_v30 = vmax.f32 %v379_v14, 0.0  ;;  %v383_v31 = vadd.f32 %v734_v36, %v348_v15 }
  0x3a   : > { %436 = vst [vmem:[%s751_s7 + $0x28] sm:$0xff] %v404_v1  ;;  %v352_v32 = vmul.f32 %v720_v22, %v317_v20  ;;  %v412_v34 = vmax.f32 %v380_v18, 0.0  ;;  %v384_v35 = vadd.f32 %v734_v36, %v349_v19  ;;  %v353_v37 = vmul.f32 %v720_v22, %v318_v25 }
  0x3b   : > { %437 = vst [vmem:[%s751_s7 + $0x30] sm:$0xff] %v405_v5  ;;  %v413_v39 = vmax.f32 %v381_v23, 0.0  ;;  %v385_v40 = vadd.f32 %v734_v36, %v350_v24  ;;  %v354_v41 = vmul.f32 %v720_v22, %v319_v29  ;;  %v414_v43 = vmax.f32 %v382_v27, 0.0 }
  0x3c   : > { %438 = vst [vmem:[%s751_s7 + $0x38] sm:$0xff] %v406_v9  ;;  %v386_v44 = vadd.f32 %v734_v36, %v351_v28  ;;  %v355_v45 = vmul.f32 %v720_v22, %v320_v33  ;;  %v415_v47 = vmax.f32 %v383_v31, 0.0  ;;  %v387_v48 = vadd.f32 %v734_v36, %v352_v32 }
  0x3d   : > { %439 = vst [vmem:[%s751_s7 + $0x40] sm:$0xff] %v407_v13  ;;  %v356_v49 = vmul.f32 %v720_v22, %v321_v38  ;;  %v416_v51 = vmax.f32 %v384_v35, 0.0  ;;  %v388_v52 = vadd.f32 %v734_v36, %v353_v37  ;;  %v357_v53 = vmul.f32 %v720_v22, %v322_v42 }
  0x3e   : > { %440 = vst [vmem:[%s751_s7 + $0x48] sm:$0xff] %v408_v17  ;;  %v417_v55 = vmax.f32 %v385_v40, 0.0  ;;  %v389_v56 = vadd.f32 %v734_v36, %v354_v41  ;;  %v358_v57 = vmul.f32 %v720_v22, %v323_v46  ;;  %v418_v59 = vmax.f32 %v386_v44, 0.0 }
  0x3f   : > { %441 = vst [vmem:[%s751_s7 + $0x50] sm:$0xff] %v409_v21  ;;  %v390_v60 = vadd.f32 %v734_v36, %v355_v45  ;;  %v359_v61 = vmul.f32 %v720_v22, %v324_v50  ;;  %v419_v63 = vmax.f32 %v387_v48, 0.0  ;;  %v391_v0 = vadd.f32 %v734_v36, %v356_v49 }
  0x40   : > { %442 = vst [vmem:[%s751_s7 + $0x58] sm:$0xff] %v410_v26  ;;  %v360_v1 = vmul.f32 %v720_v22, %v325_v54  ;;  %v420_v3 = vmax.f32 %v388_v52, 0.0  ;;  %v392_v4 = vadd.f32 %v734_v36, %v357_v53  ;;  %v361_v5 = vmul.f32 %v720_v22, %v326_v58 }
  0x41   : > { %443 = vst [vmem:[%s751_s7 + $0x60] sm:$0xff] %v411_v30  ;;  %v421_v6 = vmax.f32 %v389_v56, 0.0  ;;  %v393_v7 = vadd.f32 %v734_v36, %v358_v57  ;;  %v362_v8 = vmul.f32 %v720_v22, %v327_v62  ;;  %v422_v9 = vmax.f32 %v390_v60, 0.0 }
  0x42   : > { %444 = vst [vmem:[%s751_s7 + $0x68] sm:$0xff] %v412_v34  ;;  %v394_v10 = vadd.f32 %v734_v36, %v359_v61  ;;  %v363_v11 = vmul.f32 %v720_v22, %v328_v2  ;;  %v423_v12 = vmax.f32 %v391_v0, 0.0  ;;  %v395_v13 = vadd.f32 %v734_v36, %v360_v1 }
  0x43   : > { %445 = vst [vmem:[%s751_s7 + $0x70] sm:$0xff] %v413_v39  ;;  %v424_v14 = vmax.f32 %v392_v4, 0.0  ;;  %v396_v15 = vadd.f32 %v734_v36, %v361_v5  ;;  %v425_v16 = vmax.f32 %v393_v7, 0.0  ;;  %v397_v17 = vadd.f32 %v734_v36, %v362_v8 }
  0x44   : > { %446 = vst [vmem:[%s751_s7 + $0x78] sm:$0xff] %v414_v43  ;;  %v426_v22 = vmax.f32 %v394_v10, 0.0  ;;  %v398_v18 = vadd.f32 %v734_v36, %v363_v11  ;;  %v427_v19 = vmax.f32 %v395_v13, 0.0 }
  0x45   : > { %447 = vst [vmem:[%s751_s7 + $0x80] sm:$0xff] %v415_v47  ;;  %v428_v20 = vmax.f32 %v396_v15, 0.0  ;;  %v429_v21 = vmax.f32 %v397_v17, 0.0 }
  0x46   : > { %448 = vst [vmem:[%s751_s7 + $0x88] sm:$0xff] %v416_v51  ;;  %v430_v23 = vmax.f32 %v398_v18, 0.0 }
  0x47   : > { %449 = vst [vmem:[%s751_s7 + $0x90] sm:$0xff] %v417_v55 }
  0x48   : > { %450 = vst [vmem:[%s751_s7 + $0x98] sm:$0xff] %v418_v59 }
  0x49   : > { %451 = vst [vmem:[%s751_s7 + $0xa0] sm:$0xff] %v419_v63 }
  0x4a   : > { %452 = vst [vmem:[%s751_s7 + $0xa8] sm:$0xff] %v420_v3 }
  0x4b   : > { %453 = vst [vmem:[%s751_s7 + $0xb0] sm:$0xff] %v421_v6 }
  0x4c   : > { %454 = vst [vmem:[%s751_s7 + $0xb8] sm:$0xff] %v422_v9 }
  0x4d   : > { %455 = vst [vmem:[%s751_s7 + $0xc0] sm:$0xff] %v423_v12 }
  0x4e   : > { %456 = vst [vmem:[%s751_s7 + $0xc8] sm:$0xff] %v424_v14 }
  0x4f   : > { %457 = vst [vmem:[%s751_s7 + $0xd0] sm:$0xff] %v425_v16 }
  0x50   : > { %458 = vst [vmem:[%s751_s7 + $0xd8] sm:$0xff] %v426_v22 }
  0x51   : > { %459 = vst [vmem:[%s751_s7 + $0xe0] sm:$0xff] %v427_v19 }
  0x52   : > { %460 = vst [vmem:[%s751_s7 + $0xe8] sm:$0xff] %v428_v20 }
  0x53   : > { %461 = vst [vmem:[%s751_s7 + $0xf0] sm:$0xff] %v429_v21 }
  0x54   : > { %462 = vst [vmem:[%s751_s7 + $0xf8] sm:$0xff] %v430_v23 }
  0x55 PF: > { %s14_s17 = sadd.s32 1, %s650_s17   ;;  %s870_s15 = smov %s646_s16 }
  0x56   : > { %p11_p5 = scmp.ge.s32.totalorder %s14_s17, 4   ;;  %s871_s16 = smov %s873_s18 }
  0x58   :  { %13 = sbr.rel (!%p11_p5) target bundleno = 2 (0x2), region = 75 }

// kernel: double_conv.5
= control target key start
LH: loop header
LB: loop body
LE: loop exit
PB: predicated region body
PF: predicated region fallthrough
CT: control target
= control target key end

     0   :  { %s785_s15 = smov 0   ;;  %s787_s16 = smov 0   ;;  %s1046_s0 = inlined_call_operand.vmem [shape: f32[2,16,16,128], index: 0, kind: input, shape index: {}]   ;;  %s1047_s1 = inlined_call_operand.vmem [shape: f32[2,128], index: 1, kind: input, shape index: {}]   ;;  %s1048_s2 = inlined_call_operand.vmem [shape: f32[1,128], index: 2, kind: input, shape index: {}]   ;;  %s1049_s3 = inlined_call_operand.vmem [shape: f32[1,128], index: 3, kind: input, shape index: {}]   ;;  %s1050_s4 = inlined_call_operand.vmem [shape: f32[2,18,18,128], index: 4, kind: output, shape index: {}]  }
   0x1   :  { %s789_s17 = smov 0  }
   0x2 LB: > { %s23_s18 = sadd.s32 1, %s753_s16  ;;  %p633_p0 = scmp.ge.s32.totalorder %s757_s17, 1  ;;  %s757_s17 = sphi %s789_s17, %s14_s17   ;;  %s753_s16 = sphi %s787_s16, %s1052_s16   ;;  %s749_s15 = sphi %s785_s15, %s1051_s15  }
   0x3   : > { %p24_p1 = scmp.ge.s32.totalorder %s23_s18, 2  ;;  %p206_p2 = scmp.lt.s32.totalorder %s757_s17, 3 }
   0x5   : > { %s1054_s18 = smov (%p24_p1, %s23_s18), 0  ;;  %p207_p3 = pnand %p633_p0, %p206_p2 }
   0x6   : > { %p248_p4 = scmp.lt.s32.totalorder (!%p207_p3), %s749_s15, 1 }
   0x7   : > { %210 = sbr.rel (%p207_p3) target bundleno = 86 (0x56), region = 36 }
   0xc   : > { %v274_v0 = vld [vmem:[%s1047_s1] sm:$0x1]  ;;  %v276_v1 = vld [vmem:[%s1047_s1 + $0x1] sm:$0x1]  ;;  %s1056_s15 = smov (!%p248_p4, %s749_s15), 1  ;;  %v759_v6 = vmov 0.0  }
   0xd   : > { %v275_v2 = vmul.f32 0.001953125, %v274_v0  ;;  %v277_v3 = vmul.f32 0.001953125, %v276_v1  ;;  %s707_s23 = smul.u32 432, %s1056_s15  ;;  %s706_s27 = sshll.u32 %s1056_s15, 8  ;;  %v281_v14 = vld [vmem:[%s1048_s2] sm:$0x1] }
   0xe   : > { %s866_s6 = scalar_lea.vmem %s1046_s0, %s706_s27  ;;  %v294_v18 = vld [vmem:[%s1049_s3] sm:$0x1] }
   0xf   : > { %v278_v4 = vmul.f32 %v275_v2, %v275_v2  ;;  %s815_s26 = scalar_lea.vmem %s1050_s4, %s707_s23  ;;  %v297_v19 = vld [vmem:[%s866_s6] sm:$0xff]  ;;  %v298_v22 = vld [vmem:[%s866_s6 + $0x8] sm:$0xff]  ;;  %v299_v23 = vld [vmem:[%s866_s6 + $0x10] sm:$0xff] }
  0x10   : > { %431 = vst [vmem:[%s815_s26] sm:$0xff] %v759_v6  ;;  %v300_v26 = vld [vmem:[%s866_s6 + $0x18] sm:$0xff]  ;;  %v301_v28 = vld [vmem:[%s866_s6 + $0x20] sm:$0xff]  ;;  %v302_v31 = vld [vmem:[%s866_s6 + $0x28] sm:$0xff] }
  0x11   : > { %v279_v5 = vsub.f32 %v277_v3, %v278_v4  ;;  %432 = vst [vmem:[%s815_s26 + $0x8] sm:$0xff] %v759_v6  ;;  %v303_v33 = vld [vmem:[%s866_s6 + $0x30] sm:$0xff]  ;;  %v304_v36 = vld [vmem:[%s866_s6 + $0x38] sm:$0xff]  ;;  %v305_v39 = vld [vmem:[%s866_s6 + $0x40] sm:$0xff] }
  0x12   : > { %433 = vst [vmem:[%s815_s26 + $0x10] sm:$0x3] %v759_v6  ;;  %v306_v42 = vld [vmem:[%s866_s6 + $0x48] sm:$0xff]  ;;  %v307_v45 = vld [vmem:[%s866_s6 + $0x50] sm:$0xff]  ;;  %v308_v49 = vld [vmem:[%s866_s6 + $0x58] sm:$0xff] }
  0x13   : > { %v280_v7 = vmax.f32 %v279_v5, 0.0  ;;  %637 = vst [vmem:[%s815_s26 + $0x198] sm:$0xff] %v759_v6  ;;  %v309_v53 = vld [vmem:[%s866_s6 + $0x60] sm:$0xff]  ;;  %v310_v57 = vld [vmem:[%s866_s6 + $0x68] sm:$0xff]  ;;  %v311_v61 = vld [vmem:[%s866_s6 + $0x70] sm:$0xff] }
  0x14   : > { %638 = vst [vmem:[%s815_s26 + $0x1a0] sm:$0xff] %v759_v6  ;;  %v312_v1 = vld [vmem:[%s866_s6 + $0x78] sm:$0xff]  ;;  %v313_v5 = vld [vmem:[%s866_s6 + $0x80] sm:$0xff] }
  0x15   : > { %v282_v8 = vadd.f32 1e-05, %v280_v7  ;;  %639 = vst [vmem:[%s815_s26 + $0x1a8] sm:$0x3] %v759_v6 }
  0x16   : > { %640 = vst [vmem:[%s815_s26 + $0x18] sm:$0x1] %v759_v6 }
  0x17   : > { %733 = vrsqrt.f32 %v282_v8  ;;  %641 = vst [vmem:[%s815_s26 + $0x30] sm:$0x1] %v759_v6  ;;  %vm289_vm0 = vweird.f32 %v282_v8 }
  0x18   : > { %642 = vst [vmem:[%s815_s26 + $0x48] sm:$0x1] %v759_v6 }
  0x19   : > { %643 = vst [vmem:[%s815_s26 + $0x60] sm:$0x1] %v759_v6 }
  0x1a   : > { %644 = vst [vmem:[%s815_s26 + $0x78] sm:$0x1] %v759_v6 }
  0x1b   : > { %645 = vst [vmem:[%s815_s26 + $0x90] sm:$0x1] %v759_v6 }
  0x1c   : > { %646 = vst [vmem:[%s815_s26 + $0xa8] sm:$0x1] %v759_v6 }
  0x1d   : > { %v734_v9 = vpop.eup %733  ;;  %647 = vst [vmem:[%s815_s26 + $0xc0] sm:$0x1] %v759_v6 }
  0x1e   : > { %v284_v10 = vmul.f32 %v734_v9, %v282_v8  ;;  %648 = vst [vmem:[%s815_s26 + $0xd8] sm:$0x1] %v759_v6  ;;  %vm290_vm1 = vweird.f32 %v734_v9 }
  0x1f   : > { %649 = vst [vmem:[%s815_s26 + $0xf0] sm:$0x1] %v759_v6  ;;  %vm291_vm2 = vmor %vm289_vm0, %vm290_vm1 }
  0x20   : > { %v285_v11 = vmul.f32 %v734_v9, %v284_v10  ;;  %650 = vst [vmem:[%s815_s26 + $0x108] sm:$0x1] %v759_v6 }
  0x21   : > { %651 = vst [vmem:[%s815_s26 + $0x120] sm:$0x1] %v759_v6 }
  0x22   : > { %v286_v12 = vmul.f32 0.5, %v285_v11  ;;  %652 = vst [vmem:[%s815_s26 + $0x138] sm:$0x1] %v759_v6 }
  0x23   : > { %653 = vst [vmem:[%s815_s26 + $0x150] sm:$0x1] %v759_v6 }
  0x24   : > { %v287_v13 = vsub.f32 1.5, %v286_v12  ;;  %654 = vst [vmem:[%s815_s26 + $0x168] sm:$0x1] %v759_v6 }
  0x25   : > { %655 = vst [vmem:[%s815_s26 + $0x180] sm:$0x1] %v759_v6 }
  0x26   : > { %v288_v15 = vmul.f32 %v734_v9, %v287_v13  ;;  %656 = vst [vmem:[%s815_s26 + $0x29] sm:$0x1] %v759_v6  ;;  %v315_v13 = vld [vmem:[%s866_s6 + $0x90] sm:$0xff] }
  0x27   : > { %657 = vst [vmem:[%s815_s26 + $0x41] sm:$0x1] %v759_v6 }
  0x28   : > { %v292_v16 = vsel %vm291_vm2, %v734_v9, %v288_v15  ;;  %658 = vst [vmem:[%s815_s26 + $0x59] sm:$0x1] %v759_v6  ;;  %v314_v9 = vld [vmem:[%s866_s6 + $0x88] sm:$0xff] }
  0x29   : > { %v293_v17 = vmul.f32 %v292_v16, %v281_v14  ;;  %659 = vst [vmem:[%s815_s26 + $0x71] sm:$0x1] %v759_v6 }
  0x2a   : > { %660 = vst [vmem:[%s815_s26 + $0x89] sm:$0x1] %v759_v6 }
  0x2b   : > { %v295_v20 = vmul.f32 %v293_v17, %v275_v2  ;;  %v880_v21 = vperm.slane %v293_v17, 0  ;;  %661 = vst [vmem:[%s815_s26 + $0xa1] sm:$0x1] %v759_v6  ;;  %v316_v17 = vld [vmem:[%s866_s6 + $0x98] sm:$0xff] }
  0x2c   : > { %662 = vst [vmem:[%s815_s26 + $0xb9] sm:$0x1] %v759_v6 }
  0x2d   : > { %v296_v24 = vsub.f32 %v294_v18, %v295_v20  ;;  %v332_v25 = vmul.f32 %v880_v21, %v297_v19  ;;  %v333_v27 = vmul.f32 %v880_v21, %v298_v22  ;;  %v334_v30 = vmul.f32 %v880_v21, %v299_v23  ;;  %663 = vst [vmem:[%s815_s26 + $0xd1] sm:$0x1] %v759_v6  ;;  %v317_v22 = vld [vmem:[%s866_s6 + $0xa0] sm:$0xff] }
  0x2e   : > { %v335_v32 = vmul.f32 %v880_v21, %v300_v26  ;;  %664 = vst [vmem:[%s815_s26 + $0xe9] sm:$0x1] %v759_v6  ;;  %v336_v35 = vmul.f32 %v880_v21, %v301_v28  ;;  %v337_v38 = vmul.f32 %v880_v21, %v302_v31  ;;  %v338_v41 = vmul.f32 %v880_v21, %v303_v33  ;;  %v318_v26 = vld [vmem:[%s866_s6 + $0xa8] sm:$0xff]  ;;  %v319_v31 = vld [vmem:[%s866_s6 + $0xb0] sm:$0xff] }
  0x2f   : > { %v896_v29 = vperm.slane %v296_v24, 0  ;;  %665 = vst [vmem:[%s815_s26 + $0x101] sm:$0x1] %v759_v6  ;;  %v339_v44 = vmul.f32 %v880_v21, %v304_v36  ;;  %v340_v48 = vmul.f32 %v880_v21, %v305_v39  ;;  %v341_v52 = vmul.f32 %v880_v21, %v306_v42  ;;  %v321_v39 = vld [vmem:[%s866_s6 + $0xc0] sm:$0xff] }
  0x30   : > { %666 = vst [vmem:[%s815_s26 + $0x119] sm:$0x1] %v759_v6  ;;  %v342_v56 = vmul.f32 %v880_v21, %v307_v45  ;;  %v343_v60 = vmul.f32 %v880_v21, %v308_v49  ;;  %v344_v0 = vmul.f32 %v880_v21, %v309_v53  ;;  %v345_v4 = vmul.f32 %v880_v21, %v310_v57 }
  0x31   : > { %v367_v34 = vadd.f32 %v896_v29, %v332_v25  ;;  %v368_v37 = vadd.f32 %v896_v29, %v333_v27  ;;  %v369_v40 = vadd.f32 %v896_v29, %v334_v30  ;;  %667 = vst [vmem:[%s815_s26 + $0x131] sm:$0x1] %v759_v6  ;;  %v370_v43 = vadd.f32 %v896_v29, %v335_v32 }
  0x32   : > { %668 = vst [vmem:[%s815_s26 + $0x149] sm:$0x1] %v759_v6  ;;  %v371_v47 = vadd.f32 %v896_v29, %v336_v35  ;;  %v372_v51 = vadd.f32 %v896_v29, %v337_v38  ;;  %v373_v55 = vadd.f32 %v896_v29, %v338_v41  ;;  %v374_v59 = vadd.f32 %v896_v29, %v339_v44  ;;  %v320_v35 = vld [vmem:[%s866_s6 + $0xb8] sm:$0xff] }
  0x33   : > { %v399_v46 = vmax.f32 %v367_v34, 0.0  ;;  %669 = vst [vmem:[%s815_s26 + $0x161] sm:$0x1] %v759_v6  ;;  %v400_v50 = vmax.f32 %v368_v37, 0.0  ;;  %v401_v54 = vmax.f32 %v369_v40, 0.0  ;;  %v402_v58 = vmax.f32 %v370_v43, 0.0 }
  0x34   : > { %670 = vst [vmem:[%s815_s26 + $0x179] sm:$0x1] %v759_v6  ;;  %v403_v62 = vmax.f32 %v371_v47, 0.0  ;;  %v375_v63 = vadd.f32 %v896_v29, %v340_v48  ;;  %v404_v2 = vmax.f32 %v372_v51, 0.0  ;;  %v376_v3 = vadd.f32 %v896_v29, %v341_v52  ;;  %v322_v43 = vld [vmem:[%s866_s6 + $0xc8] sm:$0xff]  ;;  %v323_v47 = vld [vmem:[%s866_s6 + $0xd0] sm:$0xff] }
  0x35   : > { %671 = vst [vmem:[%s815_s26 + $0x191] sm:$0x1] %v759_v6  ;;  %v405_v6 = vmax.f32 %v373_v55, 0.0  ;;  %v377_v7 = vadd.f32 %v896_v29, %v342_v56  ;;  %v346_v8 = vmul.f32 %v880_v21, %v311_v61  ;;  %v406_v10 = vmax.f32 %v374_v59, 0.0  ;;  %v324_v51 = vld [vmem:[%s866_s6 + $0xd8] sm:$0xff]  ;;  %v325_v55 = vld [vmem:[%s866_s6 + $0xe0] sm:$0xff] }
  0x36   : > { %672 = vst [vmem:[%s815_s26 + $0x19] sm:$0xff] %v399_v46  ;;  %v378_v11 = vadd.f32 %v896_v29, %v343_v60  ;;  %v347_v12 = vmul.f32 %v880_v21, %v312_v1  ;;  %v407_v14 = vmax.f32 %v375_v63, 0.0  ;;  %v379_v15 = vadd.f32 %v896_v29, %v344_v0  ;;  %v326_v59 = vld [vmem:[%s866_s6 + $0xe8] sm:$0xff]  ;;  %v327_v63 = vld [vmem:[%s866_s6 + $0xf0] sm:$0xff] }
  0x37   : > { %673 = vst [vmem:[%s815_s26 + $0x21] sm:$0xff] %v400_v50  ;;  %v348_v16 = vmul.f32 %v880_v21, %v313_v5  ;;  %v408_v18 = vmax.f32 %v376_v3, 0.0  ;;  %v380_v19 = vadd.f32 %v896_v29, %v345_v4  ;;  %v349_v20 = vmul.f32 %v880_v21, %v314_v9  ;;  %v328_v3 = vld [vmem:[%s866_s6 + $0xf8] sm:$0xff] }
  0x38   : > { %674 = vst [vmem:[%s815_s26 + $0x31] sm:$0xff] %v401_v54  ;;  %v409_v23 = vmax.f32 %v377_v7, 0.0  ;;  %v381_v24 = vadd.f32 %v896_v29, %v346_v8  ;;  %v350_v25 = vmul.f32 %v880_v21, %v315_v13  ;;  %v410_v27 = vmax.f32 %v378_v11, 0.0 }
  0x39   : > { %675 = vst [vmem:[%s815_s26 + $0x39] sm:$0xff] %v402_v58  ;;  %v382_v28 = vadd.f32 %v896_v29, %v347_v12  ;;  %v351_v30 = vmul.f32 %v880_v21, %v316_v17  ;;  %v411_v32 = vmax.f32 %v379_v15, 0.0  ;;  %v383_v33 = vadd.f32 %v896_v29, %v348_v16 }
  0x3a   : > { %676 = vst [vmem:[%s815_s26 + $0x49] sm:$0xff] %v403_v62  ;;  %v352_v34 = vmul.f32 %v880_v21, %v317_v22  ;;  %v412_v36 = vmax.f32 %v380_v19, 0.0  ;;  %v384_v37 = vadd.f32 %v896_v29, %v349_v20  ;;  %v353_v38 = vmul.f32 %v880_v21, %v318_v26 }
  0x3b   : > { %677 = vst [vmem:[%s815_s26 + $0x51] sm:$0xff] %v404_v2  ;;  %v413_v40 = vmax.f32 %v381_v24, 0.0  ;;  %v385_v41 = vadd.f32 %v896_v29, %v350_v25  ;;  %v354_v42 = vmul.f32 %v880_v21, %v319_v31  ;;  %v414_v44 = vmax.f32 %v382_v28, 0.0 }
  0x3c   : > { %678 = vst [vmem:[%s815_s26 + $0x61] sm:$0xff] %v405_v6  ;;  %v386_v45 = vadd.f32 %v896_v29, %v351_v30  ;;  %v355_v46 = vmul.f32 %v880_v21, %v320_v35  ;;  %v415_v48 = vmax.f32 %v383_v33, 0.0  ;;  %v387_v49 = vadd.f32 %v896_v29, %v352_v34 }
  0x3d   : > { %679 = vst [vmem:[%s815_s26 + $0x69] sm:$0xff] %v406_v10  ;;  %v356_v50 = vmul.f32 %v880_v21, %v321_v39  ;;  %v416_v52 = vmax.f32 %v384_v37, 0.0  ;;  %v388_v53 = vadd.f32 %v896_v29, %v353_v38  ;;  %v357_v54 = vmul.f32 %v880_v21, %v322_v43 }
  0x3e   : > { %680 = vst [vmem:[%s815_s26 + $0x79] sm:$0xff] %v407_v14  ;;  %v417_v56 = vmax.f32 %v385_v41, 0.0  ;;  %v389_v57 = vadd.f32 %v896_v29, %v354_v42  ;;  %v358_v58 = vmul.f32 %v880_v21, %v323_v47  ;;  %v418_v60 = vmax.f32 %v386_v45, 0.0 }
  0x3f   : > { %681 = vst [vmem:[%s815_s26 + $0x81] sm:$0xff] %v408_v18  ;;  %v390_v61 = vadd.f32 %v896_v29, %v355_v46  ;;  %v359_v62 = vmul.f32 %v880_v21, %v324_v51  ;;  %v419_v0 = vmax.f32 %v387_v49, 0.0  ;;  %v391_v1 = vadd.f32 %v896_v29, %v356_v50 }
  0x40   : > { %682 = vst [vmem:[%s815_s26 + $0x91] sm:$0xff] %v409_v23  ;;  %v360_v2 = vmul.f32 %v880_v21, %v325_v55  ;;  %v420_v4 = vmax.f32 %v388_v53, 0.0  ;;  %v392_v5 = vadd.f32 %v896_v29, %v357_v54  ;;  %v361_v6 = vmul.f32 %v880_v21, %v326_v59 }
  0x41   : > { %683 = vst [vmem:[%s815_s26 + $0x99] sm:$0xff] %v410_v27  ;;  %v421_v7 = vmax.f32 %v389_v57, 0.0  ;;  %v393_v8 = vadd.f32 %v896_v29, %v358_v58  ;;  %v362_v9 = vmul.f32 %v880_v21, %v327_v63  ;;  %v422_v10 = vmax.f32 %v390_v61, 0.0 }
  0x42   : > { %684 = vst [vmem:[%s815_s26 + $0xa9] sm:$0xff] %v411_v32  ;;  %v394_v11 = vadd.f32 %v896_v29, %v359_v62  ;;  %v363_v12 = vmul.f32 %v880_v21, %v328_v3  ;;  %v423_v13 = vmax.f32 %v391_v1, 0.0  ;;  %v395_v14 = vadd.f32 %v896_v29, %v360_v2 }
  0x43   : > { %685 = vst [vmem:[%s815_s26 + $0xb1] sm:$0xff] %v412_v36  ;;  %v424_v15 = vmax.f32 %v392_v5, 0.0  ;;  %v396_v16 = vadd.f32 %v896_v29, %v361_v6  ;;  %v425_v17 = vmax.f32 %v393_v8, 0.0  ;;  %v397_v18 = vadd.f32 %v896_v29, %v362_v9 }
  0x44   : > { %686 = vst [vmem:[%s815_s26 + $0xc1] sm:$0xff] %v413_v40  ;;  %v426_v21 = vmax.f32 %v394_v11, 0.0  ;;  %v398_v19 = vadd.f32 %v896_v29, %v363_v12  ;;  %v427_v20 = vmax.f32 %v395_v14, 0.0 }
  0x45   : > { %687 = vst [vmem:[%s815_s26 + $0xc9] sm:$0xff] %v414_v44  ;;  %v428_v22 = vmax.f32 %v396_v16, 0.0  ;;  %v429_v23 = vmax.f32 %v397_v18, 0.0 }
  0x46   : > { %688 = vst [vmem:[%s815_s26 + $0xd9] sm:$0xff] %v415_v48  ;;  %v430_v24 = vmax.f32 %v398_v19, 0.0 }
  0x47   : > { %689 = vst [vmem:[%s815_s26 + $0xe1] sm:$0xff] %v416_v52 }
  0x48   : > { %690 = vst [vmem:[%s815_s26 + $0xf1] sm:$0xff] %v417_v56 }
  0x49   : > { %691 = vst [vmem:[%s815_s26 + $0xf9] sm:$0xff] %v418_v60 }
  0x4a   : > { %692 = vst [vmem:[%s815_s26 + $0x109] sm:$0xff] %v419_v0 }
  0x4b   : > { %693 = vst [vmem:[%s815_s26 + $0x111] sm:$0xff] %v420_v4 }
  0x4c   : > { %694 = vst [vmem:[%s815_s26 + $0x121] sm:$0xff] %v421_v7 }
  0x4d   : > { %695 = vst [vmem:[%s815_s26 + $0x129] sm:$0xff] %v422_v10 }
  0x4e   : > { %696 = vst [vmem:[%s815_s26 + $0x139] sm:$0xff] %v423_v13 }
  0x4f   : > { %697 = vst [vmem:[%s815_s26 + $0x141] sm:$0xff] %v424_v15 }
  0x50   : > { %698 = vst [vmem:[%s815_s26 + $0x151] sm:$0xff] %v425_v17 }
  0x51   : > { %699 = vst [vmem:[%s815_s26 + $0x159] sm:$0xff] %v426_v21 }
  0x52   : > { %700 = vst [vmem:[%s815_s26 + $0x169] sm:$0xff] %v427_v20 }
  0x53   : > { %701 = vst [vmem:[%s815_s26 + $0x171] sm:$0xff] %v428_v22 }
  0x54   : > { %702 = vst [vmem:[%s815_s26 + $0x181] sm:$0xff] %v429_v23 }
  0x55   : > { %703 = vst [vmem:[%s815_s26 + $0x189] sm:$0xff] %v430_v24 }
  0x56 PF: > { %s14_s17 = sadd.s32 1, %s757_s17   ;;  %s1051_s15 = smov %s753_s16 }
  0x57   : > { %p11_p5 = scmp.ge.s32.totalorder %s14_s17, 4   ;;  %s1052_s16 = smov %s1054_s18 }
  0x59   :  { %13 = sbr.rel (!%p11_p5) target bundleno = 2 (0x2), region = 77 }

// kernel: double_conv.4
= control target key start
LH: loop header
LB: loop body
LE: loop exit
PB: predicated region body
PF: predicated region fallthrough
CT: control target
= control target key end

     0   :  { %s2173_s12 = smov 0   ;;  %s2175_s13 = smov 0   ;;  %s3738_s0 = inlined_call_operand.vmem [shape: f32[2,18,18,128], index: 0, kind: input, shape index: {}]   ;;  %s3739_s1 = inlined_call_operand.vmem [shape: f32[1152,128], index: 1, kind: input, shape index: {}]   ;;  %s3740_s2 = inlined_call_operand.vmem [shape: f32[2,16,16,128], index: 2, kind: output, shape index: {0}]   ;;  %s3741_s3 = inlined_call_operand.vmem [shape: f32[2,128], index: 3, kind: output, shape index: {1}]  }
   0x1   :  { %s2177_s14 = smov 0  }
   0x2 LB: > { %s23_s15 = sadd.s32 1, %s2146_s13  ;;  %p2017_p0 = scmp.ge.s32.totalorder %s2150_s14, 1  ;;  %s2150_s14 = sphi %s2177_s14, %s14_s14   ;;  %s2146_s13 = sphi %s2175_s13, %s3887_s13   ;;  %s2142_s12 = sphi %s2173_s12, %s3886_s12  }
   0x3   : > { %p24_p1 = scmp.ge.s32.totalorder %s23_s15, 2  ;;  %p163_p2 = scmp.lt.s32.totalorder %s2150_s14, 3 }
   0x5   : > { %s3889_s15 = smov (%p24_p1, %s23_s15), 0  ;;  %p164_p3 = pnand %p2017_p0, %p163_p2 }
   0x7   : > { %167 = sbr.rel (%p164_p3) target bundleno = 832 (0x340), region = 28 }
   0xc   : > { %v596_v0 = vld [vmem:[%s3739_s1 + $0x78] sm:$0xff]  ;;  %v595_v1 = vld [vmem:[%s3739_s1 + $0x70] sm:$0xff]  ;;  %v594_v2 = vld [vmem:[%s3739_s1 + $0x68] sm:$0xff]  ;;  %p198_p4 = scmp.lt.s32.totalorder %s2142_s12, 1  ;;  %vm321_vm0 = vcmask 1046528   ;;  %vm434_vm1 = vcmask 1045504  }
   0xd   : > { %2026 = vmatpush.msra.mxu1 %v596_v0  ;;  %2027 = vmatpush.msra.mxu2 %v596_v0  ;;  %v593_v3 = vld [vmem:[%s3739_s1 + $0x60] sm:$0xff]  ;;  %v592_v4 = vld [vmem:[%s3739_s1 + $0x58] sm:$0xff]  ;;  %v591_v5 = vld [vmem:[%s3739_s1 + $0x50] sm:$0xff]  ;;  %p2021_p5 = scmp.ne.s32.totalorder %s2142_s12, 0 }
   0xe   : > { %2028 = vmatpush.msra.mxu3 %v596_v0  ;;  %725 = vmatpush.msra.mxu0 %v596_v0  ;;  %v590_v6 = vld [vmem:[%s3739_s1 + $0x48] sm:$0xff]  ;;  %v589_v7 = vld [vmem:[%s3739_s1 + $0x40] sm:$0xff]  ;;  %v588_v8 = vld [vmem:[%s3739_s1 + $0x38] sm:$0xff]  ;;  %s2228_s11 = scalar_select %p198_p4, %s2142_s12, 1 }
   0xf   : > { %2029 = vmatpush.msra.mxu1 %v595_v1  ;;  %2030 = vmatpush.msra.mxu2 %v595_v1  ;;  %v587_v9 = vld [vmem:[%s3739_s1 + $0x30] sm:$0xff]  ;;  %v586_v10 = vld [vmem:[%s3739_s1 + $0x28] sm:$0xff]  ;;  %v585_v11 = vld [vmem:[%s3739_s1 + $0x20] sm:$0xff] }
  0x10   : > { %2031 = vmatpush.msra.mxu3 %v595_v1  ;;  %726 = vmatpush.msra.mxu0 %v595_v1  ;;  %v584_v12 = vld [vmem:[%s3739_s1 + $0x18] sm:$0xff]  ;;  %s2074_s20 = smul.u32 432, %s2228_s11  ;;  %v583_v13 = vld [vmem:[%s3739_s1 + $0x10] sm:$0xff]  ;;  %v582_v14 = vld [vmem:[%s3739_s1 + $0x8] sm:$0xff]  ;;  %s2025_s7 = sshll.u32 %s2228_s11, 8 }
  0x11   : > { %2032 = vmatpush.msra.mxu1 %v594_v2  ;;  %2033 = vmatpush.msra.mxu2 %v594_v2  ;;  %v581_v15 = vld [vmem:[%s3739_s1] sm:$0xff]  ;;  %v628_v18 = vld [vmem:[%s3739_s1 + $0x178] sm:$0xff]  ;;  %v627_v22 = vld [vmem:[%s3739_s1 + $0x170] sm:$0xff]  ;;  %s3394_s10 = scalar_lea.vmem %s3740_s2, %s2025_s7 }
  0x12   : > { %2034 = vmatpush.msra.mxu3 %v594_v2  ;;  %727 = vmatpush.msra.mxu0 %v594_v2  ;;  %s2246_s27 = scalar_lea.vmem %s3738_s0, %s2074_s20  ;;  %v612_v20 = vld [vmem:[%s3739_s1 + $0xf8] sm:$0xff]  ;;  %v611_v23 = vld [vmem:[%s3739_s1 + $0xf0] sm:$0xff]  ;;  %v626_v25 = vld [vmem:[%s3739_s1 + $0x168] sm:$0xff] }
  0x13   : > { %2035 = vmatpush.msra.mxu1 %v593_v3  ;;  %2036 = vmatpush.msra.mxu2 %v593_v3  ;;  %v2252_v16 = vld [vmem:[%s2246_s27 + $0x60] sm:$0xff]  ;;  %v644_v21 = vld [vmem:[%s3739_s1 + $0x1f8] sm:$0xff]  ;;  %v643_v24 = vld [vmem:[%s3739_s1 + $0x1f0] sm:$0xff] }
  0x14   : > { %2037 = vmatpush.msra.mxu3 %v593_v3  ;;  %728 = vmatpush.msra.mxu0 %v593_v3  ;;  %v2255_v17 = vld [vmem:[%s2246_s27 + $0xc0] sm:$0xff]  ;;  %v610_v27 = vld [vmem:[%s3739_s1 + $0xe8] sm:$0xff]  ;;  %v660_v29 = vld [vmem:[%s3739_s1 + $0x278] sm:$0xff] }
  0x15   : > { %2038 = vmatpush.msra.mxu1 %v592_v4  ;;  %2039 = vmatpush.msra.mxu2 %v592_v4  ;;  %v255_v19 = vld [vmem:[%s2246_s27 + $0x120] sm:$0xff]  ;;  %v642_v28 = vld [vmem:[%s3739_s1 + $0x1e8] sm:$0xff]  ;;  %v659_v35 = vld [vmem:[%s3739_s1 + $0x270] sm:$0xff] }
  0x16   : > { %2040 = vmatpush.msra.mxu3 %v592_v4  ;;  %729 = vmatpush.msra.mxu0 %v592_v4  ;;  %v2282_v26 = vld [vmem:[%s2246_s27] sm:$0xff]  ;;  %v2294_v30 = vld [vmem:[%s2246_s27 + $0x68] sm:$0xff]  ;;  %v624_v37 = vld [vmem:[%s3739_s1 + $0x158] sm:$0xff] }
  0x17   : > { %2041 = vmatpush.msra.mxu1 %v591_v5  ;;  %2042 = vmatpush.msra.mxu2 %v591_v5  ;;  %v2297_v31 = vld [vmem:[%s2246_s27 + $0xc8] sm:$0xff]  ;;  %v625_v32 = vld [vmem:[%s3739_s1 + $0x160] sm:$0xff]  ;;  %v640_v38 = vld [vmem:[%s3739_s1 + $0x1d8] sm:$0xff] }
  0x18   : > { %2043 = vmatpush.msra.mxu3 %v591_v5  ;;  %730 = vmatpush.msra.mxu0 %v591_v5  ;;  %v641_v33 = vld [vmem:[%s3739_s1 + $0x1e0] sm:$0xff]  ;;  %v256_v34 = vld [vmem:[%s2246_s27 + $0x128] sm:$0xff]  ;;  %v608_v40 = vld [vmem:[%s3739_s1 + $0xd8] sm:$0xff] }
  0x19   : > { %2044 = vmatpush.msra.mxu1 %v590_v6  ;;  %2045 = vmatpush.msra.mxu2 %v590_v6  ;;  %v609_v36 = vld [vmem:[%s3739_s1 + $0xe0] sm:$0xff]  ;;  %v658_v39 = vld [vmem:[%s3739_s1 + $0x268] sm:$0xff]  ;;  %v623_v41 = vld [vmem:[%s3739_s1 + $0x150] sm:$0xff] }
  0x1a   : > { %2046 = vmatpush.msra.mxu3 %v590_v6  ;;  %731 = vmatpush.msra.mxu0 %v590_v6  ;;  %v2331_v42 = vld [vmem:[%s2246_s27 + $0x8] sm:$0xff]  ;;  %v639_v43 = vld [vmem:[%s3739_s1 + $0x1d0] sm:$0xff]  ;;  %v657_v44 = vld [vmem:[%s3739_s1 + $0x260] sm:$0xff] }
  0x1b   : > { %2047 = vmatpush.msra.mxu1 %v589_v7  ;;  %2048 = vmatpush.msra.mxu2 %v589_v7  ;;  %v607_v45 = vld [vmem:[%s3739_s1 + $0xd0] sm:$0xff]  ;;  %v2343_v46 = vld [vmem:[%s2246_s27 + $0x78] sm:$0xff]  ;;  %v622_v48 = vld [vmem:[%s3739_s1 + $0x148] sm:$0xff] }
  0x1c   : > { %2049 = vmatpush.msra.mxu3 %v589_v7  ;;  %732 = vmatpush.msra.mxu0 %v589_v7  ;;  %v2346_v47 = vld [vmem:[%s2246_s27 + $0xd8] sm:$0xff]  ;;  %v638_v49 = vld [vmem:[%s3739_s1 + $0x1c8] sm:$0xff]  ;;  %v621_v53 = vld [vmem:[%s3739_s1 + $0x140] sm:$0xff] }
  0x1d   : > { %2050 = vmatpush.msra.mxu1 %v588_v8  ;;  %2051 = vmatpush.msra.mxu2 %v588_v8  ;;  %v258_v50 = vld [vmem:[%s2246_s27 + $0x138] sm:$0xff]  ;;  %v606_v52 = vld [vmem:[%s3739_s1 + $0xc8] sm:$0xff]  ;;  %v637_v54 = vld [vmem:[%s3739_s1 + $0x1c0] sm:$0xff] }
  0x1e   : > { %2052 = vmatpush.msra.mxu3 %v588_v8  ;;  %733 = vmatpush.msra.mxu0 %v588_v8  ;;  %v656_v51 = vld [vmem:[%s3739_s1 + $0x258] sm:$0xff]  ;;  %v655_v55 = vld [vmem:[%s3739_s1 + $0x250] sm:$0xff]  ;;  %v605_v56 = vld [vmem:[%s3739_s1 + $0xc0] sm:$0xff] }
  0x1f   : > { %2053 = vmatpush.msra.mxu1 %v587_v9  ;;  %2054 = vmatpush.msra.mxu2 %v587_v9  ;;  %v620_v57 = vld [vmem:[%s3739_s1 + $0x138] sm:$0xff]  ;;  %v654_v60 = vld [vmem:[%s3739_s1 + $0x248] sm:$0xff]  ;;  %v2392_v62 = vld [vmem:[%s2246_s27 + $0x80] sm:$0xff] }
  0x20   : > { %2055 = vmatpush.msra.mxu3 %v587_v9  ;;  %734 = vmatpush.msra.mxu0 %v587_v9  ;;  %v2380_v58 = vld [vmem:[%s2246_s27 + $0x18] sm:$0xff]  ;;  %v2395_v63 = vld [vmem:[%s2246_s27 + $0xe0] sm:$0xff]  ;;  %v619_v0 = vld [vmem:[%s3739_s1 + $0x130] sm:$0xff] }
  0x21   : > { %2056 = vmatpush.msra.mxu1 %v586_v10  ;;  %2057 = vmatpush.msra.mxu2 %v586_v10  ;;  %v636_v59 = vld [vmem:[%s3739_s1 + $0x1b8] sm:$0xff]  ;;  %v635_v1 = vld [vmem:[%s3739_s1 + $0x1b0] sm:$0xff]  ;;  %v259_v2 = vld [vmem:[%s2246_s27 + $0x140] sm:$0xff] }
  0x22   : > { %2058 = vmatpush.msra.mxu3 %v586_v10  ;;  %735 = vmatpush.msra.mxu0 %v586_v10  ;;  %v604_v61 = vld [vmem:[%s3739_s1 + $0xb8] sm:$0xff]  ;;  %v653_v3 = vld [vmem:[%s3739_s1 + $0x240] sm:$0xff]  ;;  %v603_v4 = vld [vmem:[%s3739_s1 + $0xb0] sm:$0xff] }
  0x23   : > { %2059 = vmatpush.msra.mxu1 %v585_v11  ;;  %2060 = vmatpush.msra.mxu2 %v585_v11  ;;  %v618_v5 = vld [vmem:[%s3739_s1 + $0x128] sm:$0xff]  ;;  %v652_v7 = vld [vmem:[%s3739_s1 + $0x238] sm:$0xff]  ;;  %v617_v9 = vld [vmem:[%s3739_s1 + $0x120] sm:$0xff] }
  0x24   : > { %2061 = vmatpush.msra.mxu3 %v585_v11  ;;  %736 = vmatpush.msra.mxu0 %v585_v11  ;;  %v634_v6 = vld [vmem:[%s3739_s1 + $0x1a8] sm:$0xff]  ;;  %v2429_v10 = vld [vmem:[%s2246_s27 + $0x20] sm:$0xff] }
  0x25   : > { %2062 = vmatpush.msra.mxu1 %v584_v12  ;;  %2063 = vmatpush.msra.mxu2 %v584_v12  ;;  %v602_v8 = vld [vmem:[%s3739_s1 + $0xa8] sm:$0xff]  ;;  %v633_v11 = vld [vmem:[%s3739_s1 + $0x1a0] sm:$0xff] }
  0x26   : > { %2064 = vmatpush.msra.mxu3 %v584_v12  ;;  %737 = vmatpush.msra.mxu0 %v584_v12  ;;  %v651_v12 = vld [vmem:[%s3739_s1 + $0x230] sm:$0xff] }
  0x27   : > { %2065 = vmatpush.msra.mxu1 %v583_v13  ;;  %2066 = vmatpush.msra.mxu2 %v583_v13 }
  0x28   : > { %2067 = vmatpush.msra.mxu3 %v583_v13  ;;  %738 = vmatpush.msra.mxu0 %v583_v13  ;;  %v601_v13 = vld [vmem:[%s3739_s1 + $0xa0] sm:$0xff] }
  0x29   : > { %2068 = vmatpush.msra.mxu1 %v582_v14  ;;  %2069 = vmatpush.msra.mxu2 %v582_v14 }
  0x2a   : > { %2070 = vmatpush.msra.mxu3 %v582_v14  ;;  %739 = vmatpush.msra.mxu0 %v582_v14  ;;  %v2441_v14 = vld [vmem:[%s2246_s27 + $0x90] sm:$0xff] }
  0x2b   : > { %2071 = vmatpush.msra.mxu1 %v581_v15  ;;  %2072 = vmatpush.msra.mxu2 %v581_v15 }
  0x2c   : > { %765 = vmatmul.f32.vlgmr.msra.gmra.mxu1 %v2252_v16  ;;  %789 = vmatmul.f32.vlgmr.msra.gmra.mxu2 %v2255_v17 }
  0x2d   : > { %951 = vmatpush.msrb.mxu2 %v628_v18  ;;  %2073 = vmatpush.msra.mxu3 %v581_v15  ;;  %v616_v18 = vld [vmem:[%s3739_s1 + $0x118] sm:$0xff] }
  0x2e   : > { %813 = vmatmul.f32.vlgmr.msra.gmra.mxu3 %v255_v19  ;;  %838 = vmatpush.msrb.mxu1 %v612_v20  ;;  %v632_v19 = vld [vmem:[%s3739_s1 + $0x198] sm:$0xff]  ;;  %v261_v20 = vld [vmem:[%s2246_s27 + $0x150] sm:$0xff] }
  0x2f   : > { %1064 = vmatpush.msrb.mxu3 %v644_v21  ;;  %952 = vmatpush.msrb.mxu2 %v627_v22  ;;  %v650_v21 = vld [vmem:[%s3739_s1 + $0x228] sm:$0xff]  ;;  %v600_v22 = vld [vmem:[%s3739_s1 + $0x98] sm:$0xff] }
  0x30   : > { %839 = vmatpush.msrb.mxu1 %v611_v23  ;;  %740 = vmatpush.msra.mxu0 %v581_v15  ;;  %v2444_v15 = vld [vmem:[%s2246_s27 + $0xf0] sm:$0xff] }
  0x31   : > { %1065 = vmatpush.msrb.mxu3 %v643_v24  ;;  %953 = vmatpush.msrb.mxu2 %v626_v25  ;;  %v615_v23 = vld [vmem:[%s3739_s1 + $0x110] sm:$0xff]  ;;  %v649_v25 = vld [vmem:[%s3739_s1 + $0x220] sm:$0xff] }
  0x32   : > { %741 = vmatmul.f32.vlgmr.msra.gmra.mxu0 %v2282_v26  ;;  %840 = vmatpush.msrb.mxu1 %v610_v27  ;;  %v631_v24 = vld [vmem:[%s3739_s1 + $0x190] sm:$0xff] }
  0x33   : > { %1066 = vmatpush.msrb.mxu3 %v642_v28  ;;  %1177 = vmatpush.msrb.mxu0 %v660_v29  ;;  %v599_v27 = vld [vmem:[%s3739_s1 + $0x90] sm:$0xff]  ;;  %v614_v28 = vld [vmem:[%s3739_s1 + $0x108] sm:$0xff] }
  0x34   : > { %768 = vmatmul.f32.gmra.mxu1 %v2294_v30  ;;  %792 = vmatmul.f32.gmra.mxu2 %v2297_v31  ;;  %v2478_v29 = vld [vmem:[%s2246_s27 + $0x30] sm:$0xff] }
  0x35   : > { %954 = vmatpush.msrb.mxu2 %v625_v32  ;;  %1067 = vmatpush.msrb.mxu3 %v641_v33  ;;  %v630_v32 = vld [vmem:[%s3739_s1 + $0x188] sm:$0xff]  ;;  %v648_v33 = vld [vmem:[%s3739_s1 + $0x218] sm:$0xff] }
  0x36   : > { %816 = vmatmul.f32.gmra.mxu3 %v256_v34  ;;  %1178 = vmatpush.msrb.mxu0 %v659_v35  ;;  %v598_v34 = vld [vmem:[%s3739_s1 + $0x88] sm:$0xff]  ;;  %v2490_v35 = vld [vmem:[%s2246_s27 + $0x98] sm:$0xff] }
  0x37   : > { %841 = vmatpush.msrb.mxu1 %v609_v36  ;;  %955 = vmatpush.msrb.mxu2 %v624_v37  ;;  %v2493_v36 = vld [vmem:[%s2246_s27 + $0xf8] sm:$0xff]  ;;  %v613_v37 = vld [vmem:[%s3739_s1 + $0x100] sm:$0xff] }
  0x38   : > { %1068 = vmatpush.msrb.mxu3 %v640_v38  ;;  %1179 = vmatpush.msrb.mxu0 %v658_v39  ;;  %v629_v38 = vld [vmem:[%s3739_s1 + $0x180] sm:$0xff]  ;;  %v262_v39 = vld [vmem:[%s2246_s27 + $0x158] sm:$0xff] }
  0x39   : > { %842 = vmatpush.msrb.mxu1 %v608_v40  ;;  %956 = vmatpush.msrb.mxu2 %v623_v41  ;;  %v647_v40 = vld [vmem:[%s3739_s1 + $0x210] sm:$0xff]  ;;  %v597_v41 = vld [vmem:[%s3739_s1 + $0x80] sm:$0xff] }
  0x3a   : > { %744 = vmatmul.f32.gmra.mxu0 %v2331_v42  ;;  %1069 = vmatpush.msrb.mxu3 %v639_v43  ;;  %v692_v43 = vld [vmem:[%s3739_s1 + $0x378] sm:$0xff] }
  0x3b   : > { %1180 = vmatpush.msrb.mxu0 %v657_v44  ;;  %843 = vmatpush.msrb.mxu1 %v607_v45  ;;  %v646_v44 = vld [vmem:[%s3739_s1 + $0x208] sm:$0xff]  ;;  %v708_v45 = vld [vmem:[%s3739_s1 + $0x3f8] sm:$0xff] }
  0x3c   : > { %771 = vmatmul.f32.gmra.mxu1 %v2343_v46  ;;  %795 = vmatmul.f32.gmra.mxu2 %v2346_v47 }
  0x3d   : > { %957 = vmatpush.msrb.mxu2 %v622_v48  ;;  %1070 = vmatpush.msrb.mxu3 %v638_v49  ;;  %v676_v48 = vld [vmem:[%s3739_s1 + $0x2f8] sm:$0xff] }
  0x3e   : > { %819 = vmatmul.f32.gmra.mxu3 %v258_v50  ;;  %1181 = vmatpush.msrb.mxu0 %v656_v51  ;;  %v2524_v49 = vld [vmem:[%s2246_s27 + $0x38] sm:$0xff]  ;;  %v645_v50 = vld [vmem:[%s3739_s1 + $0x200] sm:$0xff]  ;;  %v2530_v51 = vld [vmem:[%s2246_s27 + $0xa8] sm:$0xff] }
  0x3f   : > { %844 = vmatpush.msrb.mxu1 %v606_v52  ;;  %958 = vmatpush.msrb.mxu2 %v621_v53  ;;  %v2533_v52 = vld [vmem:[%s2246_s27 + $0x108] sm:$0xff]  ;;  %v724_v53 = vld [vmem:[%s3739_s1 + $0x478] sm:$0xff] }
  0x40   : > { %1071 = vmatpush.msrb.mxu3 %v637_v54  ;;  %1182 = vmatpush.msrb.mxu0 %v655_v55  ;;  %v264_v54 = vld [vmem:[%s2246_s27 + $0x168] sm:$0xff]  ;;  %v691_v55 = vld [vmem:[%s3739_s1 + $0x370] sm:$0xff] }
  0x41   : > { %845 = vmatpush.msrb.mxu1 %v605_v56  ;;  %959 = vmatpush.msrb.mxu2 %v620_v57  ;;  %v707_v56 = vld [vmem:[%s3739_s1 + $0x3f0] sm:$0xff] }
  0x42   : > { %747 = vmatmul.f32.gmra.mxu0 %v2380_v58  ;;  %1072 = vmatpush.msrb.mxu3 %v636_v59  ;;  %v675_v57 = vld [vmem:[%s3739_s1 + $0x2f0] sm:$0xff]  ;;  %v2552_v59 = vld [vmem:[%s2246_s27 + $0x48] sm:$0xff] }
  0x43   : > { %1183 = vmatpush.msrb.mxu0 %v654_v60  ;;  %846 = vmatpush.msrb.mxu1 %v604_v61  ;;  %v2555_v60 = vld [vmem:[%s2246_s27 + $0xb0] sm:$0xff] }
  0x44   : > { %774 = vmatmul.f32.gmra.mxu1 %v2392_v62  ;;  %798 = vmatmul.f32.gmra.mxu2 %v2395_v63  ;;  %v2558_v61 = vld [vmem:[%s2246_s27 + $0x110] sm:$0xff] }
  0x45   : > { %960 = vmatpush.msrb.mxu2 %v619_v0  ;;  %1073 = vmatpush.msrb.mxu3 %v635_v1  ;;  %v265_v0 = vld [vmem:[%s2246_s27 + $0x170] sm:$0xff]  ;;  %v322_v1 = vrot.slane %v2282_v26, 1 }
  0x46   : > { %822 = vmatmul.f32.gmra.mxu3 %v259_v2  ;;  %1184 = vmatpush.msrb.mxu0 %v653_v3  ;;  %v435_v2 = vrot.slane %v2282_v26, 2  ;;  %v323_v3 = vrot.slane %v2331_v42, 1  ;;  %v221_v26 = vld [vmem:[%s2246_s27 + $0x10] sm:$0x3] }
  0x47   : > { %847 = vmatpush.msrb.mxu1 %v603_v4  ;;  %961 = vmatpush.msrb.mxu2 %v618_v5  ;;  %v436_v4 = vrot.slane %v2331_v42, 2  ;;  %v723_v5 = vld [vmem:[%s3739_s1 + $0x470] sm:$0xff]  ;;  %v327_v42 = vrot.slane %v2380_v58, 1 }
  0x48   : > { %1074 = vmatpush.msrb.mxu3 %v634_v6  ;;  %1185 = vmatpush.msrb.mxu0 %v652_v7  ;;  %v2572_v6 = vld [vmem:[%s2246_s27 + $0x50] sm:$0xff]  ;;  %v324_v7 = vsel %vm321_vm0, %v322_v1, %v323_v3  ;;  %v672_v1 = vld [vmem:[%s3739_s1 + $0x2d8] sm:$0xff] }
  0x49   : > { %848 = vmatpush.msrb.mxu1 %v602_v8  ;;  %962 = vmatpush.msrb.mxu2 %v617_v9  ;;  %v437_v8 = vsel %vm434_vm1, %v435_v2, %v436_v4  ;;  %v328_v9 = vrot.slane %v2429_v10, 1  ;;  %v230_v2 = vld [vmem:[%s2246_s27 + $0x58] sm:$0x3] }
  0x4a   : > { %750 = vmatmul.f32.gmra.mxu0 %v2429_v10  ;;  %1075 = vmatpush.msrb.mxu3 %v633_v11  ;;  %v690_v11 = vld [vmem:[%s3739_s1 + $0x368] sm:$0xff] }
  0x4b   : > { %1186 = vmatpush.msrb.mxu0 %v651_v12  ;;  %849 = vmatpush.msrb.mxu1 %v601_v13  ;;  %v325_v12 = vrot.slane %v221_v26, 1  ;;  %v438_v13 = vrot.slane %v221_v26, 2 }
  0x4c   : > { %777 = vmatmul.f32.gmra.mxu1 %v2441_v14  ;;  %801 = vmatmul.f32.gmra.mxu2 %v2444_v15 }
  0x4d   : > { %963 = vmatpush.msrb.mxu2 %v616_v18  ;;  %1076 = vmatpush.msrb.mxu3 %v632_v19  ;;  %v706_v18 = vld [vmem:[%s3739_s1 + $0x3e8] sm:$0xff] }
  0x4e   : > { %825 = vmatmul.f32.gmra.mxu3 %v261_v20  ;;  %1187 = vmatpush.msrb.mxu0 %v650_v21  ;;  %v674_v19 = vld [vmem:[%s3739_s1 + $0x2e8] sm:$0xff]  ;;  %v329_v20 = vsel %vm321_vm0, %v327_v42, %v328_v9 }
  0x4f   : > { %850 = vmatpush.msrb.mxu1 %v600_v22  ;;  %964 = vmatpush.msrb.mxu2 %v615_v23  ;;  %v224_v21 = vld [vmem:[%s2246_s27 + $0x28] sm:$0x3]  ;;  %v326_v22 = vsel %vm321_vm0, %v323_v3, %v325_v12  ;;  %v439_v23 = vsel %vm434_vm1, %v436_v4, %v438_v13  ;;  %v340_v4 = vrot.slane %v230_v2, 1  ;;  %v703_v12 = vld [vmem:[%s3739_s1 + $0x3d0] sm:$0xff] }
  0x50   : > { %1077 = vmatpush.msrb.mxu3 %v631_v24  ;;  %1188 = vmatpush.msrb.mxu0 %v649_v25  ;;  %v330_v24 = vrot.slane %v224_v21, 1  ;;  %v440_v25 = vrot.slane %v2380_v58, 2 }
  0x51   : > { %851 = vmatpush.msrb.mxu1 %v599_v27  ;;  %965 = vmatpush.msrb.mxu2 %v614_v28  ;;  %v441_v27 = vrot.slane %v2429_v10, 2  ;;  %v722_v28 = vld [vmem:[%s3739_s1 + $0x468] sm:$0xff] }
  0x52   : > { %753 = vmatmul.f32.gmra.mxu0 %v2478_v29  ;;  %1078 = vmatpush.msrb.mxu3 %v630_v32  ;;  %v331_v32 = vsel %vm321_vm0, %v328_v9, %v330_v24  ;;  %v343_v9 = vrot.slane %v2294_v30, 1  ;;  %v719_v24 = vld [vmem:[%s3739_s1 + $0x450] sm:$0xff] }
  0x53   : > { %1189 = vmatpush.msrb.mxu0 %v648_v33  ;;  %852 = vmatpush.msrb.mxu1 %v598_v34  ;;  %v2602_v33 = vsel %vm434_vm1, %v440_v25, %v441_v27  ;;  %v332_v34 = vrot.slane %v2478_v29, 1 }
  0x54   : > { %780 = vmatmul.f32.gmra.mxu1 %v2490_v35  ;;  %804 = vmatmul.f32.gmra.mxu2 %v2493_v36 }
  0x55   : > { %966 = vmatpush.msrb.mxu2 %v613_v37  ;;  %1079 = vmatpush.msrb.mxu3 %v629_v38  ;;  %v443_v37 = vrot.slane %v224_v21, 2  ;;  %v705_v38 = vld [vmem:[%s3739_s1 + $0x3e0] sm:$0xff] }
  0x56   : > { %828 = vmatmul.f32.gmra.mxu3 %v262_v39  ;;  %1190 = vmatpush.msrb.mxu0 %v647_v40  ;;  %v673_v39 = vld [vmem:[%s3739_s1 + $0x2e0] sm:$0xff] }
  0x57   : > { %853 = vmatpush.msrb.mxu1 %v597_v41  ;;  %1403 = vmatpush.msra.mxu2 %v692_v43  ;;  %v227_v41 = vld [vmem:[%s2246_s27 + $0x40] sm:$0x3]  ;;  %v2622_v43 = vsel %vm434_vm1, %v441_v27, %v443_v37 }
  0x58   : > { %1191 = vmatpush.msrb.mxu0 %v646_v44  ;;  %1516 = vmatpush.msra.mxu3 %v708_v45  ;;  %v335_v44 = vrot.slane %v227_v41, 1  ;;  %v445_v45 = vrot.slane %v2478_v29, 2 }
  0x59   : > { %1290 = vmatpush.msra.mxu1 %v676_v48  ;;  %1404 = vmatpush.msra.mxu2 %v691_v55  ;;  %v446_v48 = vrot.slane %v2524_v49, 2  ;;  %v338_v55 = vrot.slane %v2572_v6, 1 }
  0x5a   : > { %756 = vmatmul.f32.gmra.mxu0 %v2524_v49  ;;  %1517 = vmatpush.msra.mxu3 %v707_v56  ;;  %v448_v56 = vrot.slane %v227_v41, 2  ;;  %v236_v41 = vld [vmem:[%s2246_s27 + $0x88] sm:$0x3] }
  0x5b   : > { %1192 = vmatpush.msrb.mxu0 %v645_v50  ;;  %1291 = vmatpush.msra.mxu1 %v675_v57  ;;  %v721_v50 = vld [vmem:[%s3739_s1 + $0x460] sm:$0xff]  ;;  %v704_v57 = vld [vmem:[%s3739_s1 + $0x3d8] sm:$0xff]  ;;  %v2670_v26 = vsel %vm321_vm0, %v338_v55, %v340_v4 }
  0x5c   : > { %783 = vmatmul.f32.gmra.mxu1 %v2530_v51  ;;  %807 = vmatmul.f32.gmra.mxu2 %v2533_v52  ;;  %v2658_v3 = vsel %vm434_vm1, %v446_v48, %v448_v56 }
  0x5d   : > { %1629 = vmatpush.msra.mxu0 %v724_v53  ;;  %1405 = vmatpush.msra.mxu2 %v690_v11  ;;  %v453_v11 = vrot.slane %v230_v2, 2 }
  0x5e   : > { %831 = vmatmul.f32.gmra.mxu3 %v264_v54  ;;  %1292 = vmatpush.msra.mxu1 %v674_v19  ;;  %v2636_v54 = vsel %vm434_vm1, %v445_v45, %v446_v48  ;;  %v233_v19 = vld [vmem:[%s2246_s27 + $0x70] sm:$0x3] }
  0x5f   : > { %1630 = vmatpush.msra.mxu0 %v723_v5  ;;  %1518 = vmatpush.msra.mxu3 %v706_v18  ;;  %v450_v5 = vrot.slane %v2552_v59, 2  ;;  %v671_v18 = vld [vmem:[%s3739_s1 + $0x2d0] sm:$0xff]  ;;  %v345_v21 = vrot.slane %v233_v19, 1 }
  0x60   : > { %1293 = vmatpush.msra.mxu1 %v673_v39  ;;  %v670_v39 = vld [vmem:[%s3739_s1 + $0x2c8] sm:$0xff] }
  0x61   : > { %1631 = vmatpush.msra.mxu0 %v722_v28  ;;  %1519 = vmatpush.msra.mxu3 %v705_v38  ;;  %v2707_v25 = vsel %vm321_vm0, %v343_v9, %v345_v21 }
  0x62   : > { %759 = vmatmul.f32.gmra.mxu0 %v2552_v59  ;;  %1294 = vmatpush.msra.mxu1 %v672_v1 }
  0x63   : > { %1632 = vmatpush.msra.mxu0 %v721_v50  ;;  %1520 = vmatpush.msra.mxu3 %v704_v57  ;;  %v350_v50 = vrot.slane %v236_v41, 1 }
  0x64   : > { %786 = vmatmul.f32.gmra.mxu1 %v2555_v60  ;;  %810 = vmatmul.f32.gmra.mxu2 %v2558_v61 }
  0x65   : > { %1521 = vmatpush.msra.mxu3 %v703_v12  ;;  %1295 = vmatpush.msra.mxu1 %v671_v18  ;;  %v669_v12 = vld [vmem:[%s3739_s1 + $0x2c0] sm:$0xff] }
  0x66   : > { %834 = vmatmul.f32.gmra.mxu3 %v265_v0  ;;  %v239_v18 = vld [vmem:[%s2246_s27 + $0xa0] sm:$0x3] }
  0x67   : > { %1296 = vmatpush.msra.mxu1 %v670_v39 }
  0x69   : > { %1297 = vmatpush.msra.mxu1 %v669_v12 }
  0x6a   : > { %762 = vmatmul.f32.gmra.mxu0 %v2572_v6 }
  0x6c   : > { %854 = vmatmul.f32.vlgmr.msrb.gmra.mxu1 %v324_v7  ;;  %967 = vmatmul.f32.vlgmr.msrb.gmra.mxu2 %v437_v8  ;;  %v451_v7 = vrot.slane %v2572_v6, 2  ;;  %v720_v8 = vld [vmem:[%s3739_s1 + $0x458] sm:$0xff] }
  0x6d   : > { %1633 = vmatpush.msra.mxu0 %v720_v8  ;;  %v463_v8 = vrot.slane %v236_v41, 2 }
  0x6e   : > { %1080 = vmatmul.f32.vlgmr.msrb.gmra.mxu3 %v2380_v58  ;;  %v333_v58 = vrot.slane %v2524_v49, 1  ;;  %v2673_v42 = vsel %vm434_vm1, %v450_v5, %v451_v7  ;;  %v353_v5 = vrot.slane %v2490_v35, 1 }
  0x6f   : > { %1634 = vmatpush.msra.mxu0 %v719_v24  ;;  %v465_v24 = vrot.slane %v2441_v14, 2 }
  0x70   : > { %v2618_v40 = vsel %vm321_vm0, %v332_v34, %v333_v58  ;;  %v2633_v53 = vsel %vm321_vm0, %v333_v58, %v335_v44  ;;  %v458_v34 = vrot.slane %v233_v19, 2  ;;  %v702_v58 = vld [vmem:[%s3739_s1 + $0x3c8] sm:$0xff] }
  0x71   : > { %1522 = vmatpush.msra.mxu3 %v702_v58 }
  0x72   : > { %1193 = vmatmul.f32.vlgmr.msrb.gmra.mxu0 %v329_v20 }
  0x74   : > { %857 = vmatmul.f32.gmra.mxu1 %v326_v22  ;;  %970 = vmatmul.f32.gmra.mxu2 %v439_v23  ;;  %v455_v22 = vrot.slane %v2252_v16, 2  ;;  %v456_v23 = vrot.slane %v2294_v30, 2 }
  0x76   : > { %1083 = vmatmul.f32.gmra.mxu3 %v2429_v10  ;;  %v689_v10 = vld [vmem:[%s3739_s1 + $0x360] sm:$0xff]  ;;  %v2712_v28 = vsel %vm434_vm1, %v455_v22, %v456_v23  ;;  %v2742_v48 = vsel %vm434_vm1, %v456_v23, %v458_v34  ;;  %v355_v23 = vrot.slane %v239_v18, 1 }
  0x77   : > { %1406 = vmatpush.msra.mxu2 %v689_v10 }
  0x78   : > { %v2811_v58 = vsel %vm321_vm0, %v353_v5, %v355_v23 }
  0x79   : > { %3788 = vst [vmem:[#allocation8_spill] sm:$0xff] %v2811_v58 }
  0x7a   : > { %1196 = vmatmul.f32.gmra.mxu0 %v331_v32 }
  0x7c   : > { %860 = vmatmul.f32.gmra.mxu1 %v329_v20  ;;  %973 = vmatmul.f32.gmra.mxu2 %v2602_v33  ;;  %v2695_v20 = vsel %vm434_vm1, %v451_v7, %v453_v11  ;;  %v685_v7 = vld [vmem:[%s3739_s1 + $0x340] sm:$0xff] }
  0x7e   : > { %1086 = vmatmul.f32.gmra.mxu3 %v2478_v29  ;;  %v337_v29 = vrot.slane %v2552_v59, 1 }
  0x80   : > { %v2651_v0 = vsel %vm321_vm0, %v337_v29, %v338_v55  ;;  %v460_v29 = vrot.slane %v2343_v46, 2  ;;  %v461_v55 = vrot.slane %v2392_v62, 2 }
  0x82   : > { %1199 = vmatmul.f32.gmra.mxu0 %v2618_v40  ;;  %v2795_v22 = vsel %vm434_vm1, %v461_v55, %v463_v8  ;;  %v242_v8 = vld [vmem:[%s2246_s27 + $0xb8] sm:$0x3] }
  0x83   : > { %3787 = vst [vmem:[#allocation7_spill] sm:$0xff] %v2795_v22 }
  0x84   : > { %863 = vmatmul.f32.gmra.mxu1 %v331_v32  ;;  %976 = vmatmul.f32.gmra.mxu2 %v2622_v43  ;;  %v686_v32 = vld [vmem:[%s3739_s1 + $0x348] sm:$0xff] }
  0x86   : > { %1089 = vmatmul.f32.gmra.mxu3 %v2524_v49  ;;  %v688_v49 = vld [vmem:[%s3739_s1 + $0x358] sm:$0xff] }
  0x87   : > { %1407 = vmatpush.msra.mxu2 %v688_v49  ;;  %v718_v49 = vld [vmem:[%s3739_s1 + $0x448] sm:$0xff] }
  0x88   : > { %1635 = vmatpush.msra.mxu0 %v718_v49  ;;  %v700_v49 = vld [vmem:[%s3739_s1 + $0x3b8] sm:$0xff] }
  0x8a   : > { %1202 = vmatmul.f32.gmra.mxu0 %v2633_v53 }
  0x8c   : > { %866 = vmatmul.f32.gmra.mxu1 %v2618_v40  ;;  %979 = vmatmul.f32.gmra.mxu2 %v2636_v54 }
  0x8e   : > { %1092 = vmatmul.f32.gmra.mxu3 %v2552_v59  ;;  %v342_v59 = vrot.slane %v2252_v16, 1 }
  0x90   : > { %v2688_v13 = vsel %vm321_vm0, %v342_v59, %v343_v9  ;;  %v701_v59 = vld [vmem:[%s3739_s1 + $0x3c0] sm:$0xff] }
  0x91   : > { %1523 = vmatpush.msra.mxu3 %v701_v59  ;;  %v668_v59 = vld [vmem:[%s3739_s1 + $0x2b8] sm:$0xff] }
  0x92   : > { %1205 = vmatmul.f32.gmra.mxu0 %v2651_v0  ;;  %1298 = vmatpush.msra.mxu1 %v668_v59 }
  0x93   : > { %1524 = vmatpush.msra.mxu3 %v700_v49 }
  0x94   : > { %869 = vmatmul.f32.gmra.mxu1 %v2633_v53  ;;  %982 = vmatmul.f32.gmra.mxu2 %v2658_v3 }
  0x96   : > { %1095 = vmatmul.f32.gmra.mxu3 %v2572_v6  ;;  %v687_v6 = vld [vmem:[%s3739_s1 + $0x350] sm:$0xff] }
  0x97   : > { %1408 = vmatpush.msra.mxu2 %v687_v6 }
  0x99   : > { %1409 = vmatpush.msra.mxu2 %v686_v32 }
  0x9a   : > { %1208 = vmatmul.f32.gmra.mxu0 %v2670_v26 }
  0x9b   : > { %1410 = vmatpush.msra.mxu2 %v685_v7 }
  0x9c   : > { %872 = vmatmul.f32.gmra.mxu1 %v2651_v0  ;;  %985 = vmatmul.f32.gmra.mxu2 %v2673_v42 }
  0x9e   : > { %1098 = vmatmul.f32.gmra.mxu3 %v2252_v16  ;;  %v347_v16 = vrot.slane %v2343_v46, 1 }
  0xa2   : > { %1211 = vmatmul.f32.gmra.mxu0 %v2688_v13 }
  0xa4   : > { %875 = vmatmul.f32.gmra.mxu1 %v2670_v26  ;;  %988 = vmatmul.f32.gmra.mxu2 %v2695_v20 }
  0xa6   : > { %1101 = vmatmul.f32.gmra.mxu3 %v2294_v30  ;;  %v348_v30 = vrot.slane %v2392_v62, 1 }
  0xa8   : > { %v2731_v38 = vsel %vm321_vm0, %v347_v16, %v348_v30  ;;  %v2758_v1 = vsel %vm321_vm0, %v348_v30, %v350_v50  ;;  %v466_v16 = vrot.slane %v2490_v35, 2  ;;  %v717_v30 = vld [vmem:[%s3739_s1 + $0x440] sm:$0xff]  ;;  %v358_v50 = vrot.slane %v2555_v60, 1 }
  0xa9   : > { %v2709_v27 = vpop.f32.mrf.mxu1  ;;  %3783 = vst [vmem:[#allocation3_spill] sm:$0xff] %v2758_v1  ;;  %1636 = vmatpush.msra.mxu0 %v717_v30  ;;  %v470_v30 = vrot.slane %v2530_v51, 2 }
  0xaa   : > { %1214 = vmatmul.f32.gmra.mxu0 %v2707_v25 }
  0xac   : > { %878 = vmatmul.f32.gmra.mxu1 %v2688_v13  ;;  %991 = vmatmul.f32.gmra.mxu2 %v2712_v28 }
  0xae   : > { %1104 = vmatmul.f32.gmra.mxu3 %v2343_v46  ;;  %v2765_v46 = vsel %vm434_vm1, %v460_v29, %v461_v55  ;;  %v684_v29 = vld [vmem:[%s3739_s1 + $0x338] sm:$0xff]  ;;  %v468_v55 = vrot.slane %v239_v18, 2 }
  0xaf   : > { %v2726_v10 = vpop.f32.mrf.mxu2  ;;  %v2728_v37 = vpop.f32.mrf.mxu0  ;;  %1411 = vmatpush.msra.mxu2 %v684_v29  ;;  %v716_v29 = vld [vmem:[%s3739_s1 + $0x438] sm:$0xff] }
  0xb0   : > { %v2848_v23 = vsel %vm434_vm1, %v466_v16, %v468_v55  ;;  %1637 = vmatpush.msra.mxu0 %v716_v29 }
  0xb1   : > { %v2737_v44 = vpop.f32.mrf.mxu1  ;;  %v2739_v45 = vpop.f32.mrf.mxu3  ;;  %3793 = vst [vmem:[#allocation13_spill] sm:$0xff] %v2848_v23 }
  0xb2   : > { %3782 = vst [vmem:[#allocation2_spill] sm:$0xff] %v2739_v45  ;;  %1217 = vmatmul.f32.gmra.mxu0 %v2731_v38 }
  0xb4   : > { %881 = vmatmul.f32.gmra.mxu1 %v2707_v25  ;;  %994 = vmatmul.f32.gmra.mxu2 %v2742_v48 }
  0xb6   : > { %1107 = vmatmul.f32.gmra.mxu3 %v2392_v62  ;;  %v352_v62 = vrot.slane %v2441_v14, 1 }
  0xb7   : > { %v2753_v56 = vpop.f32.mrf.mxu2  ;;  %v2755_v57 = vpop.f32.mrf.mxu0 }
  0xb8   : > { %v2784_v11 = vsel %vm321_vm0, %v352_v62, %v353_v5 }
  0xb9   : > { %v2760_v2 = vpop.f32.mrf.mxu1  ;;  %v2762_v4 = vpop.f32.mrf.mxu3  ;;  %3785 = vst [vmem:[#allocation5_spill] sm:$0xff] %v2784_v11 }
  0xba   : > { %3784 = vst [vmem:[#allocation4_spill] sm:$0xff] %v2762_v4  ;;  %1220 = vmatmul.f32.gmra.mxu0 %v2758_v1  ;;  %v368_v4 = vrot.slane %v2395_v63, 1 }
  0xbc   : > { %884 = vmatmul.f32.gmra.mxu1 %v2731_v38  ;;  %997 = vmatmul.f32.gmra.mxu2 %v2765_v46 }
  0xbe   : > { %1110 = vmatmul.f32.gmra.mxu3 %v2441_v14  ;;  %v2818_v14 = vsel %vm434_vm1, %v465_v24, %v466_v16  ;;  %v360_v24 = vrot.slane %v242_v8, 1 }
  0xbf   : > { %v2779_v9 = vpop.f32.mrf.mxu2  ;;  %v2781_v6 = vpop.f32.mrf.mxu0  ;;  %3790 = vst [vmem:[#allocation10_spill] sm:$0xff] %v2818_v14 }
  0xc0   : > { %v2864_v49 = vsel %vm321_vm0, %v358_v50, %v360_v24  ;;  %v473_v24 = vrot.slane %v242_v8, 2  ;;  %v667_v8 = vld [vmem:[%s3739_s1 + $0x2b0] sm:$0xff] }
  0xc1   : > { %v2790_v19 = vpop.f32.mrf.mxu1  ;;  %v2792_v21 = vpop.f32.mrf.mxu3  ;;  %3794 = vst [vmem:[#allocation14_spill] sm:$0xff] %v2864_v49  ;;  %1299 = vmatpush.msra.mxu1 %v667_v8 }
  0xc2   : > { %3786 = vst [vmem:[#allocation6_spill] sm:$0xff] %v2792_v21  ;;  %1223 = vmatmul.f32.gmra.mxu0 %v2784_v11 }
  0xc4   : > { %887 = vmatmul.f32.gmra.mxu1 %v2758_v1  ;;  %1000 = vmatmul.f32.gmra.mxu2 %v2795_v22 }
  0xc6   : > { %1113 = vmatmul.f32.gmra.mxu3 %v2490_v35  ;;  %v357_v35 = vrot.slane %v2530_v51, 1 }
  0xc7   : > { %v2806_v32 = vpop.f32.mrf.mxu2  ;;  %v2808_v34 = vpop.f32.mrf.mxu0 }
  0xc8   : > { %v2837_v7 = vsel %vm321_vm0, %v357_v35, %v358_v50  ;;  %v471_v35 = vrot.slane %v2555_v60, 2  ;;  %v683_v50 = vld [vmem:[%s3739_s1 + $0x330] sm:$0xff] }
  0xc9   : > { %v2813_v39 = vpop.f32.mrf.mxu1  ;;  %v2815_v41 = vpop.f32.mrf.mxu3  ;;  %3791 = vst [vmem:[#allocation11_spill] sm:$0xff] %v2837_v7  ;;  %1412 = vmatpush.msra.mxu2 %v683_v50 }
  0xca   : > { %3789 = vst [vmem:[#allocation9_spill] sm:$0xff] %v2815_v41  ;;  %1226 = vmatmul.f32.gmra.mxu0 %v2811_v58  ;;  %v363_v41 = vrot.slane %v2297_v31, 1 }
  0xcc   : > { %890 = vmatmul.f32.gmra.mxu1 %v2784_v11  ;;  %1003 = vmatmul.f32.gmra.mxu2 %v2818_v14  ;;  %v248_v11 = vld [vmem:[%s2246_s27 + $0xe8] sm:$0x3] }
  0xcd   : > { %v370_v22 = vrot.slane %v248_v11, 1 }
  0xce   : > { %1116 = vmatmul.f32.gmra.mxu3 %v2530_v51  ;;  %v2871_v51 = vsel %vm434_vm1, %v470_v30, %v471_v35  ;;  %v699_v30 = vld [vmem:[%s3739_s1 + $0x3b0] sm:$0xff] }
  0xcf   : > { %v2832_v62 = vpop.f32.mrf.mxu2  ;;  %v2834_v5 = vpop.f32.mrf.mxu0  ;;  %3796 = vst [vmem:[#allocation16_spill] sm:$0xff] %v2871_v51  ;;  %1525 = vmatpush.msra.mxu3 %v699_v30  ;;  %v476_v30 = vrot.slane %v2297_v31, 2 }
  0xd1   : > { %v2843_v12 = vpop.f32.mrf.mxu1  ;;  %v2845_v18 = vpop.f32.mrf.mxu3 }
  0xd2   : > { %3792 = vst [vmem:[#allocation12_spill] sm:$0xff] %v2845_v18  ;;  %1229 = vmatmul.f32.gmra.mxu0 %v2837_v7 }
  0xd4   : > { %893 = vmatmul.f32.gmra.mxu1 %v2811_v58  ;;  %1006 = vmatmul.f32.gmra.mxu2 %v2848_v23  ;;  %v2901_v23 = vsel %vm434_vm1, %v471_v35, %v473_v24 }
  0xd5   : > { %3799 = vst [vmem:[#allocation19_spill] sm:$0xff] %v2901_v23 }
  0xd6   : > { %1119 = vmatmul.f32.gmra.mxu3 %v2555_v60  ;;  %v362_v60 = vrot.slane %v2255_v17, 1 }
  0xd7   : > { %v2859_v16 = vpop.f32.mrf.mxu2  ;;  %v2861_v55 = vpop.f32.mrf.mxu0 }
  0xd9   : > { %v2866_v59 = vpop.f32.mrf.mxu1  ;;  %v2868_v18 = vpop.f32.mrf.mxu3 }
  0xda   : > { %3795 = vst [vmem:[#allocation15_spill] sm:$0xff] %v2868_v18  ;;  %1232 = vmatmul.f32.gmra.mxu0 %v2864_v49 }
  0xdc   : > { %896 = vmatmul.f32.gmra.mxu1 %v2837_v7  ;;  %1009 = vmatmul.f32.gmra.mxu2 %v2871_v51  ;;  %v2890_v7 = vsel %vm321_vm0, %v362_v60, %v363_v41  ;;  %v245_v51 = vld [vmem:[%s2246_s27 + $0xd0] sm:$0x3]  ;;  %v475_v60 = vrot.slane %v2255_v17, 2 }
  0xdd   : > { %3797 = vst [vmem:[#allocation17_spill] sm:$0xff] %v2890_v7  ;;  %v365_v58 = vrot.slane %v245_v51, 1 }
  0xde   : > { %1122 = vmatmul.f32.gmra.mxu3 %v2255_v17  ;;  %v2922_v17 = vsel %vm434_vm1, %v475_v60, %v476_v30  ;;  %v698_v60 = vld [vmem:[%s3739_s1 + $0x3a8] sm:$0xff] }
  0xdf   : > { %v2885_v29 = vpop.f32.mrf.mxu2  ;;  %v2887_v18 = vpop.f32.mrf.mxu0  ;;  %v2917_v8 = vsel %vm321_vm0, %v363_v41, %v365_v58  ;;  %3801 = vst [vmem:[#allocation21_spill] sm:$0xff] %v2922_v17  ;;  %v478_v58 = vrot.slane %v245_v51, 2  ;;  %1526 = vmatpush.msra.mxu3 %v698_v60  ;;  %v666_v51 = vld [vmem:[%s3739_s1 + $0x2a8] sm:$0xff] }
  0xe0   : > { %1300 = vmatpush.msra.mxu1 %v666_v51 }
  0xe1   : > { %v2896_v50 = vpop.f32.mrf.mxu1  ;;  %v2898_v21 = vpop.f32.mrf.mxu3 }
  0xe2   : > { %3798 = vst [vmem:[#allocation18_spill] sm:$0xff] %v2898_v21  ;;  %1235 = vmatmul.f32.gmra.mxu0 %v2890_v7  ;;  %v715_v21 = vld [vmem:[%s3739_s1 + $0x430] sm:$0xff] }
  0xe3   : > { %1638 = vmatpush.msra.mxu0 %v715_v21  ;;  %v682_v21 = vld [vmem:[%s3739_s1 + $0x328] sm:$0xff] }
  0xe4   : > { %899 = vmatmul.f32.gmra.mxu1 %v2864_v49  ;;  %1012 = vmatmul.f32.gmra.mxu2 %v2901_v23 }
  0xe5   : > { %1413 = vmatpush.msra.mxu2 %v682_v21 }
  0xe6   : > { %1125 = vmatmul.f32.gmra.mxu3 %v2297_v31  ;;  %v367_v31 = vrot.slane %v2346_v47, 1 }
  0xe7   : > { %v2912_v35 = vpop.f32.mrf.mxu2  ;;  %v2914_v24 = vpop.f32.mrf.mxu0 }
  0xe9   : > { %v2919_v49 = vpop.f32.mrf.mxu3  ;;  %v855_v23 = vpop.f32.mrf.mxu1 }
  0xea   : > { %3800 = vst [vmem:[#allocation20_spill] sm:$0xff] %v2919_v49  ;;  %1238 = vmatmul.f32.gmra.mxu0 %v2917_v8  ;;  %v856_v41 = vadd.f32 %v855_v23, %v2728_v37  ;;  %v2945_v23 = vsel %vm434_vm1, %v476_v30, %v478_v58  ;;  %v714_v30 = vld [vmem:[%s3739_s1 + $0x428] sm:$0xff] }
  0xeb   : > { %1639 = vmatpush.msra.mxu0 %v714_v30 }
  0xec   : > { %902 = vmatmul.f32.gmra.mxu1 %v2890_v7  ;;  %1015 = vmatmul.f32.gmra.mxu2 %v2922_v17  ;;  %v2938_v7 = vsel %vm321_vm0, %v367_v31, %v368_v4  ;;  %v481_v31 = vrot.slane %v2395_v63, 2 }
  0xee   : > { %1128 = vmatmul.f32.gmra.mxu3 %v2346_v47 }
  0xef   : > { %v968_v49 = vpop.f32.mrf.mxu2  ;;  %v1194_v14 = vpop.f32.mrf.mxu0 }
  0xf0   : > { %v969_v17 = vadd.f32 %v968_v49, %v856_v41  ;;  %v480_v49 = vrot.slane %v2346_v47, 2 }
  0xf1   : > { %v858_v21 = vpop.f32.mrf.mxu1  ;;  %v1081_v37 = vpop.f32.mrf.mxu3 }
  0xf2   : > { %v1082_v45 = vadd.f32 %v1081_v37, %v969_v17  ;;  %1241 = vmatmul.f32.gmra.mxu0 %v2938_v7  ;;  %v859_v41 = vadd.f32 %v858_v21, %v2755_v57  ;;  %v2963_v47 = vsel %vm434_vm1, %v480_v49, %v481_v31  ;;  %v373_v57 = vrot.slane %v2493_v36, 1 }
  0xf4   : > { %v2948_v1 = vadd.f32 %v1194_v14, %v1082_v45  ;;  %905 = vmatmul.f32.gmra.mxu1 %v2917_v8  ;;  %1018 = vmatmul.f32.gmra.mxu2 %v2945_v23  ;;  %v2960_v45 = vsel %vm321_vm0, %v368_v4, %v370_v22  ;;  %v681_v4 = vld [vmem:[%s3739_s1 + $0x320] sm:$0xff]  ;;  %v483_v22 = vrot.slane %v248_v11, 2 }
  0xf5   : > { %1414 = vmatpush.msra.mxu2 %v681_v4  ;;  %v665_v11 = vld [vmem:[%s3739_s1 + $0x2a0] sm:$0xff] }
  0xf6   : > { %3802 = vst [vmem:[#allocation22_spill] sm:$0xff] %v2948_v1  ;;  %1131 = vmatmul.f32.gmra.mxu3 %v2395_v63  ;;  %v372_v63 = vrot.slane %v2444_v15, 1  ;;  %1301 = vmatpush.msra.mxu1 %v665_v11 }
  0xf7   : > { %v971_v17 = vpop.f32.mrf.mxu2  ;;  %v1197_v58 = vpop.f32.mrf.mxu0 }
  0xf8   : > { %v972_v14 = vadd.f32 %v971_v17, %v859_v41  ;;  %v697_v41 = vld [vmem:[%s3739_s1 + $0x3a0] sm:$0xff] }
  0xf9   : > { %v861_v60 = vpop.f32.mrf.mxu1  ;;  %v1084_v51 = vpop.f32.mrf.mxu3  ;;  %1527 = vmatpush.msra.mxu3 %v697_v41 }
  0xfa   : > { %v1085_v37 = vadd.f32 %v1084_v51, %v972_v14  ;;  %1244 = vmatmul.f32.gmra.mxu0 %v2960_v45  ;;  %v862_v49 = vadd.f32 %v861_v60, %v2781_v6  ;;  %v251_v51 = vld [vmem:[%s2246_s27 + $0x100] sm:$0x3]  ;;  %v2988_v60 = vsel %vm434_vm1, %v481_v31, %v483_v22 }
  0xfb   : > { %v713_v31 = vld [vmem:[%s3739_s1 + $0x420] sm:$0xff] }
  0xfc   : > { %v2968_v21 = vadd.f32 %v1197_v58, %v1085_v37  ;;  %908 = vmatmul.f32.gmra.mxu1 %v2938_v7  ;;  %1021 = vmatmul.f32.gmra.mxu2 %v2963_v47  ;;  %v2981_v58 = vsel %vm321_vm0, %v372_v63, %v373_v57  ;;  %v485_v63 = vrot.slane %v2444_v15, 2 }
  0xfd   : > { %1640 = vmatpush.msra.mxu0 %v713_v31 }
  0xfe   : > { %3803 = vst [vmem:[#allocation23_spill] sm:$0xff] %v2968_v21  ;;  %1134 = vmatmul.f32.gmra.mxu3 %v2444_v15  ;;  %v375_v21 = vrot.slane %v251_v51, 1 }
  0xff   : > { %v974_v30 = vpop.f32.mrf.mxu2  ;;  %v1200_v17 = vpop.f32.mrf.mxu0 }
 0x100   : > { %v975_v14 = vadd.f32 %v974_v30, %v862_v49  ;;  %v486_v49 = vrot.slane %v2493_v36, 2 }
 0x101   : > { %v864_v37 = vpop.f32.mrf.mxu1  ;;  %v1087_v6 = vpop.f32.mrf.mxu3 }
 0x102   : > { %v1088_v4 = vadd.f32 %v1087_v6, %v975_v14  ;;  %1247 = vmatmul.f32.gmra.mxu0 %v2981_v58  ;;  %v865_v41 = vadd.f32 %v864_v37, %v2808_v34  ;;  %v3006_v15 = vsel %vm434_vm1, %v485_v63, %v486_v49  ;;  %v378_v34 = vrot.slane %v2558_v61, 1 }
 0x104   : > { %v2991_v1 = vadd.f32 %v1200_v17, %v1088_v4  ;;  %911 = vmatmul.f32.gmra.mxu1 %v2960_v45  ;;  %1024 = vmatmul.f32.gmra.mxu2 %v2988_v60  ;;  %v3003_v17 = vsel %vm321_vm0, %v373_v57, %v375_v21  ;;  %v680_v57 = vld [vmem:[%s3739_s1 + $0x318] sm:$0xff]  ;;  %v488_v21 = vrot.slane %v251_v51, 2 }
 0x105   : > { %1415 = vmatpush.msra.mxu2 %v680_v57  ;;  %v664_v51 = vld [vmem:[%s3739_s1 + $0x298] sm:$0xff] }
 0x106   : > { %3804 = vst [vmem:[#allocation24_spill] sm:$0xff] %v2991_v1  ;;  %1137 = vmatmul.f32.gmra.mxu3 %v2493_v36  ;;  %v377_v36 = vrot.slane %v2533_v52, 1  ;;  %1302 = vmatpush.msra.mxu1 %v664_v51 }
 0x107   : > { %v977_v22 = vpop.f32.mrf.mxu2  ;;  %v1203_v30 = vpop.f32.mrf.mxu0 }
 0x108   : > { %v978_v14 = vadd.f32 %v977_v22, %v865_v41  ;;  %v696_v41 = vld [vmem:[%s3739_s1 + $0x398] sm:$0xff] }
 0x109   : > { %v867_v11 = vpop.f32.mrf.mxu1  ;;  %v1090_v6 = vpop.f32.mrf.mxu3  ;;  %1528 = vmatpush.msra.mxu3 %v696_v41 }
 0x10a   : > { %v1091_v4 = vadd.f32 %v1090_v6, %v978_v14  ;;  %1250 = vmatmul.f32.gmra.mxu0 %v3003_v17  ;;  %v868_v63 = vadd.f32 %v867_v11, %v2834_v5  ;;  %v254_v6 = vld [vmem:[%s2246_s27 + $0x118] sm:$0x3]  ;;  %v3031_v11 = vsel %vm434_vm1, %v486_v49, %v488_v21 }
 0x10b   : > { %v712_v21 = vld [vmem:[%s3739_s1 + $0x418] sm:$0xff] }
 0x10c   : > { %v3011_v37 = vadd.f32 %v1203_v30, %v1091_v4  ;;  %914 = vmatmul.f32.gmra.mxu1 %v2981_v58  ;;  %1027 = vmatmul.f32.gmra.mxu2 %v3006_v15  ;;  %v3024_v30 = vsel %vm321_vm0, %v377_v36, %v378_v34  ;;  %v490_v36 = vrot.slane %v2533_v52, 2 }
 0x10d   : > { %3806 = vst [vmem:[#allocation26_spill] sm:$0xff] %v3024_v30  ;;  %1641 = vmatpush.msra.mxu0 %v712_v21 }
 0x10e   : > { %3805 = vst [vmem:[#allocation25_spill] sm:$0xff] %v3011_v37  ;;  %1140 = vmatmul.f32.gmra.mxu3 %v2533_v52  ;;  %v380_v37 = vrot.slane %v254_v6, 1 }
 0x10f   : > { %v980_v31 = vpop.f32.mrf.mxu2  ;;  %v1206_v22 = vpop.f32.mrf.mxu0 }
 0x110   : > { %v981_v14 = vadd.f32 %v980_v31, %v868_v63  ;;  %v491_v63 = vrot.slane %v2558_v61, 2 }
 0x111   : > { %v870_v4 = vpop.f32.mrf.mxu1  ;;  %v1093_v5 = vpop.f32.mrf.mxu3 }
 0x112   : > { %v1094_v57 = vadd.f32 %v1093_v5, %v981_v14  ;;  %1253 = vmatmul.f32.gmra.mxu0 %v3024_v30  ;;  %v871_v49 = vadd.f32 %v870_v4, %v2861_v55  ;;  %v3049_v5 = vsel %vm434_vm1, %v490_v36, %v491_v63  ;;  %v3057_v4 = vld [vmem:[%s2246_s27 + $0x128] sm:$0xff]  ;;  %v679_v36 = vld [vmem:[%s3739_s1 + $0x310] sm:$0xff] }
 0x113   : > { %3808 = vst [vmem:[#allocation28_spill] sm:$0xff] %v3049_v5  ;;  %1416 = vmatpush.msra.mxu2 %v679_v36 }
 0x114   : > { %v3034_v1 = vadd.f32 %v1206_v22, %v1094_v57  ;;  %917 = vmatmul.f32.gmra.mxu1 %v3003_v17  ;;  %1030 = vmatmul.f32.gmra.mxu2 %v3031_v11  ;;  %v3046_v22 = vsel %vm321_vm0, %v378_v34, %v380_v37  ;;  %3810 = vst [vmem:[#allocation30_spill] sm:$0xff] %v3057_v4  ;;  %v383_v34 = vrot.slane %v3057_v4, 1 }
 0x116   : > { %3807 = vst [vmem:[#allocation27_spill] sm:$0xff] %v3034_v1  ;;  %1143 = vmatmul.f32.gmra.mxu3 %v2558_v61  ;;  %v3053_v61 = vld [vmem:[%s2246_s27 + $0x120] sm:$0xff] }
 0x117   : > { %v983_v41 = vpop.f32.mrf.mxu2  ;;  %v1209_v31 = vpop.f32.mrf.mxu0  ;;  %3809 = vst [vmem:[#allocation29_spill] sm:$0xff] %v3053_v61  ;;  %v382_v55 = vrot.slane %v3053_v61, 1 }
 0x118   : > { %v984_v14 = vadd.f32 %v983_v41, %v871_v49  ;;  %v493_v49 = vrot.slane %v254_v6, 2  ;;  %v695_v41 = vld [vmem:[%s3739_s1 + $0x390] sm:$0xff] }
 0x119   : > { %v873_v51 = vpop.f32.mrf.mxu1  ;;  %v1096_v52 = vpop.f32.mrf.mxu3  ;;  %1529 = vmatpush.msra.mxu3 %v695_v41  ;;  %v663_v6 = vld [vmem:[%s3739_s1 + $0x290] sm:$0xff] }
 0x11a   : > { %v1097_v57 = vadd.f32 %v1096_v52, %v984_v14  ;;  %1256 = vmatmul.f32.gmra.mxu0 %v3046_v22  ;;  %v874_v21 = vadd.f32 %v873_v51, %v2887_v18  ;;  %v3073_v52 = vsel %vm321_vm0, %v382_v55, %v383_v34  ;;  %v3080_v51 = vsel %vm434_vm1, %v491_v63, %v493_v49  ;;  %v711_v49 = vld [vmem:[%s3739_s1 + $0x410] sm:$0xff] }
 0x11b   : > { %3812 = vst [vmem:[#allocation32_spill] sm:$0xff] %v3073_v52  ;;  %1303 = vmatpush.msra.mxu1 %v663_v6  ;;  %v495_v55 = vrot.slane %v3053_v61, 2  ;;  %1642 = vmatpush.msra.mxu0 %v711_v49 }
 0x11c   : > { %v3060_v37 = vadd.f32 %v1209_v31, %v1097_v57  ;;  %920 = vmatmul.f32.gmra.mxu1 %v3024_v30  ;;  %1033 = vmatmul.f32.gmra.mxu2 %v3049_v5 }
 0x11e   : > { %3811 = vst [vmem:[#allocation31_spill] sm:$0xff] %v3060_v37  ;;  %1146 = vmatmul.f32.gmra.mxu3 %v3053_v61  ;;  %v257_v37 = vld [vmem:[%s2246_s27 + $0x130] sm:$0x3] }
 0x11f   : > { %v986_v31 = vpop.f32.mrf.mxu2  ;;  %v1212_v14 = vpop.f32.mrf.mxu0  ;;  %v385_v5 = vrot.slane %v257_v37, 1 }
 0x120   : > { %v987_v57 = vadd.f32 %v986_v31, %v874_v21  ;;  %v496_v21 = vrot.slane %v3057_v4, 2 }
 0x121   : > { %v876_v36 = vpop.f32.mrf.mxu1  ;;  %v1099_v18 = vpop.f32.mrf.mxu3  ;;  %v3095_v31 = vsel %vm321_vm0, %v383_v34, %v385_v5 }
 0x122   : > { %v1100_v1 = vadd.f32 %v1099_v18, %v987_v57  ;;  %1259 = vmatmul.f32.gmra.mxu0 %v3073_v52  ;;  %v877_v63 = vadd.f32 %v876_v36, %v2914_v24  ;;  %v3098_v18 = vsel %vm434_vm1, %v495_v55, %v496_v21  ;;  %v3102_v24 = vld [vmem:[%s2246_s27 + $0x138] sm:$0xff]  ;;  %v678_v55 = vld [vmem:[%s3739_s1 + $0x308] sm:$0xff] }
 0x123   : > { %3814 = vst [vmem:[#allocation34_spill] sm:$0xff] %v3098_v18  ;;  %v387_v36 = vrot.slane %v3102_v24, 1  ;;  %1417 = vmatpush.msra.mxu2 %v678_v55 }
 0x124   : > { %v3083_v30 = vadd.f32 %v1212_v14, %v1100_v1  ;;  %923 = vmatmul.f32.gmra.mxu1 %v3046_v22  ;;  %1036 = vmatmul.f32.gmra.mxu2 %v3080_v51  ;;  %3815 = vst [vmem:[#allocation35_spill] sm:$0xff] %v3102_v24 }
 0x126   : > { %3813 = vst [vmem:[#allocation33_spill] sm:$0xff] %v3083_v30  ;;  %1149 = vmatmul.f32.gmra.mxu3 %v3057_v4  ;;  %v3106_v4 = vld [vmem:[%s2246_s27 + $0x140] sm:$0xff] }
 0x127   : > { %v989_v1 = vpop.f32.mrf.mxu2  ;;  %v1215_v41 = vpop.f32.mrf.mxu0  ;;  %3816 = vst [vmem:[#allocation36_spill] sm:$0xff] %v3106_v4  ;;  %v388_v5 = vrot.slane %v3106_v4, 1 }
 0x128   : > { %v990_v14 = vadd.f32 %v989_v1, %v877_v63  ;;  %v498_v63 = vrot.slane %v257_v37, 2  ;;  %v694_v1 = vld [vmem:[%s3739_s1 + $0x388] sm:$0xff] }
 0x129   : > { %v879_v57 = vpop.f32.mrf.mxu1  ;;  %v1102_v6 = vpop.f32.mrf.mxu3  ;;  %1530 = vmatpush.msra.mxu3 %v694_v1  ;;  %v662_v37 = vld [vmem:[%s3739_s1 + $0x288] sm:$0xff] }
 0x12a   : > { %v1103_v30 = vadd.f32 %v1102_v6, %v990_v14  ;;  %1262 = vmatmul.f32.gmra.mxu0 %v3095_v31  ;;  %v880_v49 = vadd.f32 %v879_v57, %v2709_v27  ;;  %v3122_v14 = vsel %vm321_vm0, %v387_v36, %v388_v5  ;;  %v3129_v57 = vsel %vm434_vm1, %v496_v21, %v498_v63  ;;  %v710_v63 = vld [vmem:[%s3739_s1 + $0x408] sm:$0xff] }
 0x12b   : > { %3818 = vst [vmem:[#allocation38_spill] sm:$0xff] %v3122_v14  ;;  %1304 = vmatpush.msra.mxu1 %v662_v37  ;;  %v500_v36 = vrot.slane %v3102_v24, 2  ;;  %1643 = vmatpush.msra.mxu0 %v710_v63 }
 0x12c   : > { %v3109_v34 = vadd.f32 %v1215_v41, %v1103_v30  ;;  %926 = vmatmul.f32.gmra.mxu1 %v3073_v52  ;;  %1039 = vmatmul.f32.gmra.mxu2 %v3098_v18 }
 0x12e   : > { %3817 = vst [vmem:[#allocation37_spill] sm:$0xff] %v3109_v34  ;;  %1152 = vmatmul.f32.gmra.mxu3 %v3102_v24  ;;  %v260_v34 = vld [vmem:[%s2246_s27 + $0x148] sm:$0x3] }
 0x12f   : > { %v992_v30 = vpop.f32.mrf.mxu2  ;;  %v1218_v41 = vpop.f32.mrf.mxu0  ;;  %v390_v52 = vrot.slane %v260_v34, 1 }
 0x130   : > { %v993_v6 = vadd.f32 %v992_v30, %v880_v49  ;;  %v501_v49 = vrot.slane %v3106_v4, 2 }
 0x131   : > { %v882_v55 = vpop.f32.mrf.mxu1  ;;  %v1105_v27 = vpop.f32.mrf.mxu3  ;;  %v3144_v30 = vsel %vm321_vm0, %v388_v5, %v390_v52 }
 0x132   : > { %v1106_v18 = vadd.f32 %v1105_v27, %v993_v6  ;;  %1265 = vmatmul.f32.gmra.mxu0 %v3122_v14  ;;  %v883_v21 = vadd.f32 %v882_v55, %v2737_v44  ;;  %3820 = vst [vmem:[#allocation40_spill] sm:$0xff] %v3144_v30  ;;  %v3147_v27 = vsel %vm434_vm1, %v500_v36, %v501_v49  ;;  %v3151_v44 = vld [vmem:[%s2246_s27 + $0x150] sm:$0xff]  ;;  %v677_v36 = vld [vmem:[%s3739_s1 + $0x300] sm:$0xff] }
 0x133   : > { %3821 = vst [vmem:[#allocation41_spill] sm:$0xff] %v3147_v27  ;;  %v392_v55 = vrot.slane %v3151_v44, 1  ;;  %1418 = vmatpush.msra.mxu2 %v677_v36 }
 0x134   : > { %v3132_v61 = vadd.f32 %v1218_v41, %v1106_v18  ;;  %929 = vmatmul.f32.gmra.mxu1 %v3095_v31  ;;  %1042 = vmatmul.f32.gmra.mxu2 %v3129_v57  ;;  %3822 = vst [vmem:[#allocation42_spill] sm:$0xff] %v3151_v44 }
 0x136   : > { %3819 = vst [vmem:[#allocation39_spill] sm:$0xff] %v3132_v61  ;;  %1155 = vmatmul.f32.gmra.mxu3 %v3106_v4  ;;  %v3155_v4 = vld [vmem:[%s2246_s27 + $0x158] sm:$0xff] }
 0x137   : > { %v995_v18 = vpop.f32.mrf.mxu2  ;;  %v1221_v1 = vpop.f32.mrf.mxu0  ;;  %3823 = vst [vmem:[#allocation43_spill] sm:$0xff] %v3155_v4  ;;  %v393_v52 = vrot.slane %v3155_v4, 1 }
 0x138   : > { %v996_v41 = vadd.f32 %v995_v18, %v883_v21  ;;  %v503_v21 = vrot.slane %v260_v34, 2  ;;  %v693_v18 = vld [vmem:[%s3739_s1 + $0x380] sm:$0xff] }
 0x139   : > { %v885_v6 = vpop.f32.mrf.mxu1  ;;  %v1108_v37 = vpop.f32.mrf.mxu3  ;;  %1531 = vmatpush.msra.mxu3 %v693_v18  ;;  %v661_v34 = vld [vmem:[%s3739_s1 + $0x280] sm:$0xff] }
 0x13a   : > { %v1109_v61 = vadd.f32 %v1108_v37, %v996_v41  ;;  %1268 = vmatmul.f32.gmra.mxu0 %v3144_v30  ;;  %v886_v63 = vadd.f32 %v885_v6, %v2760_v2  ;;  %v3171_v41 = vsel %vm321_vm0, %v392_v55, %v393_v52  ;;  %v3178_v6 = vsel %vm434_vm1, %v501_v49, %v503_v21  ;;  %v709_v21 = vld [vmem:[%s3739_s1 + $0x400] sm:$0xff] }
 0x13b   : > { %3825 = vst [vmem:[#allocation45_spill] sm:$0xff] %v3178_v6  ;;  %1305 = vmatpush.msra.mxu1 %v661_v34  ;;  %v505_v55 = vrot.slane %v3151_v44, 2  ;;  %1644 = vmatpush.msra.mxu0 %v709_v21 }
 0x13c   : > { %v3158_v5 = vadd.f32 %v1221_v1, %v1109_v61  ;;  %932 = vmatmul.f32.gmra.mxu1 %v3122_v14  ;;  %1045 = vmatmul.f32.gmra.mxu2 %v3147_v27 }
 0x13e   : > { %3824 = vst [vmem:[#allocation44_spill] sm:$0xff] %v3158_v5  ;;  %1158 = vmatmul.f32.gmra.mxu3 %v3151_v44  ;;  %v263_v5 = vld [vmem:[%s2246_s27 + $0x160] sm:$0x3]  ;;  %v266_v44 = vld [vmem:[%s2246_s27 + $0x178] sm:$0x3] }
 0x13f   : > { %v998_v61 = vpop.f32.mrf.mxu2  ;;  %v1224_v1 = vpop.f32.mrf.mxu0  ;;  %v395_v14 = vrot.slane %v263_v5, 1 }
 0x140   : > { %v999_v37 = vadd.f32 %v998_v61, %v886_v63  ;;  %v506_v63 = vrot.slane %v3155_v4, 2 }
 0x141   : > { %v888_v36 = vpop.f32.mrf.mxu1  ;;  %v1111_v2 = vpop.f32.mrf.mxu3  ;;  %v3193_v61 = vsel %vm321_vm0, %v393_v52, %v395_v14 }
 0x142   : > { %v1112_v27 = vadd.f32 %v1111_v2, %v999_v37  ;;  %1271 = vmatmul.f32.gmra.mxu0 %v3171_v41  ;;  %v889_v49 = vadd.f32 %v888_v36, %v2790_v19  ;;  %v3196_v2 = vsel %vm434_vm1, %v505_v55, %v506_v63  ;;  %v3200_v19 = vld [vmem:[%s2246_s27 + $0x168] sm:$0xff]  ;;  %v508_v55 = vrot.slane %v263_v5, 2 }
 0x143   : > { %3827 = vst [vmem:[#allocation47_spill] sm:$0xff] %v3200_v19  ;;  %v397_v36 = vrot.slane %v3200_v19, 1  ;;  %v400_v5 = vrot.slane %v266_v44, 1 }
 0x144   : > { %v3181_v24 = vadd.f32 %v1224_v1, %v1112_v27  ;;  %935 = vmatmul.f32.gmra.mxu1 %v3144_v30  ;;  %1048 = vmatmul.f32.gmra.mxu2 %v3178_v6 }
 0x146   : > { %3826 = vst [vmem:[#allocation46_spill] sm:$0xff] %v3181_v24  ;;  %1161 = vmatmul.f32.gmra.mxu3 %v3155_v4  ;;  %v3204_v4 = vld [vmem:[%s2246_s27 + $0x170] sm:$0xff] }
 0x147   : > { %v1001_v27 = vpop.f32.mrf.mxu2  ;;  %v1227_v18 = vpop.f32.mrf.mxu0  ;;  %3828 = vst [vmem:[#allocation48_spill] sm:$0xff] %v3204_v4  ;;  %v398_v14 = vrot.slane %v3204_v4, 1 }
 0x148   : > { %v1002_v1 = vadd.f32 %v1001_v27, %v889_v49 }
 0x149   : > { %v891_v37 = vpop.f32.mrf.mxu1  ;;  %v1114_v34 = vpop.f32.mrf.mxu3 }
 0x14a   : > { %v1115_v24 = vadd.f32 %v1114_v34, %v1002_v1  ;;  %1274 = vmatmul.f32.gmra.mxu0 %v3193_v61  ;;  %v892_v49 = vadd.f32 %v891_v37, %v2813_v39  ;;  %v3214_v1 = vsel %vm321_vm0, %v397_v36, %v398_v14  ;;  %v510_v37 = vrot.slane %v3200_v19, 2 }
 0x14b   : > { %v511_v36 = vrot.slane %v3204_v4, 2 }
 0x14c   : > { %v3207_v52 = vadd.f32 %v1227_v18, %v1115_v24  ;;  %938 = vmatmul.f32.gmra.mxu1 %v3171_v41  ;;  %1051 = vmatmul.f32.gmra.mxu2 %v3196_v2  ;;  %v3218_v24 = vsel %vm434_vm1, %v506_v63, %v508_v55  ;;  %v3230_v55 = vsel %vm321_vm0, %v398_v14, %v400_v5  ;;  %v513_v5 = vrot.slane %v266_v44, 2 }
 0x14d   : > { %3830 = vst [vmem:[#allocation50_spill] sm:$0xff] %v3218_v24 }
 0x14e   : > { %3829 = vst [vmem:[#allocation49_spill] sm:$0xff] %v3207_v52  ;;  %1164 = vmatmul.f32.gmra.mxu3 %v3200_v19  ;;  %v3239_v19 = vld [vmem:[%s2246_s27 + $0x180] sm:$0xff] }
 0x14f   : > { %v1004_v21 = vpop.f32.mrf.mxu2  ;;  %v1230_v27 = vpop.f32.mrf.mxu0 }
 0x150   : > { %v1005_v34 = vadd.f32 %v1004_v21, %v892_v49 }
 0x151   : > { %v894_v6 = vpop.f32.mrf.mxu1  ;;  %v1117_v30 = vpop.f32.mrf.mxu3 }
 0x152   : > { %v1118_v18 = vadd.f32 %v1117_v30, %v1005_v34  ;;  %1277 = vmatmul.f32.gmra.mxu0 %v3214_v1  ;;  %v895_v49 = vadd.f32 %v894_v6, %v2843_v12  ;;  %v550_v12 = vrot.slane %v3239_v19, 1 }
 0x154   : > { %v3221_v39 = vadd.f32 %v1230_v27, %v1118_v18  ;;  %941 = vmatmul.f32.gmra.mxu1 %v3193_v61  ;;  %1054 = vmatmul.f32.gmra.mxu2 %v3218_v24  ;;  %v3233_v27 = vld [vmem:[%s2246_s27 + $0x188] sm:$0xff] }
 0x155   : > { %v551_v6 = vrot.slane %v3233_v27, 1 }
 0x156   : > { %3831 = vst [vmem:[#allocation51_spill] sm:$0xff] %v3221_v39  ;;  %1167 = vmatmul.f32.gmra.mxu3 %v3204_v4  ;;  %v3236_v39 = vsel %vm434_vm1, %v510_v37, %v511_v36  ;;  %v3254_v4 = vld [vmem:[%s2246_s27 + $0x190] sm:$0x3] }
 0x157   : > { %v1007_v63 = vpop.f32.mrf.mxu2  ;;  %v1233_v30 = vpop.f32.mrf.mxu0 }
 0x158   : > { %v1008_v21 = vadd.f32 %v1007_v63, %v895_v49 }
 0x159   : > { %v897_v34 = vpop.f32.mrf.mxu1  ;;  %v1120_v18 = vpop.f32.mrf.mxu3 }
 0x15a   : > { %v1121_v52 = vadd.f32 %v1120_v18, %v1008_v21  ;;  %1280 = vmatmul.f32.gmra.mxu0 %v3230_v55  ;;  %v898_v37 = vadd.f32 %v897_v34, %v2866_v59  ;;  %v3251_v21 = vsel %vm321_vm0, %v550_v12, %v551_v6  ;;  %v553_v59 = vrot.slane %v3254_v4, 1 }
 0x15c   : > { %v3244_v14 = vadd.f32 %v1233_v30, %v1121_v52  ;;  %944 = vmatmul.f32.gmra.mxu1 %v3214_v1  ;;  %1057 = vmatmul.f32.gmra.mxu2 %v3236_v39  ;;  %v3257_v30 = vsel %vm434_vm1, %v511_v36, %v513_v5  ;;  %v3268_v36 = vsel %vm321_vm0, %v551_v6, %v553_v59 }
 0x15e   : > { %3832 = vst [vmem:[#allocation52_spill] sm:$0xff] %v3244_v14  ;;  %1170 = vmatmul.f32.gmra.mxu3 %v3239_v19 }
 0x15f   : > { %v1010_v49 = vpop.f32.mrf.mxu2  ;;  %v1236_v63 = vpop.f32.mrf.mxu0 }
 0x160   : > { %v1011_v18 = vadd.f32 %v1010_v49, %v898_v37 }
 0x161   : > { %v900_v24 = vpop.f32.mrf.mxu1  ;;  %v1123_v52 = vpop.f32.mrf.mxu3 }
 0x162   : > { %v1124_v14 = vadd.f32 %v1123_v52, %v1011_v18  ;;  %1283 = vmatmul.f32.gmra.mxu0 %v3251_v21  ;;  %v901_v34 = vadd.f32 %v900_v24, %v2896_v50 }
 0x164   : > { %v3261_v44 = vadd.f32 %v1236_v63, %v1124_v14  ;;  %947 = vmatmul.f32.gmra.mxu1 %v3230_v55  ;;  %1060 = vmatmul.f32.gmra.mxu2 %v3257_v30  ;;  %v2108_v63 = vld [vmem:[%s2246_s27 + $0x30] sm:$0xff] }
 0x166   : > { %3833 = vst [vmem:[#allocation53_spill] sm:$0xff] %v3261_v44  ;;  %1173 = vmatmul.f32.gmra.mxu3 %v3233_v27 }
 0x167   : > { %v1013_v12 = vpop.f32.mrf.mxu2  ;;  %v1239_v37 = vpop.f32.mrf.mxu0 }
 0x168   : > { %v1014_v5 = vadd.f32 %v1013_v12, %v901_v34 }
 0x169   : > { %v903_v49 = vpop.f32.mrf.mxu1  ;;  %v1126_v18 = vpop.f32.mrf.mxu3 }
 0x16a   : > { %v1127_v52 = vadd.f32 %v1126_v18, %v1014_v5  ;;  %1286 = vmatmul.f32.gmra.mxu0 %v3268_v36  ;;  %v904_v50 = vadd.f32 %v903_v49, %v2726_v10 }
 0x16c   : > { %v3271_v14 = vadd.f32 %v1239_v37, %v1127_v52  ;;  %1306 = vmatmul.f32.vlgmr.msra.gmra.mxu1 %v2602_v33  ;;  %1419 = vmatmul.f32.vlgmr.msra.gmra.mxu2 %v2108_v63  ;;  %v2109_v33 = vld [vmem:[%s2246_s27 + $0x38] sm:$0xff] }
 0x16e   : > { %1532 = vmatmul.f32.vlgmr.msra.gmra.mxu3 %v2618_v40 }
 0x16f   : > { %v1016_v24 = vpop.f32.mrf.mxu2  ;;  %v1242_v6 = vpop.f32.mrf.mxu0 }
 0x170   : > { %v1017_v59 = vadd.f32 %v1016_v24, %v904_v50 }
 0x171   : > { %v906_v34 = vpop.f32.mrf.mxu1  ;;  %v1129_v12 = vpop.f32.mrf.mxu3 }
 0x172   : > { %v1130_v44 = vadd.f32 %v1129_v12, %v1017_v59  ;;  %1645 = vmatmul.f32.vlgmr.msra.gmra.mxu0 %v2636_v54  ;;  %v907_v37 = vadd.f32 %v906_v34, %v2753_v56 }
 0x174   : > { %v3278_v5 = vadd.f32 %v1242_v6, %v1130_v44  ;;  %1309 = vmatmul.f32.gmra.mxu1 %v2622_v43  ;;  %1422 = vmatmul.f32.gmra.mxu2 %v2109_v33  ;;  %v2110_v43 = vld [vmem:[%s2246_s27 + $0x48] sm:$0xff] }
 0x176   : > { %1535 = vmatmul.f32.gmra.mxu3 %v2633_v53 }
 0x177   : > { %v1019_v40 = vpop.f32.mrf.mxu2  ;;  %v1245_v10 = vpop.f32.mrf.mxu0 }
 0x178   : > { %v1020_v49 = vadd.f32 %v1019_v40, %v907_v37 }
 0x179   : > { %v909_v18 = vpop.f32.mrf.mxu1  ;;  %v1132_v52 = vpop.f32.mrf.mxu3 }
 0x17a   : > { %v1133_v63 = vadd.f32 %v1132_v52, %v1020_v49  ;;  %1648 = vmatmul.f32.gmra.mxu0 %v2658_v3  ;;  %v910_v44 = vadd.f32 %v909_v18, %v2779_v9 }
 0x17c   : > { %v3285_v50 = vadd.f32 %v1245_v10, %v1133_v63  ;;  %1312 = vmatmul.f32.gmra.mxu1 %v2636_v54  ;;  %1425 = vmatmul.f32.gmra.mxu2 %v2110_v43  ;;  %v2111_v54 = vld [vmem:[%s2246_s27 + $0x50] sm:$0xff] }
 0x17e   : > { %1538 = vmatmul.f32.gmra.mxu3 %v2651_v0 }
 0x17f   : > { %v1022_v53 = vpop.f32.mrf.mxu2  ;;  %v1248_v56 = vpop.f32.mrf.mxu0 }
 0x180   : > { %v1023_v24 = vadd.f32 %v1022_v53, %v910_v44 }
 0x181   : > { %v912_v6 = vpop.f32.mrf.mxu1  ;;  %v1135_v59 = vpop.f32.mrf.mxu3 }
 0x182   : > { %v1136_v34 = vadd.f32 %v1135_v59, %v1023_v24  ;;  %1651 = vmatmul.f32.gmra.mxu0 %v2673_v42  ;;  %v913_v33 = vadd.f32 %v912_v6, %v2806_v32 }
 0x184   : > { %v3292_v12 = vadd.f32 %v1248_v56, %v1136_v34  ;;  %1315 = vmatmul.f32.gmra.mxu1 %v2658_v3  ;;  %1428 = vmatmul.f32.gmra.mxu2 %v2111_v54  ;;  %v2112_v3 = vld [vmem:[%s2246_s27 + $0x60] sm:$0xff] }
 0x186   : > { %1541 = vmatmul.f32.gmra.mxu3 %v2670_v26 }
 0x187   : > { %v1025_v0 = vpop.f32.mrf.mxu2  ;;  %v1251_v9 = vpop.f32.mrf.mxu0 }
 0x188   : > { %v1026_v37 = vadd.f32 %v1025_v0, %v913_v33 }
 0x189   : > { %v915_v40 = vpop.f32.mrf.mxu1  ;;  %v1138_v10 = vpop.f32.mrf.mxu3 }
 0x18a   : > { %v1139_v49 = vadd.f32 %v1138_v10, %v1026_v37  ;;  %1654 = vmatmul.f32.gmra.mxu0 %v2695_v20  ;;  %v916_v52 = vadd.f32 %v915_v40, %v2832_v62 }
 0x18c   : > { %v3299_v18 = vadd.f32 %v1251_v9, %v1139_v49  ;;  %1318 = vmatmul.f32.gmra.mxu1 %v2673_v42  ;;  %1431 = vmatmul.f32.gmra.mxu2 %v2112_v3  ;;  %v2113_v42 = vld [vmem:[%s2246_s27 + $0x68] sm:$0xff] }
 0x18e   : > { %1544 = vmatmul.f32.gmra.mxu3 %v2688_v13 }
 0x18f   : > { %v1028_v26 = vpop.f32.mrf.mxu2  ;;  %v1254_v32 = vpop.f32.mrf.mxu0 }
 0x190   : > { %v1029_v63 = vadd.f32 %v1028_v26, %v916_v52 }
 0x191   : > { %v918_v43 = vpop.f32.mrf.mxu1  ;;  %v1141_v44 = vpop.f32.mrf.mxu3 }
 0x192   : > { %v1142_v53 = vadd.f32 %v1141_v44, %v1029_v63  ;;  %1657 = vmatmul.f32.gmra.mxu0 %v2712_v28  ;;  %v919_v24 = vadd.f32 %v918_v43, %v2859_v16  ;;  %v3835_v44 = vld [vmem:[#allocation7_spill] sm:$0xff] }
 0x194   : > { %v3306_v56 = vadd.f32 %v1254_v32, %v1142_v53  ;;  %1321 = vmatmul.f32.gmra.mxu1 %v2695_v20  ;;  %1434 = vmatmul.f32.gmra.mxu2 %v2113_v42  ;;  %v2114_v20 = vld [vmem:[%s2246_s27 + $0x78] sm:$0xff]  ;;  %v3836_v42 = vld [vmem:[#allocation2_spill] sm:$0xff] }
 0x196   : > { %1547 = vmatmul.f32.gmra.mxu3 %v2707_v25 }
 0x197   : > { %v1031_v13 = vpop.f32.mrf.mxu2  ;;  %v1257_v62 = vpop.f32.mrf.mxu0 }
 0x198   : > { %v1032_v6 = vadd.f32 %v1031_v13, %v919_v24 }
 0x199   : > { %v921_v59 = vpop.f32.mrf.mxu1  ;;  %v1144_v34 = vpop.f32.mrf.mxu3 }
 0x19a   : > { %v1145_v54 = vadd.f32 %v1144_v34, %v1032_v6  ;;  %1660 = vmatmul.f32.gmra.mxu0 %v2742_v48  ;;  %v922_v0 = vadd.f32 %v921_v59, %v2885_v29  ;;  %v3834_v29 = vld [vmem:[#allocation3_spill] sm:$0xff] }
 0x19c   : > { %v3313_v33 = vadd.f32 %v1257_v62, %v1145_v54  ;;  %1324 = vmatmul.f32.gmra.mxu1 %v2712_v28  ;;  %1437 = vmatmul.f32.gmra.mxu2 %v2114_v20  ;;  %v2115_v28 = vld [vmem:[%s2246_s27 + $0x80] sm:$0xff] }
 0x19d   : > { %v3838_v20 = vld [vmem:[#allocation10_spill] sm:$0xff] }
 0x19e   : > { %1550 = vmatmul.f32.gmra.mxu3 %v2731_v38 }
 0x19f   : > { %v1034_v25 = vpop.f32.mrf.mxu2  ;;  %v1260_v16 = vpop.f32.mrf.mxu0 }
 0x1a0   : > { %v1035_v9 = vadd.f32 %v1034_v25, %v922_v0  ;;  %v3839_v25 = vld [vmem:[#allocation4_spill] sm:$0xff] }
 0x1a1   : > { %v924_v37 = vpop.f32.mrf.mxu1  ;;  %v1147_v40 = vpop.f32.mrf.mxu3 }
 0x1a2   : > { %v1148_v10 = vadd.f32 %v1147_v40, %v1035_v9  ;;  %1663 = vmatmul.f32.gmra.mxu0 %v2765_v46  ;;  %v925_v3 = vadd.f32 %v924_v37, %v2912_v35  ;;  %v3837_v35 = vld [vmem:[#allocation5_spill] sm:$0xff]  ;;  %v3840_v9 = vld [vmem:[#allocation8_spill] sm:$0xff] }
 0x1a4   : > { %v3320_v49 = vadd.f32 %v1260_v16, %v1148_v10  ;;  %1327 = vmatmul.f32.gmra.mxu1 %v2742_v48  ;;  %1440 = vmatmul.f32.gmra.mxu2 %v2115_v28  ;;  %v2116_v48 = vld [vmem:[%s2246_s27 + $0x90] sm:$0xff] }
 0x1a6   : > { %1553 = vmatmul.f32.gmra.mxu3 %v3834_v29 }
 0x1a7   : > { %v1037_v38 = vpop.f32.mrf.mxu2  ;;  %v1263_v52 = vpop.f32.mrf.mxu0 }
 0x1a8   : > { %v1038_v26 = vadd.f32 %v1037_v38, %v925_v3  ;;  %v3841_v38 = vld [vmem:[#allocation13_spill] sm:$0xff] }
 0x1a9   : > { %v927_v32 = vpop.f32.mrf.mxu1  ;;  %v1150_v63 = vpop.f32.mrf.mxu3 }
 0x1aa   : > { %v1151_v43 = vadd.f32 %v1150_v63, %v1038_v26  ;;  %1666 = vmatmul.f32.gmra.mxu0 %v3835_v44  ;;  %v928_v24 = vadd.f32 %v927_v32, %v3836_v42  ;;  %v2118_v26 = vld [vmem:[%s2246_s27 + $0xa8] sm:$0xff]  ;;  %v3842_v32 = vld [vmem:[#allocation6_spill] sm:$0xff] }
 0x1ac   : > { %v3327_v53 = vadd.f32 %v1263_v52, %v1151_v43  ;;  %1330 = vmatmul.f32.gmra.mxu1 %v2765_v46  ;;  %1443 = vmatmul.f32.gmra.mxu2 %v2116_v48  ;;  %v2117_v46 = vld [vmem:[%s2246_s27 + $0x98] sm:$0xff]  ;;  %v3843_v43 = vld [vmem:[#allocation11_spill] sm:$0xff] }
 0x1ae   : > { %1556 = vmatmul.f32.gmra.mxu3 %v3837_v35 }
 0x1af   : > { %v1040_v13 = vpop.f32.mrf.mxu2  ;;  %v1266_v62 = vpop.f32.mrf.mxu0 }
 0x1b0   : > { %v1041_v6 = vadd.f32 %v1040_v13, %v928_v24 }
 0x1b1   : > { %v930_v59 = vpop.f32.mrf.mxu1  ;;  %v1153_v34 = vpop.f32.mrf.mxu3 }
 0x1b2   : > { %v1154_v54 = vadd.f32 %v1153_v34, %v1041_v6  ;;  %1669 = vmatmul.f32.gmra.mxu0 %v3838_v20  ;;  %v931_v16 = vadd.f32 %v930_v59, %v3839_v25  ;;  %v2119_v59 = vld [vmem:[%s2246_s27 + $0xb0] sm:$0xff]  ;;  %v3845_v34 = vld [vmem:[#allocation9_spill] sm:$0xff] }
 0x1b4   : > { %v3334_v0 = vadd.f32 %v1266_v62, %v1154_v54  ;;  %1333 = vmatmul.f32.gmra.mxu1 %v3835_v44  ;;  %1446 = vmatmul.f32.gmra.mxu2 %v2117_v46  ;;  %v3844_v62 = vld [vmem:[#allocation16_spill] sm:$0xff] }
 0x1b6   : > { %1559 = vmatmul.f32.gmra.mxu3 %v3840_v9 }
 0x1b7   : > { %v1043_v37 = vpop.f32.mrf.mxu2  ;;  %v1269_v40 = vpop.f32.mrf.mxu0 }
 0x1b8   : > { %v1044_v10 = vadd.f32 %v1043_v37, %v931_v16 }
 0x1b9   : > { %v933_v28 = vpop.f32.mrf.mxu1  ;;  %v1156_v3 = vpop.f32.mrf.mxu3 }
 0x1ba   : > { %v1157_v29 = vadd.f32 %v1156_v3, %v1044_v10  ;;  %1672 = vmatmul.f32.gmra.mxu0 %v3841_v38  ;;  %v934_v63 = vadd.f32 %v933_v28, %v3842_v32  ;;  %v3847_v10 = vld [vmem:[#allocation19_spill] sm:$0xff]  ;;  %v2120_v3 = vld [vmem:[%s2246_s27 + $0xc0] sm:$0xff] }
 0x1bc   : > { %v3341_v52 = vadd.f32 %v1269_v40, %v1157_v29  ;;  %1336 = vmatmul.f32.gmra.mxu1 %v3838_v20  ;;  %1449 = vmatmul.f32.gmra.mxu2 %v2118_v26  ;;  %v3846_v20 = vld [vmem:[#allocation14_spill] sm:$0xff]  ;;  %v3848_v29 = vld [vmem:[#allocation12_spill] sm:$0xff]  ;;  %v3849_v26 = vld [vmem:[#allocation17_spill] sm:$0xff] }
 0x1be   : > { %1562 = vmatmul.f32.gmra.mxu3 %v3843_v43 }
 0x1bf   : > { %v1046_v44 = vpop.f32.mrf.mxu2  ;;  %v1272_v48 = vpop.f32.mrf.mxu0 }
 0x1c0   : > { %v1047_v42 = vadd.f32 %v1046_v44, %v934_v63 }
 0x1c1   : > { %v936_v24 = vpop.f32.mrf.mxu1  ;;  %v1159_v35 = vpop.f32.mrf.mxu3 }
 0x1c2   : > { %v1160_v13 = vadd.f32 %v1159_v35, %v1047_v42  ;;  %1675 = vmatmul.f32.gmra.mxu0 %v3844_v62  ;;  %v937_v54 = vadd.f32 %v936_v24, %v3845_v34  ;;  %v3850_v24 = vld [vmem:[#allocation21_spill] sm:$0xff] }
 0x1c4   : > { %v3348_v6 = vadd.f32 %v1272_v48, %v1160_v13  ;;  %1339 = vmatmul.f32.gmra.mxu1 %v3841_v38  ;;  %1452 = vmatmul.f32.gmra.mxu2 %v2119_v59  ;;  %v2121_v13 = vld [vmem:[%s2246_s27 + $0xc8] sm:$0xff] }
 0x1c6   : > { %1565 = vmatmul.f32.gmra.mxu3 %v3846_v20 }
 0x1c7   : > { %v1049_v46 = vpop.f32.mrf.mxu2  ;;  %v1275_v25 = vpop.f32.mrf.mxu0 }
 0x1c8   : > { %v1050_v16 = vadd.f32 %v1049_v46, %v937_v54 }
 0x1c9   : > { %v939_v9 = vpop.f32.mrf.mxu1  ;;  %v1162_v37 = vpop.f32.mrf.mxu3 }
 0x1ca   : > { %v1163_v40 = vadd.f32 %v1162_v37, %v1050_v16  ;;  %1678 = vmatmul.f32.gmra.mxu0 %v3847_v10  ;;  %v940_v38 = vadd.f32 %v939_v9, %v3848_v29  ;;  %v2122_v37 = vld [vmem:[%s2246_s27 + $0xd8] sm:$0xff] }
 0x1cc   : > { %v3355_v28 = vadd.f32 %v1275_v25, %v1163_v40  ;;  %1342 = vmatmul.f32.gmra.mxu1 %v3844_v62  ;;  %1455 = vmatmul.f32.gmra.mxu2 %v2120_v3  ;;  %v3851_v62 = vld [vmem:[#allocation15_spill] sm:$0xff]  ;;  %v3852_v40 = vld [vmem:[#allocation18_spill] sm:$0xff] }
 0x1ce   : > { %1568 = vmatmul.f32.gmra.mxu3 %v3849_v26 }
 0x1cf   : > { %v1052_v32 = vpop.f32.mrf.mxu2  ;;  %v1278_v63 = vpop.f32.mrf.mxu0 }
 0x1d0   : > { %v1053_v43 = vadd.f32 %v1052_v32, %v940_v38 }
 0x1d1   : > { %v942_v44 = vpop.f32.mrf.mxu1  ;;  %v1165_v48 = vpop.f32.mrf.mxu3 }
 0x1d2   : > { %v1166_v42 = vadd.f32 %v1165_v48, %v1053_v43  ;;  %1681 = vmatmul.f32.gmra.mxu0 %v3850_v24  ;;  %v943_v59 = vadd.f32 %v942_v44, %v3851_v62  ;;  %v2123_v43 = vld [vmem:[%s2246_s27 + $0xe0] sm:$0xff]  ;;  %v3853_v44 = vld [vmem:[#allocation20_spill] sm:$0xff] }
 0x1d4   : > { %v3362_v35 = vadd.f32 %v1278_v63, %v1166_v42  ;;  %1345 = vmatmul.f32.gmra.mxu1 %v3847_v10  ;;  %1458 = vmatmul.f32.gmra.mxu2 %v2121_v13 }
 0x1d6   : > { %1571 = vmatmul.f32.gmra.mxu3 %v2917_v8 }
 0x1d7   : > { %v1055_v34 = vpop.f32.mrf.mxu2  ;;  %v1281_v54 = vpop.f32.mrf.mxu0 }
 0x1d8   : > { %v1056_v20 = vadd.f32 %v1055_v34, %v943_v59 }
 0x1d9   : > { %v945_v46 = vpop.f32.mrf.mxu1  ;;  %v1168_v25 = vpop.f32.mrf.mxu3 }
 0x1da   : > { %v1169_v16 = vadd.f32 %v1168_v25, %v1056_v20  ;;  %1684 = vmatmul.f32.gmra.mxu0 %v2945_v23  ;;  %v946_v10 = vadd.f32 %v945_v46, %v3852_v40 }
 0x1dc   : > { %v3369_v9 = vadd.f32 %v1281_v54, %v1169_v16  ;;  %1348 = vmatmul.f32.gmra.mxu1 %v3850_v24  ;;  %1461 = vmatmul.f32.gmra.mxu2 %v2122_v37  ;;  %v3854_v54 = vld [vmem:[#allocation22_spill] sm:$0xff] }
 0x1de   : > { %1574 = vmatmul.f32.gmra.mxu3 %v2938_v7 }
 0x1df   : > { %v1058_v8 = vpop.f32.mrf.mxu2  ;;  %v1284_v3 = vpop.f32.mrf.mxu0 }
 0x1e0   : > { %v1059_v29 = vadd.f32 %v1058_v8, %v946_v10  ;;  %v3855_v10 = vld [vmem:[#allocation23_spill] sm:$0xff] }
 0x1e1   : > { %v948_v38 = vpop.f32.mrf.mxu1  ;;  %v1171_v26 = vpop.f32.mrf.mxu3 }
 0x1e2   : > { %v1172_v32 = vadd.f32 %v1171_v26, %v1059_v29  ;;  %1687 = vmatmul.f32.gmra.mxu0 %v2963_v47  ;;  %v949_v48 = vadd.f32 %v948_v38, %v3853_v44 }
 0x1e4   : > { %v3376_v63 = vadd.f32 %v1284_v3, %v1172_v32  ;;  %1351 = vmatmul.f32.gmra.mxu1 %v2945_v23  ;;  %1464 = vmatmul.f32.gmra.mxu2 %v2123_v43  ;;  %v2124_v23 = vld [vmem:[%s2246_s27 + $0xf0] sm:$0xff] }
 0x1e6   : > { %1577 = vmatmul.f32.gmra.mxu3 %v2960_v45 }
 0x1e7   : > { %v1061_v7 = vpop.f32.mrf.mxu2  ;;  %v1287_v42 = vpop.f32.mrf.mxu0 }
 0x1e8   : > { %v1062_v24 = vadd.f32 %v1061_v7, %v949_v48  ;;  %v3856_v48 = vld [vmem:[#allocation24_spill] sm:$0xff] }
 0x1e9   : > { %v1174_v13 = vpop.f32.mrf.mxu3  ;;  %v1307_v62 = vpop.f32.mrf.mxu1 }
 0x1ea   : > { %v1175_v59 = vadd.f32 %v1174_v13, %v1062_v24  ;;  %1690 = vmatmul.f32.gmra.mxu0 %v2988_v60  ;;  %v1308_v20 = vadd.f32 %v1307_v62, %v3854_v54  ;;  %v3858_v54 = vld [vmem:[#allocation28_spill] sm:$0xff] }
 0x1ec   : > { %v3383_v34 = vadd.f32 %v1287_v42, %v1175_v59  ;;  %1354 = vmatmul.f32.gmra.mxu1 %v2963_v47  ;;  %1467 = vmatmul.f32.gmra.mxu2 %v2124_v23 }
 0x1ee   : > { %1580 = vmatmul.f32.gmra.mxu3 %v2981_v58  ;;  %v2125_v58 = vld [vmem:[%s2246_s27 + $0xf8] sm:$0xff] }
 0x1ef   : > { %v1420_v45 = vpop.f32.mrf.mxu2  ;;  %v1646_v46 = vpop.f32.mrf.mxu0 }
 0x1f0   : > { %v1421_v25 = vadd.f32 %v1420_v45, %v1308_v20  ;;  %v3859_v45 = vld [vmem:[#allocation25_spill] sm:$0xff] }
 0x1f1   : > { %v1310_v16 = vpop.f32.mrf.mxu1  ;;  %v1533_v37 = vpop.f32.mrf.mxu3 }
 0x1f2   : > { %v1534_v40 = vadd.f32 %v1533_v37, %v1421_v25  ;;  %1693 = vmatmul.f32.gmra.mxu0 %v3006_v15  ;;  %v1311_v8 = vadd.f32 %v1310_v16, %v3855_v10 }
 0x1f4   : > { %v3396_v47 = vadd.f32 %v1646_v46, %v1534_v40  ;;  %1357 = vmatmul.f32.gmra.mxu1 %v2988_v60  ;;  %1470 = vmatmul.f32.gmra.mxu2 %v2125_v58  ;;  %v2126_v60 = vld [vmem:[%s2246_s27 + $0x108] sm:$0xff] }
 0x1f6   : > { %1742 = vst [vmem:[%s3394_s10] sm:$0xff] %v3396_v47  ;;  %1583 = vmatmul.f32.gmra.mxu3 %v3003_v17  ;;  %v3857_v17 = vld [vmem:[#allocation26_spill] sm:$0xff] }
 0x1f7   : > { %v1423_v3 = vpop.f32.mrf.mxu2  ;;  %v1649_v29 = vpop.f32.mrf.mxu0 }
 0x1f8   : > { %v1424_v38 = vadd.f32 %v1423_v3, %v1311_v8  ;;  %v3861_v3 = vld [vmem:[#allocation27_spill] sm:$0xff] }
 0x1f9   : > { %v1313_v26 = vpop.f32.mrf.mxu1  ;;  %v1536_v32 = vpop.f32.mrf.mxu3 }
 0x1fa   : > { %v1537_v43 = vadd.f32 %v1536_v32, %v1424_v38  ;;  %1696 = vmatmul.f32.gmra.mxu0 %v3031_v11  ;;  %v1314_v7 = vadd.f32 %v1313_v26, %v3856_v48 }
 0x1fc   : > { %v3405_v44 = vadd.f32 %v1649_v29, %v1537_v43  ;;  %1360 = vmatmul.f32.gmra.mxu1 %v3006_v15  ;;  %1473 = vmatmul.f32.gmra.mxu2 %v2126_v60  ;;  %v2127_v15 = vld [vmem:[%s2246_s27 + $0x110] sm:$0xff] }
 0x1fe   : > { %1743 = vst [vmem:[%s3394_s10 + $0x8] sm:$0xff] %v3405_v44  ;;  %1586 = vmatmul.f32.gmra.mxu3 %v3857_v17 }
 0x1ff   : > { %v1426_v42 = vpop.f32.mrf.mxu2  ;;  %v1652_v24 = vpop.f32.mrf.mxu0 }
 0x200   : > { %v1427_v13 = vadd.f32 %v1426_v42, %v1314_v7  ;;  %v3863_v7 = vld [vmem:[#allocation34_spill] sm:$0xff] }
 0x201   : > { %v1316_v62 = vpop.f32.mrf.mxu1  ;;  %v1539_v59 = vpop.f32.mrf.mxu3  ;;  %v3864_v42 = vld [vmem:[#allocation30_spill] sm:$0xff] }
 0x202   : > { %v1540_v23 = vadd.f32 %v1539_v59, %v1427_v13  ;;  %1699 = vmatmul.f32.gmra.mxu0 %v3858_v54  ;;  %v1317_v46 = vadd.f32 %v1316_v62, %v3859_v45 }
 0x204   : > { %v3414_v20 = vadd.f32 %v1652_v24, %v1540_v23  ;;  %1363 = vmatmul.f32.gmra.mxu1 %v3031_v11  ;;  %1476 = vmatmul.f32.gmra.mxu2 %v2127_v15  ;;  %v3860_v11 = vld [vmem:[#allocation29_spill] sm:$0xff]  ;;  %v3865_v24 = vld [vmem:[#allocation31_spill] sm:$0xff] }
 0x206   : > { %1744 = vst [vmem:[%s3394_s10 + $0x10] sm:$0xff] %v3414_v20  ;;  %1589 = vmatmul.f32.gmra.mxu3 %v3046_v22  ;;  %v3862_v22 = vld [vmem:[#allocation32_spill] sm:$0xff] }
 0x207   : > { %v1429_v25 = vpop.f32.mrf.mxu2  ;;  %v1655_v16 = vpop.f32.mrf.mxu0 }
 0x208   : > { %v1430_v37 = vadd.f32 %v1429_v25, %v1317_v46  ;;  %v3867_v25 = vld [vmem:[#allocation33_spill] sm:$0xff] }
 0x209   : > { %v1319_v40 = vpop.f32.mrf.mxu1  ;;  %v1542_v58 = vpop.f32.mrf.mxu3 }
 0x20a   : > { %v1543_v10 = vadd.f32 %v1542_v58, %v1430_v37  ;;  %1702 = vmatmul.f32.gmra.mxu0 %v3080_v51  ;;  %v1320_v29 = vadd.f32 %v1319_v40, %v3861_v3 }
 0x20c   : > { %v3423_v8 = vadd.f32 %v1655_v16, %v1543_v10  ;;  %1366 = vmatmul.f32.gmra.mxu1 %v3858_v54  ;;  %1479 = vmatmul.f32.gmra.mxu2 %v3860_v11 }
 0x20e   : > { %1745 = vst [vmem:[%s3394_s10 + $0x18] sm:$0xff] %v3423_v8  ;;  %1592 = vmatmul.f32.gmra.mxu3 %v3862_v22 }
 0x20f   : > { %v1432_v38 = vpop.f32.mrf.mxu2  ;;  %v1658_v26 = vpop.f32.mrf.mxu0 }
 0x210   : > { %v1433_v32 = vadd.f32 %v1432_v38, %v1320_v29  ;;  %v3869_v29 = vld [vmem:[#allocation41_spill] sm:$0xff]  ;;  %v3870_v38 = vld [vmem:[#allocation36_spill] sm:$0xff] }
 0x211   : > { %v1322_v43 = vpop.f32.mrf.mxu1  ;;  %v1545_v60 = vpop.f32.mrf.mxu3 }
 0x212   : > { %v1546_v48 = vadd.f32 %v1545_v60, %v1433_v32  ;;  %1705 = vmatmul.f32.gmra.mxu0 %v3863_v7  ;;  %v1323_v13 = vadd.f32 %v1322_v43, %v3865_v24  ;;  %v3872_v43 = vld [vmem:[#allocation40_spill] sm:$0xff] }
 0x214   : > { %v3432_v17 = vadd.f32 %v1658_v26, %v1546_v48  ;;  %1369 = vmatmul.f32.gmra.mxu1 %v3080_v51  ;;  %1482 = vmatmul.f32.gmra.mxu2 %v3864_v42  ;;  %v3866_v51 = vld [vmem:[#allocation35_spill] sm:$0xff]  ;;  %v3871_v26 = vld [vmem:[#allocation37_spill] sm:$0xff] }
 0x216   : > { %1746 = vst [vmem:[%s3394_s10 + $0x20] sm:$0xff] %v3432_v17  ;;  %1595 = vmatmul.f32.gmra.mxu3 %v3095_v31  ;;  %v3868_v31 = vld [vmem:[#allocation38_spill] sm:$0xff] }
 0x217   : > { %v1435_v62 = vpop.f32.mrf.mxu2  ;;  %v1661_v59 = vpop.f32.mrf.mxu0 }
 0x218   : > { %v1436_v23 = vadd.f32 %v1435_v62, %v1323_v13  ;;  %v3873_v62 = vld [vmem:[#allocation45_spill] sm:$0xff] }
 0x219   : > { %v1325_v54 = vpop.f32.mrf.mxu1  ;;  %v1548_v15 = vpop.f32.mrf.mxu3 }
 0x21a   : > { %v1549_v45 = vadd.f32 %v1548_v15, %v1436_v23  ;;  %1708 = vmatmul.f32.gmra.mxu0 %v3129_v57  ;;  %v1326_v16 = vadd.f32 %v1325_v54, %v3867_v25  ;;  %v3875_v23 = vld [vmem:[#allocation39_spill] sm:$0xff] }
 0x21c   : > { %v3441_v46 = vadd.f32 %v1661_v59, %v1549_v45  ;;  %1372 = vmatmul.f32.gmra.mxu1 %v3863_v7  ;;  %1485 = vmatmul.f32.gmra.mxu2 %v3866_v51 }
 0x21e   : > { %1747 = vst [vmem:[%s3394_s10 + $0x28] sm:$0xff] %v3441_v46  ;;  %1598 = vmatmul.f32.gmra.mxu3 %v3868_v31 }
 0x21f   : > { %v1438_v37 = vpop.f32.mrf.mxu2  ;;  %v1664_v40 = vpop.f32.mrf.mxu0 }
 0x220   : > { %v1439_v58 = vadd.f32 %v1438_v37, %v1326_v16 }
 0x221   : > { %v1328_v10 = vpop.f32.mrf.mxu1  ;;  %v1551_v11 = vpop.f32.mrf.mxu3 }
 0x222   : > { %v1552_v3 = vadd.f32 %v1551_v11, %v1439_v58  ;;  %1711 = vmatmul.f32.gmra.mxu0 %v3869_v29  ;;  %v1329_v32 = vadd.f32 %v1328_v10, %v3871_v26  ;;  %v3877_v58 = vld [vmem:[#allocation44_spill] sm:$0xff] }
 0x224   : > { %v3450_v22 = vadd.f32 %v1664_v40, %v1552_v3  ;;  %1375 = vmatmul.f32.gmra.mxu1 %v3129_v57  ;;  %1488 = vmatmul.f32.gmra.mxu2 %v3870_v38  ;;  %v3874_v57 = vld [vmem:[#allocation42_spill] sm:$0xff]  ;;  %v3876_v40 = vld [vmem:[#allocation43_spill] sm:$0xff] }
 0x226   : > { %1748 = vst [vmem:[%s3394_s10 + $0x30] sm:$0xff] %v3450_v22  ;;  %1601 = vmatmul.f32.gmra.mxu3 %v3872_v43 }
 0x227   : > { %v1441_v60 = vpop.f32.mrf.mxu2  ;;  %v1667_v48 = vpop.f32.mrf.mxu0 }
 0x228   : > { %v1442_v7 = vadd.f32 %v1441_v60, %v1329_v32  ;;  %v3878_v32 = vld [vmem:[#allocation50_spill] sm:$0xff]  ;;  %v3879_v60 = vld [vmem:[#allocation47_spill] sm:$0xff] }
 0x229   : > { %v1331_v42 = vpop.f32.mrf.mxu1  ;;  %v1554_v24 = vpop.f32.mrf.mxu3 }
 0x22a   : > { %v1555_v13 = vadd.f32 %v1554_v24, %v1442_v7  ;;  %1714 = vmatmul.f32.gmra.mxu0 %v3873_v62  ;;  %v1332_v54 = vadd.f32 %v1331_v42, %v3875_v23 }
 0x22c   : > { %v3459_v59 = vadd.f32 %v1667_v48, %v1555_v13  ;;  %1378 = vmatmul.f32.gmra.mxu1 %v3869_v29  ;;  %1491 = vmatmul.f32.gmra.mxu2 %v3874_v57  ;;  %v3880_v48 = vld [vmem:[#allocation46_spill] sm:$0xff] }
 0x22e   : > { %1749 = vst [vmem:[%s3394_s10 + $0x38] sm:$0xff] %v3459_v59  ;;  %1604 = vmatmul.f32.gmra.mxu3 %v3171_v41 }
 0x22f   : > { %v1444_v15 = vpop.f32.mrf.mxu2  ;;  %v1670_v45 = vpop.f32.mrf.mxu0 }
 0x230   : > { %v1445_v51 = vadd.f32 %v1444_v15, %v1332_v54  ;;  %v3882_v54 = vld [vmem:[#allocation49_spill] sm:$0xff] }
 0x231   : > { %v1334_v25 = vpop.f32.mrf.mxu1  ;;  %v1557_v16 = vpop.f32.mrf.mxu3 }
 0x232   : > { %v1558_v31 = vadd.f32 %v1557_v16, %v1445_v51  ;;  %1717 = vmatmul.f32.gmra.mxu0 %v3196_v2  ;;  %v1335_v10 = vadd.f32 %v1334_v25, %v3877_v58  ;;  %v558_v58 = vrot.slane %v3233_v27, 2 }
 0x234   : > { %v3468_v37 = vadd.f32 %v1670_v45, %v1558_v31  ;;  %1381 = vmatmul.f32.gmra.mxu1 %v3873_v62  ;;  %1494 = vmatmul.f32.gmra.mxu2 %v3876_v40  ;;  %v557_v40 = vrot.slane %v3239_v19, 2 }
 0x236   : > { %1750 = vst [vmem:[%s3394_s10 + $0x40] sm:$0xff] %v3468_v37  ;;  %1607 = vmatmul.f32.gmra.mxu3 %v3193_v61 }
 0x237   : > { %v1447_v41 = vpop.f32.mrf.mxu2  ;;  %v1673_v11 = vpop.f32.mrf.mxu0 }
 0x238   : > { %v1448_v3 = vadd.f32 %v1447_v41, %v1335_v10  ;;  %v3883_v41 = vld [vmem:[#allocation51_spill] sm:$0xff] }
 0x239   : > { %v1337_v29 = vpop.f32.mrf.mxu1  ;;  %v1560_v38 = vpop.f32.mrf.mxu3 }
 0x23a   : > { %v1561_v26 = vadd.f32 %v1560_v38, %v1448_v3  ;;  %1720 = vmatmul.f32.gmra.mxu0 %v3878_v32  ;;  %v1338_v7 = vadd.f32 %v1337_v29, %v3880_v48  ;;  %v559_v29 = vsel %vm434_vm1, %v557_v40, %v558_v58  ;;  %v270_v48 = vld [vmem:[%s2246_s27 + $0x198] sm:$0xff] }
 0x23c   : > { %v3477_v43 = vadd.f32 %v1673_v11, %v1561_v26  ;;  %1384 = vmatmul.f32.gmra.mxu1 %v3196_v2  ;;  %1497 = vmatmul.f32.gmra.mxu2 %v3879_v60  ;;  %v3881_v2 = vld [vmem:[#allocation48_spill] sm:$0xff] }
 0x23e   : > { %1751 = vst [vmem:[%s3394_s10 + $0x48] sm:$0xff] %v3477_v43  ;;  %1610 = vmatmul.f32.gmra.mxu3 %v3214_v1 }
 0x23f   : > { %v1450_v61 = vpop.f32.mrf.mxu2  ;;  %v1676_v42 = vpop.f32.mrf.mxu0 }
 0x240   : > { %v1451_v24 = vadd.f32 %v1450_v61, %v1338_v7  ;;  %v3884_v7 = vld [vmem:[#allocation52_spill] sm:$0xff] }
 0x241   : > { %v1340_v13 = vpop.f32.mrf.mxu1  ;;  %v1563_v62 = vpop.f32.mrf.mxu3 }
 0x242   : > { %v1564_v57 = vadd.f32 %v1563_v62, %v1451_v24  ;;  %1723 = vmatmul.f32.gmra.mxu0 %v3236_v39  ;;  %v1341_v15 = vadd.f32 %v1340_v13, %v3882_v54  ;;  %v567_v13 = vrot.slane %v270_v48, 1  ;;  %v574_v54 = vrot.slane %v270_v48, 2 }
 0x244   : > { %v3486_v23 = vadd.f32 %v1676_v42, %v1564_v57  ;;  %1387 = vmatmul.f32.gmra.mxu1 %v3878_v32  ;;  %1500 = vmatmul.f32.gmra.mxu2 %v3881_v2 }
 0x246   : > { %1752 = vst [vmem:[%s3394_s10 + $0x50] sm:$0xff] %v3486_v23  ;;  %1613 = vmatmul.f32.gmra.mxu3 %v3230_v55 }
 0x247   : > { %v1453_v1 = vpop.f32.mrf.mxu2  ;;  %v1679_v45 = vpop.f32.mrf.mxu0 }
 0x248   : > { %v1454_v51 = vadd.f32 %v1453_v1, %v1341_v15 }
 0x249   : > { %v1343_v25 = vpop.f32.mrf.mxu1  ;;  %v1566_v16 = vpop.f32.mrf.mxu3 }
 0x24a   : > { %v1567_v31 = vadd.f32 %v1566_v16, %v1454_v51  ;;  %1726 = vmatmul.f32.gmra.mxu0 %v3257_v30  ;;  %v1344_v55 = vadd.f32 %v1343_v25, %v3883_v41  ;;  %v3885_v51 = vld [vmem:[#allocation53_spill] sm:$0xff] }
 0x24c   : > { %v3497_v10 = vadd.f32 %v1679_v45, %v1567_v31  ;;  %1390 = vmatmul.f32.gmra.mxu1 %v3236_v39  ;;  %1503 = vmatmul.f32.gmra.mxu2 %v3239_v19  ;;  %v560_v19 = vrot.slane %v3254_v4, 2 }
 0x24e   : > { %1753 = vst [vmem:[%s3394_s10 + $0x58] sm:$0xff] %v3497_v10  ;;  %1616 = vmatmul.f32.gmra.mxu3 %v3251_v21  ;;  %v271_v21 = vld [vmem:[%s2246_s27 + $0x1a0] sm:$0xff]  ;;  %v561_v62 = vsel %vm434_vm1, %v558_v58, %v560_v19 }
 0x24f   : > { %v1456_v11 = vpop.f32.mrf.mxu2  ;;  %v1682_v3 = vpop.f32.mrf.mxu0  ;;  %v568_v4 = vrot.slane %v271_v21, 1  ;;  %v575_v1 = vrot.slane %v271_v21, 2 }
 0x250   : > { %v1457_v38 = vadd.f32 %v1456_v11, %v1344_v55 }
 0x251   : > { %v1346_v26 = vpop.f32.mrf.mxu1  ;;  %v1569_v32 = vpop.f32.mrf.mxu3  ;;  %v569_v15 = vsel %vm321_vm0, %v567_v13, %v568_v4  ;;  %v576_v58 = vsel %vm434_vm1, %v574_v54, %v575_v1 }
 0x252   : > { %v1570_v60 = vadd.f32 %v1569_v32, %v1457_v38  ;;  %1729 = vmatmul.f32.gmra.mxu0 %v559_v29  ;;  %v1347_v61 = vadd.f32 %v1346_v26, %v3884_v7 }
 0x254   : > { %v3507_v39 = vadd.f32 %v1682_v3, %v1570_v60  ;;  %1393 = vmatmul.f32.gmra.mxu1 %v3257_v30  ;;  %1506 = vmatmul.f32.gmra.mxu2 %v3233_v27 }
 0x256   : > { %1754 = vst [vmem:[%s3394_s10 + $0x60] sm:$0xff] %v3507_v39  ;;  %1619 = vmatmul.f32.gmra.mxu3 %v3268_v36  ;;  %v272_v36 = vld [vmem:[%s2246_s27 + $0x1a8] sm:$0x3] }
 0x257   : > { %v1459_v42 = vpop.f32.mrf.mxu2  ;;  %v1685_v24 = vpop.f32.mrf.mxu0  ;;  %v570_v40 = vrot.slane %v272_v36, 1  ;;  %v577_v38 = vrot.slane %v272_v36, 2 }
 0x258   : > { %v1460_v57 = vadd.f32 %v1459_v42, %v1347_v61 }
 0x259   : > { %v1349_v30 = vpop.f32.mrf.mxu1  ;;  %v1572_v2 = vpop.f32.mrf.mxu3 }
 0x25a   : > { %v1573_v27 = vadd.f32 %v1572_v2, %v1460_v57  ;;  %1732 = vmatmul.f32.gmra.mxu0 %v561_v62  ;;  %v1350_v25 = vadd.f32 %v1349_v30, %v3885_v51 }
 0x25c   : > { %v3519_v45 = vadd.f32 %v1685_v24, %v1573_v27  ;;  %1396 = vmatmul.f32.gmra.mxu1 %v559_v29  ;;  %1509 = vmatmul.f32.gmra.mxu2 %v270_v48  ;;  %v571_v29 = vsel %vm321_vm0, %v568_v4, %v570_v40  ;;  %v578_v48 = vsel %vm434_vm1, %v575_v1, %v577_v38 }
 0x25e   : > { %1755 = vst [vmem:[%s3394_s10 + $0x68] sm:$0xff] %v3519_v45  ;;  %1622 = vmatmul.f32.gmra.mxu3 %v569_v15 }
 0x25f   : > { %v1462_v16 = vpop.f32.mrf.mxu2  ;;  %v1688_v31 = vpop.f32.mrf.mxu0 }
 0x260   : > { %v1463_v41 = vadd.f32 %v1462_v16, %v1350_v25 }
 0x261   : > { %v1352_v55 = vpop.f32.mrf.mxu1  ;;  %v1575_v11 = vpop.f32.mrf.mxu3 }
 0x262   : > { %v1576_v3 = vadd.f32 %v1575_v11, %v1463_v41  ;;  %1735 = vmatmul.f32.gmra.mxu0 %v576_v58  ;;  %v1353_v32 = vadd.f32 %v1352_v55, %v3271_v14 }
 0x264   : > { %v3527_v26 = vadd.f32 %v1688_v31, %v1576_v3  ;;  %1399 = vmatmul.f32.gmra.mxu1 %v561_v62  ;;  %1512 = vmatmul.f32.gmra.mxu2 %v271_v21 }
 0x266   : > { %1756 = vst [vmem:[%s3394_s10 + $0x70] sm:$0xff] %v3527_v26  ;;  %1625 = vmatmul.f32.gmra.mxu3 %v571_v29 }
 0x267   : > { %v1465_v60 = vpop.f32.mrf.mxu2  ;;  %v1691_v19 = vpop.f32.mrf.mxu0 }
 0x268   : > { %v1466_v7 = vadd.f32 %v1465_v60, %v1353_v32 }
 0x269   : > { %v1355_v61 = vpop.f32.mrf.mxu1  ;;  %v1578_v42 = vpop.f32.mrf.mxu3 }
 0x26a   : > { %v1579_v24 = vadd.f32 %v1578_v42, %v1466_v7  ;;  %1738 = vmatmul.f32.gmra.mxu0 %v578_v48  ;;  %v1356_v4 = vadd.f32 %v1355_v61, %v3278_v5 }
 0x26c   : > { %v3533_v13 = vadd.f32 %v1691_v19, %v1579_v24 }
 0x26e   : > { %1757 = vst [vmem:[%s3394_s10 + $0x78] sm:$0xff] %v3533_v13 }
 0x26f   : > { %v1468_v14 = vpop.f32.mrf.mxu2  ;;  %v1694_v21 = vpop.f32.mrf.mxu0 }
 0x270   : > { %v1469_v62 = vadd.f32 %v1468_v14, %v1356_v4 }
 0x271   : > { %v1358_v57 = vpop.f32.mrf.mxu1  ;;  %v1581_v30 = vpop.f32.mrf.mxu3 }
 0x272   : > { %v1582_v2 = vadd.f32 %v1581_v30, %v1469_v62  ;;  %v1359_v54 = vadd.f32 %v1358_v57, %v3285_v50 }
 0x274   : > { %v3538_v27 = vadd.f32 %v1694_v21, %v1582_v2 }
 0x276   : > { %1758 = vst [vmem:[%s3394_s10 + $0x80] sm:$0xff] %v3538_v27 }
 0x277   : > { %v1471_v15 = vpop.f32.mrf.mxu2  ;;  %v1697_v1 = vpop.f32.mrf.mxu0 }
 0x278   : > { %v1472_v36 = vadd.f32 %v1471_v15, %v1359_v54 }
 0x279   : > { %v1361_v5 = vpop.f32.mrf.mxu1  ;;  %v1584_v51 = vpop.f32.mrf.mxu3 }
 0x27a   : > { %v1585_v25 = vadd.f32 %v1584_v51, %v1472_v36  ;;  %v1362_v31 = vadd.f32 %v1361_v5, %v3292_v12 }
 0x27c   : > { %v3543_v16 = vadd.f32 %v1697_v1, %v1585_v25 }
 0x27e   : > { %1759 = vst [vmem:[%s3394_s10 + $0x88] sm:$0xff] %v3543_v16 }
 0x27f   : > { %v1474_v40 = vpop.f32.mrf.mxu2  ;;  %v1700_v58 = vpop.f32.mrf.mxu0 }
 0x280   : > { %v1475_v41 = vadd.f32 %v1474_v40, %v1362_v31 }
 0x281   : > { %v1364_v50 = vpop.f32.mrf.mxu1  ;;  %v1587_v55 = vpop.f32.mrf.mxu3 }
 0x282   : > { %v1588_v11 = vadd.f32 %v1587_v55, %v1475_v41  ;;  %v1365_v29 = vadd.f32 %v1364_v50, %v3299_v18 }
 0x284   : > { %v3548_v3 = vadd.f32 %v1700_v58, %v1588_v11 }
 0x286   : > { %1760 = vst [vmem:[%s3394_s10 + $0x90] sm:$0xff] %v3548_v3 }
 0x287   : > { %v1477_v38 = vpop.f32.mrf.mxu2  ;;  %v1703_v32 = vpop.f32.mrf.mxu0 }
 0x288   : > { %v1478_v60 = vadd.f32 %v1477_v38, %v1365_v29 }
 0x289   : > { %v1367_v12 = vpop.f32.mrf.mxu1  ;;  %v1590_v19 = vpop.f32.mrf.mxu3 }
 0x28a   : > { %v1591_v48 = vadd.f32 %v1590_v19, %v1478_v60  ;;  %v1368_v61 = vadd.f32 %v1367_v12, %v3306_v56 }
 0x28c   : > { %v3553_v7 = vadd.f32 %v1703_v32, %v1591_v48 }
 0x28e   : > { %1761 = vst [vmem:[%s3394_s10 + $0x98] sm:$0xff] %v3553_v7 }
 0x28f   : > { %v1480_v42 = vpop.f32.mrf.mxu2  ;;  %v1706_v24 = vpop.f32.mrf.mxu0 }
 0x290   : > { %v1481_v4 = vadd.f32 %v1480_v42, %v1368_v61 }
 0x291   : > { %v1370_v18 = vpop.f32.mrf.mxu1  ;;  %v1593_v14 = vpop.f32.mrf.mxu3 }
 0x292   : > { %v1594_v21 = vadd.f32 %v1593_v14, %v1481_v4  ;;  %v1371_v57 = vadd.f32 %v1370_v18, %v3313_v33 }
 0x294   : > { %v3558_v62 = vadd.f32 %v1706_v24, %v1594_v21 }
 0x296   : > { %1762 = vst [vmem:[%s3394_s10 + $0xa0] sm:$0xff] %v3558_v62 }
 0x297   : > { %v1483_v30 = vpop.f32.mrf.mxu2  ;;  %v1709_v2 = vpop.f32.mrf.mxu0 }
 0x298   : > { %v1484_v54 = vadd.f32 %v1483_v30, %v1371_v57 }
 0x299   : > { %v1373_v56 = vpop.f32.mrf.mxu1  ;;  %v1596_v15 = vpop.f32.mrf.mxu3 }
 0x29a   : > { %v1597_v1 = vadd.f32 %v1596_v15, %v1484_v54  ;;  %v1374_v5 = vadd.f32 %v1373_v56, %v3320_v49 }
 0x29c   : > { %v3563_v36 = vadd.f32 %v1709_v2, %v1597_v1 }
 0x29e   : > { %1763 = vst [vmem:[%s3394_s10 + $0xa8] sm:$0xff] %v3563_v36 }
 0x29f   : > { %v1486_v51 = vpop.f32.mrf.mxu2  ;;  %v1712_v25 = vpop.f32.mrf.mxu0 }
 0x2a0   : > { %v1487_v31 = vadd.f32 %v1486_v51, %v1374_v5 }
 0x2a1   : > { %v1376_v33 = vpop.f32.mrf.mxu1  ;;  %v1599_v40 = vpop.f32.mrf.mxu3 }
 0x2a2   : > { %v1600_v58 = vadd.f32 %v1599_v40, %v1487_v31  ;;  %v1377_v50 = vadd.f32 %v1376_v33, %v3327_v53 }
 0x2a4   : > { %v3568_v41 = vadd.f32 %v1712_v25, %v1600_v58 }
 0x2a6   : > { %1764 = vst [vmem:[%s3394_s10 + $0xb0] sm:$0xff] %v3568_v41 }
 0x2a7   : > { %v1489_v55 = vpop.f32.mrf.mxu2  ;;  %v1715_v11 = vpop.f32.mrf.mxu0 }
 0x2a8   : > { %v1490_v29 = vadd.f32 %v1489_v55, %v1377_v50 }
 0x2a9   : > { %v1379_v49 = vpop.f32.mrf.mxu1  ;;  %v1602_v38 = vpop.f32.mrf.mxu3 }
 0x2aa   : > { %v1603_v32 = vadd.f32 %v1602_v38, %v1490_v29  ;;  %v1380_v12 = vadd.f32 %v1379_v49, %v3334_v0 }
 0x2ac   : > { %v3573_v60 = vadd.f32 %v1715_v11, %v1603_v32 }
 0x2ae   : > { %1765 = vst [vmem:[%s3394_s10 + $0xb8] sm:$0xff] %v3573_v60 }
 0x2af   : > { %v1492_v19 = vpop.f32.mrf.mxu2  ;;  %v1718_v48 = vpop.f32.mrf.mxu0 }
 0x2b0   : > { %v1493_v61 = vadd.f32 %v1492_v19, %v1380_v12 }
 0x2b1   : > { %v1382_v53 = vpop.f32.mrf.mxu1  ;;  %v1605_v42 = vpop.f32.mrf.mxu3 }
 0x2b2   : > { %v1606_v24 = vadd.f32 %v1605_v42, %v1493_v61  ;;  %v1383_v18 = vadd.f32 %v1382_v53, %v3341_v52 }
 0x2b4   : > { %v3578_v4 = vadd.f32 %v1718_v48, %v1606_v24 }
 0x2b6   : > { %1766 = vst [vmem:[%s3394_s10 + $0xc0] sm:$0xff] %v3578_v4 }
 0x2b7   : > { %v1495_v14 = vpop.f32.mrf.mxu2  ;;  %v1721_v21 = vpop.f32.mrf.mxu0 }
 0x2b8   : > { %v1496_v57 = vadd.f32 %v1495_v14, %v1383_v18 }
 0x2b9   : > { %v1385_v0 = vpop.f32.mrf.mxu1  ;;  %v1608_v30 = vpop.f32.mrf.mxu3 }
 0x2ba   : > { %v1609_v2 = vadd.f32 %v1608_v30, %v1496_v57  ;;  %v1386_v56 = vadd.f32 %v1385_v0, %v3348_v6 }
 0x2bc   : > { %v3583_v54 = vadd.f32 %v1721_v21, %v1609_v2 }
 0x2be   : > { %1767 = vst [vmem:[%s3394_s10 + $0xc8] sm:$0xff] %v3583_v54 }
 0x2bf   : > { %v1498_v15 = vpop.f32.mrf.mxu2  ;;  %v1724_v1 = vpop.f32.mrf.mxu0 }
 0x2c0   : > { %v1499_v5 = vadd.f32 %v1498_v15, %v1386_v56 }
 0x2c1   : > { %v1388_v52 = vpop.f32.mrf.mxu1  ;;  %v1611_v51 = vpop.f32.mrf.mxu3 }
 0x2c2   : > { %v1612_v25 = vadd.f32 %v1611_v51, %v1499_v5  ;;  %v1389_v33 = vadd.f32 %v1388_v52, %v3355_v28 }
 0x2c4   : > { %v3588_v31 = vadd.f32 %v1724_v1, %v1612_v25 }
 0x2c6   : > { %1768 = vst [vmem:[%s3394_s10 + $0xd0] sm:$0xff] %v3588_v31 }
 0x2c7   : > { %v1501_v40 = vpop.f32.mrf.mxu2  ;;  %v1727_v58 = vpop.f32.mrf.mxu0 }
 0x2c8   : > { %v1502_v50 = vadd.f32 %v1501_v40, %v1389_v33 }
 0x2c9   : > { %v1391_v6 = vpop.f32.mrf.mxu1  ;;  %v1614_v55 = vpop.f32.mrf.mxu3 }
 0x2ca   : > { %v1615_v11 = vadd.f32 %v1614_v55, %v1502_v50  ;;  %v1392_v49 = vadd.f32 %v1391_v6, %v3362_v35 }
 0x2cc   : > { %v3593_v29 = vadd.f32 %v1727_v58, %v1615_v11 }
 0x2ce   : > { %1769 = vst [vmem:[%s3394_s10 + $0xd8] sm:$0xff] %v3593_v29 }
 0x2cf   : > { %v1504_v38 = vpop.f32.mrf.mxu2  ;;  %v1730_v32 = vpop.f32.mrf.mxu0 }
 0x2d0   : > { %v1505_v12 = vadd.f32 %v1504_v38, %v1392_v49 }
 0x2d1   : > { %v1394_v28 = vpop.f32.mrf.mxu1  ;;  %v1617_v19 = vpop.f32.mrf.mxu3 }
 0x2d2   : > { %v1618_v48 = vadd.f32 %v1617_v19, %v1505_v12  ;;  %v1395_v53 = vadd.f32 %v1394_v28, %v3369_v9 }
 0x2d4   : > { %v3598_v61 = vadd.f32 %v1730_v32, %v1618_v48 }
 0x2d6   : > { %1770 = vst [vmem:[%s3394_s10 + $0xe0] sm:$0xff] %v3598_v61 }
 0x2d7   : > { %v1507_v42 = vpop.f32.mrf.mxu2  ;;  %v1733_v24 = vpop.f32.mrf.mxu0 }
 0x2d8   : > { %v1508_v18 = vadd.f32 %v1507_v42, %v1395_v53 }
 0x2d9   : > { %v1397_v35 = vpop.f32.mrf.mxu1  ;;  %v1620_v14 = vpop.f32.mrf.mxu3 }
 0x2da   : > { %v1621_v21 = vadd.f32 %v1620_v14, %v1508_v18  ;;  %v1398_v0 = vadd.f32 %v1397_v35, %v3376_v63 }
 0x2dc   : > { %v3603_v57 = vadd.f32 %v1733_v24, %v1621_v21 }
 0x2de   : > { %1771 = vst [vmem:[%s3394_s10 + $0xe8] sm:$0xff] %v3603_v57 }
 0x2df   : > { %v1510_v30 = vpop.f32.mrf.mxu2  ;;  %v1736_v2 = vpop.f32.mrf.mxu0 }
 0x2e0   : > { %v1511_v56 = vadd.f32 %v1510_v30, %v1398_v0 }
 0x2e1   : > { %v1623_v9 = vpop.f32.mrf.mxu3  ;;  %v1400_v1 = vpop.f32.mrf.mxu1 }
 0x2e2   : > { %v1624_v15 = vadd.f32 %v1623_v9, %v1511_v56  ;;  %v1401_v52 = vadd.f32 %v1400_v1, %v3383_v34 }
 0x2e4   : > { %v3608_v5 = vadd.f32 %v1736_v2, %v1624_v15 }
 0x2e6   : > { %1772 = vst [vmem:[%s3394_s10 + $0xf0] sm:$0xff] %v3608_v5 }
 0x2e7   : > { %v1513_v51 = vpop.f32.mrf.mxu2  ;;  %v1739_v40 = vpop.f32.mrf.mxu0 }
 0x2e8   : > { %v1514_v25 = vadd.f32 %v1513_v51, %v1401_v52 }
 0x2e9   : > { %v1626_v33 = vpop.f32.mrf.mxu3 }
 0x2ea   : > { %v1627_v63 = vadd.f32 %v1626_v33, %v1514_v25  ;;  %1777 = sbr.rel (%p2021_p5) target bundleno = 753 (0x2f1), region = 32 }
 0x2ec   : > { %v3613_v58 = vadd.f32 %v1739_v40, %v1627_v63 }
 0x2ee   : > { %1773 = vst [vmem:[%s3394_s10 + $0xf8] sm:$0xff] %v3613_v58 }
 0x2ef   : > { %v2152_v50 = vmov 0.0  }
 0x2f0   : > { %1778 = vst [vmem:[%s3741_s3] sm:$0x3] %v2152_v50 }
 0x2f1 PF: > { %v1780_v34 = vadd.f32 %v3405_v44, %v3396_v47  ;;  %v1820_v6 = vmul.f32 %v3396_v47, %v3396_v47  ;;  %v1821_v55 = vmul.f32 %v3405_v44, %v3405_v44  ;;  %v1822_v49 = vmul.f32 %v3414_v20, %v3414_v20 }
 0x2f2   : > { %v1823_v32 = vmul.f32 %v3423_v8, %v3423_v8  ;;  %v1824_v19 = vmul.f32 %v3432_v17, %v3432_v17  ;;  %v1825_v44 = vmul.f32 %v3441_v46, %v3441_v46  ;;  %v1826_v42 = vmul.f32 %v3450_v22, %v3450_v22 }
 0x2f3   : > { %v1781_v11 = vadd.f32 %v1780_v34, %v3414_v20  ;;  %v1852_v12 = vadd.f32 %v1821_v55, %v1820_v6  ;;  %v1827_v18 = vmul.f32 %v3459_v59, %v3459_v59  ;;  %v1828_v14 = vmul.f32 %v3468_v37, %v3468_v37 }
 0x2f4   : > { %v1829_v0 = vmul.f32 %v3477_v43, %v3477_v43  ;;  %v1830_v2 = vmul.f32 %v3486_v23, %v3486_v23  ;;  %v1831_v9 = vmul.f32 %v3497_v10, %v3497_v10  ;;  %v1832_v1 = vmul.f32 %v3507_v39, %v3507_v39 }
 0x2f5   : > { %v1782_v38 = vadd.f32 %v1781_v11, %v3423_v8  ;;  %v1853_v47 = vadd.f32 %v1852_v12, %v1822_v49  ;;  %v1833_v51 = vmul.f32 %v3519_v45, %v3519_v45  ;;  %v1834_v33 = vmul.f32 %v3527_v26, %v3527_v26 }
 0x2f6   : > { %v1835_v63 = vmul.f32 %v3533_v13, %v3533_v13  ;;  %v1836_v34 = vmul.f32 %v3538_v27, %v3538_v27  ;;  %v1837_v55 = vmul.f32 %v3543_v16, %v3543_v16  ;;  %v1838_v49 = vmul.f32 %v3548_v3, %v3548_v3 }
 0x2f7   : > { %v1783_v28 = vadd.f32 %v1782_v38, %v3432_v17  ;;  %v1854_v53 = vadd.f32 %v1853_v47, %v1823_v32  ;;  %v1839_v32 = vmul.f32 %v3553_v7, %v3553_v7  ;;  %v1841_v47 = vmul.f32 %v3563_v36, %v3563_v36 }
 0x2f9   : > { %v1784_v48 = vadd.f32 %v1783_v28, %v3441_v46  ;;  %v1855_v24 = vadd.f32 %v1854_v53, %v1824_v19  ;;  %v1840_v28 = vmul.f32 %v3558_v62, %v3558_v62 }
 0x2fb   : > { %v1785_v20 = vadd.f32 %v1784_v48, %v3450_v22  ;;  %v1856_v35 = vadd.f32 %v1855_v24, %v1825_v44  ;;  %v1842_v44 = vmul.f32 %v3568_v41, %v3568_v41  ;;  %v1844_v24 = vmul.f32 %v3578_v4, %v3578_v4 }
 0x2fd   : > { %v1786_v8 = vadd.f32 %v1785_v20, %v3459_v59  ;;  %v1857_v21 = vadd.f32 %v1856_v35, %v1826_v42  ;;  %v1843_v20 = vmul.f32 %v3573_v60, %v3573_v60 }
 0x2ff   : > { %v1787_v17 = vadd.f32 %v1786_v8, %v3468_v37  ;;  %v1858_v30 = vadd.f32 %v1857_v21, %v1827_v18  ;;  %v1845_v18 = vmul.f32 %v3583_v54, %v3583_v54  ;;  %v1847_v21 = vmul.f32 %v3593_v29, %v3593_v29 }
 0x301   : > { %v1788_v46 = vadd.f32 %v1787_v17, %v3477_v43  ;;  %v1859_v56 = vadd.f32 %v1858_v30, %v1828_v14  ;;  %v1846_v17 = vmul.f32 %v3588_v31, %v3588_v31 }
 0x303   : > { %v1789_v22 = vadd.f32 %v1788_v46, %v3486_v23  ;;  %v1860_v15 = vadd.f32 %v1859_v56, %v1829_v0  ;;  %v1848_v0 = vmul.f32 %v3598_v61, %v3598_v61  ;;  %v1850_v56 = vmul.f32 %v3608_v5, %v3608_v5 }
 0x305   : > { %v1790_v59 = vadd.f32 %v1789_v22, %v3497_v10  ;;  %v1861_v52 = vadd.f32 %v1860_v15, %v1830_v2  ;;  %v1849_v22 = vmul.f32 %v3603_v57, %v3603_v57 }
 0x307   : > { %v1791_v37 = vadd.f32 %v1790_v59, %v3507_v39  ;;  %v1862_v25 = vadd.f32 %v1861_v52, %v1831_v9  ;;  %v1851_v9 = vmul.f32 %v3613_v58, %v3613_v58 }
 0x309   : > { %v1792_v43 = vadd.f32 %v1791_v37, %v3519_v45  ;;  %v1863_v40 = vadd.f32 %v1862_v25, %v1832_v1 }
 0x30b   : > { %v1793_v23 = vadd.f32 %v1792_v43, %v3527_v26  ;;  %v1864_v50 = vadd.f32 %v1863_v40, %v1833_v51 }
 0x30d   : > { %v1794_v10 = vadd.f32 %v1793_v23, %v3533_v13  ;;  %v1865_v6 = vadd.f32 %v1864_v50, %v1834_v33 }
 0x30f   : > { %v1795_v39 = vadd.f32 %v1794_v10, %v3538_v27  ;;  %v1866_v11 = vadd.f32 %v1865_v6, %v1835_v63 }
 0x311   : > { %v1796_v45 = vadd.f32 %v1795_v39, %v3543_v16  ;;  %v1867_v38 = vadd.f32 %v1866_v11, %v1836_v34 }
 0x313   : > { %v1797_v26 = vadd.f32 %v1796_v45, %v3548_v3  ;;  %v1868_v12 = vadd.f32 %v1867_v38, %v1837_v55 }
 0x315   : > { %v1798_v13 = vadd.f32 %v1797_v26, %v3553_v7  ;;  %v1869_v19 = vadd.f32 %v1868_v12, %v1838_v49 }
 0x317   : > { %v1799_v27 = vadd.f32 %v1798_v13, %v3558_v62  ;;  %v1870_v48 = vadd.f32 %v1869_v19, %v1839_v32 }
 0x319   : > { %v1800_v16 = vadd.f32 %v1799_v27, %v3563_v36  ;;  %v1871_v53 = vadd.f32 %v1870_v48, %v1840_v28 }
 0x31b   : > { %v1801_v3 = vadd.f32 %v1800_v16, %v3568_v41  ;;  %v1872_v42 = vadd.f32 %v1871_v53, %v1841_v47 }
 0x31d   : > { %v1802_v7 = vadd.f32 %v1801_v3, %v3573_v60  ;;  %v1873_v8 = vadd.f32 %v1872_v42, %v1842_v44 }
 0x31f   : > { %v1803_v62 = vadd.f32 %v1802_v7, %v3578_v4  ;;  %v1874_v35 = vadd.f32 %v1873_v8, %v1843_v20 }
 0x321   : > { %v1804_v36 = vadd.f32 %v1803_v62, %v3583_v54  ;;  %v1875_v14 = vadd.f32 %v1874_v35, %v1844_v24 }
 0x323   : > { %v1805_v41 = vadd.f32 %v1804_v36, %v3588_v31  ;;  %v1876_v46 = vadd.f32 %v1875_v14, %v1845_v18 }
 0x325   : > { %v1806_v60 = vadd.f32 %v1805_v41, %v3593_v29  ;;  %v1877_v30 = vadd.f32 %v1876_v46, %v1846_v17 }
 0x327   : > { %v1807_v4 = vadd.f32 %v1806_v60, %v3598_v61  ;;  %v1878_v2 = vadd.f32 %v1877_v30, %v1847_v21 }
 0x329   : > { %v1808_v54 = vadd.f32 %v1807_v4, %v3603_v57  ;;  %v1879_v59 = vadd.f32 %v1878_v2, %v1848_v0 }
 0x32b   : > { %v1809_v31 = vadd.f32 %v1808_v54, %v3608_v5  ;;  %v1880_v15 = vadd.f32 %v1879_v59, %v1849_v22  ;;  %v1779_v5 = vld [vmem:[%s3741_s3] sm:$0x1] }
 0x32d   : > { %v1810_v29 = vadd.f32 %v1809_v31, %v3613_v58  ;;  %v1881_v37 = vadd.f32 %v1880_v15, %v1850_v56  ;;  %v1819_v58 = vld [vmem:[%s3741_s3 + $0x1] sm:$0x1] }
 0x32f   : > { %v1811_v61 = vrot.slane %v1810_v29, 4  ;;  %v1882_v52 = vadd.f32 %v1881_v37, %v1851_v9 }
 0x331   : > { %v1812_v1 = vadd.f32 %v1811_v61, %v1810_v29  ;;  %v1883_v51 = vrot.slane %v1882_v52, 4 }
 0x333   : > { %v1813_v43 = vrot.slane %v1812_v1, 2  ;;  %v1884_v25 = vadd.f32 %v1883_v51, %v1882_v52 }
 0x335   : > { %v1814_v57 = vadd.f32 %v1813_v43, %v1812_v1  ;;  %v1885_v33 = vrot.slane %v1884_v25, 2 }
 0x337   : > { %v1815_v23 = vrot.slane %v1814_v57, 1  ;;  %v1886_v10 = vadd.f32 %v1885_v33, %v1884_v25 }
 0x339   : > { %v1816_v40 = vadd.f32 %v1815_v23, %v1814_v57  ;;  %v1887_v50 = vrot.slane %v1886_v10, 1 }
 0x33b   : > { %v1817_v63 = vadd.f32 %v1816_v40, %v1779_v5  ;;  %v1888_v39 = vadd.f32 %v1887_v50, %v1886_v10 }
 0x33d   : > { %1818 = vst [vmem:[%s3741_s3] sm:$0x1] %v1817_v63  ;;  %v1889_v34 = vadd.f32 %v1888_v39, %v1819_v58 }
 0x33f   : > { %1890 = vst [vmem:[%s3741_s3 + $0x1] sm:$0x1] %v1889_v34 }
 0x340 PF: > { %s14_s14 = sadd.s32 1, %s2150_s14   ;;  %s3886_s12 = smov %s2146_s13 }
 0x341   : > { %p11_p6 = scmp.ge.s32.totalorder %s14_s14, 4   ;;  %s3887_s13 = smov %s3889_s15 }
 0x343   :  { %13 = sbr.rel (!%p11_p6) target bundleno = 2 (0x2), region = 77 }

</bundles_post_ra>
